<compile_context>
chip_gen: v7x
topology: tpu7x:2x2x1
jax: 0.10.0
libtpu: 0.0.40
codegen_flags: <defaults>
</compile_context>

<pallas_src>
import functools

import numpy as np

import jax
import jax.numpy as jnp
from jax.experimental import pallas as pl
from jax.experimental.pallas import tpu as pltpu


# ---------------------------------------------------------------------------
# Fused decoder kernel (one grid step == one sample)
# ---------------------------------------------------------------------------
def _decoder_kernel(z_ref, w0_ref, b0_ref,
                    w1_ref, b1_ref,
                    w2_ref, b2_ref,
                    w3_ref, b3_ref,
                    w4_ref, o_ref,
                    a0_ref, a1_ref, a2_ref, a3_ref,
                    *, strided_interleave=True):
    f32 = jnp.float32
    bf16 = jnp.bfloat16

    # ---- first_upconv: ConvTranspose2d(in_dim, 8w, 4, 1, 0) + bias + ReLU ----
    z = z_ref[0].astype(bf16)                                    # (1, in_dim)
    h0 = jnp.dot(z, w0_ref[...], preferred_element_type=f32)     # (1, 16*C0)
    h0 = jnp.maximum(h0 + b0_ref[...], 0.0)
    lane0 = a0_ref.shape[1]                                      # 4*C0 = 256
    zero0 = jnp.zeros((1, lane0), f32)
    a0_ref[0:1, :] = zero0                                       # top pad row
    a0_ref[a0_ref.shape[0] - 1:a0_ref.shape[0], :] = zero0       # bottom pad row
    for ky in range(4):                                          # lane block ky -> spatial row ky
        a0_ref[ky + 1:ky + 2, :] = h0[:, ky * lane0:(ky + 1) * lane0]

    # ---- stride-2 ConvTranspose2d(k=4, s=2, p=1) as 4 accumulating dots ------
    # Output row 2m+p reads padded input rows m+p and m+p+1.  The per-parity
    # weight blocks w_ref[p, s_idx] bake in the 4x4 taps and the x-direction
    # stride-2 scatter (lanes = (ix, ci) -> (ox, co)).
    def upconv(a_ref, w_ref, b_ref):
        h = a_ref.shape[0] - 2                                   # input spatial rows
        win0 = a_ref[0:h, :].astype(bf16)
        win1 = a_ref[1:h + 1, :].astype(bf16)
        win2 = a_ref[2:h + 2, :].astype(bf16)
        p0 = (jnp.dot(win0, w_ref[0, 0, :, :], preferred_element_type=f32) +
              jnp.dot(win1, w_ref[0, 1, :, :], preferred_element_type=f32))
        p1 = (jnp.dot(win1, w_ref[1, 0, :, :], preferred_element_type=f32) +
              jnp.dot(win2, w_ref[1, 1, :, :], preferred_element_type=f32))
        if b_ref is not None:                                    # bias + ReLU (f32)
            b = b_ref[...]
            p0 = jnp.maximum(p0 + b, 0.0)
            p1 = jnp.maximum(p1 + b, 0.0)
        return p0, p1

    # Scatter even/odd output rows into the next padded activation.  Pad rows
    # are re-zeroed every grid step: scratch persists across samples and is
    # uninitialized on the first step.
    def interleave_store(a_out, p0, p1):
        h, lanes = p0.shape
        zrow = jnp.zeros((1, lanes), f32)
        a_out[0:1, :] = zrow
        a_out[2 * h + 1:2 * h + 2, :] = zrow
        if strided_interleave:
            a_out[pl.ds(1, h, stride=2), :] = p0                 # output rows 0,2,...
            a_out[pl.ds(2, h, stride=2), :] = p1                 # output rows 1,3,...
        else:
            for m in range(h):                                   # safe per-row fallback
                a_out[1 + 2 * m:2 + 2 * m, :] = p0[m:m + 1, :]
                a_out[2 + 2 * m:3 + 2 * m, :] = p1[m:m + 1, :]

    for a_in, w_ref, b_ref, a_out in ((a0_ref, w1_ref, b1_ref, a1_ref),
                                      (a1_ref, w2_ref, b2_ref, a2_ref),
                                      (a2_ref, w3_ref, b3_ref, a3_ref)):
        p0, p1 = upconv(a_in, w_ref, b_ref)
        interleave_store(a_out, p0, p1)

    # ---- last layer: ConvTranspose2d(w, out_c, 4, 2, 1, bias=False), no act --
    p0, p1 = upconv(a3_ref, w4_ref, None)
    o_ref[0, 0, :, :] = p0.astype(o_ref.dtype)                   # output rows 2m
    o_ref[0, 1, :, :] = p1.astype(o_ref.dtype)                   # output rows 2m+1


# ---------------------------------------------------------------------------
# Weight preprocessing (one-time, numpy): PyTorch layout -> kernel operands
# ---------------------------------------------------------------------------
def _expand_stride2_weight_parity(w, spatial):
    """(Cin, Cout, 4, 4) ConvTranspose2d(stride=2, pad=1) weight ->
    per-output-row-parity dense blocks of shape (2, 2, W*Cin, Wo*Cout).

    Output row oy = 2*m + p reads padded input rows m + p + s_idx
    (s_idx in {0,1}), kernel row ky = 3 - p - 2*s_idx; within a row,
    output col ox = 2*ix - 1 + kx.  The third row shift that contributes
    nothing to parity p is simply not stored (1/3 fewer weight bytes)."""
    cin, cout, k, _ = w.shape
    wi, wo = spatial, 2 * spatial
    m = np.zeros((2, 2, wi, cin, wo, cout), np.float32)
    for p in range(2):
        for s_idx in range(2):
            ky = 3 - p - 2 * s_idx
            for ix in range(wi):
                for kx in range(k):
                    ox = 2 * ix - 1 + kx
                    if 0 <= ox < wo:
                        m[p, s_idx, ix, :, ox, :] = w[:, :, ky, kx]
    return m.reshape(2, 2, wi * cin, wo * cout)


def preprocess_params(params):
    """Repack PyTorch-layout ConvTranspose2d params into the fused kernel's
    operands (matmul matrices in bf16, biases in f32)."""
    w0, b0 = params["first"]
    w0 = np.asarray(w0)
    b0 = np.asarray(b0)
    in_dim, c0, k, _ = w0.shape
    # columns ordered (ky, kx, c) so lane block ky is one 4x4 output row
    w0_mat = w0.transpose(0, 2, 3, 1).reshape(in_dim, k * k * c0)
    ops = [jnp.asarray(w0_mat, jnp.bfloat16),
           jnp.asarray(np.tile(b0, k * k)[None, :], jnp.float32)]
    spatial = k                      # 4x4 feature map enters the first stride-2 layer
    convs = params["convs"]
    for i, (w, b) in enumerate(convs):
        w = np.asarray(w)
        wo = 2 * spatial
        ops.append(jnp.asarray(_expand_stride2_weight_parity(w, spatial),
                               jnp.bfloat16))
        if i < len(convs) - 1:       # last layer has no bias / activation
            ops.append(jnp.asarray(np.tile(np.asarray(b), wo)[None, :],
                                   jnp.float32))
        spatial = wo
    return ops


# ---------------------------------------------------------------------------
# Forward pass wrapper
# ---------------------------------------------------------------------------
def dcgan_decoder_forward(z, kernel_ops, *, width=8, out_channels=3,
                          strided_interleave=True):
    n, in_dim = z.shape
    n_up = 4                                               # stride-2 layers (out_size==64)
    h_sizes = [4 * 2 ** i for i in range(n_up)]            # 4, 8, 16, 32
    c_sizes = [width * 8 // 2 ** i for i in range(n_up)]   # 64, 32, 16, 8
    h_last = h_sizes[-1]                                   # 32
    out_size = 2 * h_last                                  # 64
    par_lane = out_size * out_channels                     # 192 lanes per row parity

    def _full_spec(shape):
        zeros = (0,) * len(shape)
        return pl.BlockSpec(shape, lambda i, _z=zeros: _z)

    grid_spec = pltpu.PrefetchScalarGridSpec(
        num_scalar_prefetch=0,
        grid=(n,),
        in_specs=[pl.BlockSpec((1, 1, in_dim), lambda i: (i, 0, 0))] +
                 [_full_spec(op.shape) for op in kernel_ops],
        out_specs=pl.BlockSpec((1, 2, h_last, par_lane), lambda i: (i, 0, 0, 0)),
        scratch_shapes=[pltpu.VMEM((h + 2, h * c), jnp.float32)
                        for h, c in zip(h_sizes, c_sizes)],
    )
    kernel = functools.partial(_decoder_kernel,
                               strided_interleave=strided_interleave)
    raw = pl.pallas_call(
        kernel,
        out_shape=jax.ShapeDtypeStruct((n, 2, h_last, par_lane), jnp.float32),
        grid_spec=grid_spec,
        compiler_params=pltpu.CompilerParams(
            dimension_semantics=("parallel",),
            vmem_limit_bytes=32 * 1024 * 1024),
    )(z.reshape(n, 1, in_dim), *kernel_ops)

    # (N, p, m, [ox, co]) -> NCHW (N, C, 64, 64), output spatial row = 2*m + p
    out = raw.reshape(n, 2, h_last, out_size, out_channels)
    return out.transpose(0, 4, 2, 1, 3).reshape(n, out_channels, out_size, out_size)


# ---------------------------------------------------------------------------
# Parameter init (deterministic, PyTorch-shaped) and pure-XLA reference
# ---------------------------------------------------------------------------
def init_params(key, in_dim, width, out_channels):
    def conv_t_params(k, cin, cout, ksize, use_bias=True):
        kw, kb = jax.random.split(k)
        bound = 1.0 / float(np.sqrt(cin * ksize * ksize))
        w = jax.random.uniform(kw, (cin, cout, ksize, ksize), jnp.float32, -bound, bound)
        b = (jax.random.uniform(kb, (cout,), jnp.float32, -bound, bound)
             if use_bias else None)
        return w, b

    keys = jax.random.split(key, 5)
    return {
        "first": conv_t_params(keys[0], in_dim, width * 8, 4, True),
        "convs": [
            conv_t_params(keys[1], width * 8, width * 4, 4, True),
            conv_t_params(keys[2], width * 4, width * 2, 4, True),
            conv_t_params(keys[3], width * 2, width, 4, True),
            # out_size == 64 branch: k=4, s=2, p=1, bias=False, no activation
            conv_t_params(keys[4], width, out_channels, 4, False),
        ],
    }


def _convt_ref(x_nchw, w, b, stride, padding):
    """PyTorch ConvTranspose2d via dilated regular conv (XLA reference)."""
    k = w.shape[2]
    w_flip = jnp.flip(w, (2, 3)).transpose(1, 0, 2, 3)      # (Cout, Cin, K, K)
    pad = k - 1 - padding
    out = jax.lax.conv_general_dilated(
        x_nchw, w_flip, window_strides=(1, 1),
        padding=[(pad, pad), (pad, pad)],
        lhs_dilation=(stride, stride), rhs_dilation=(1, 1),
        dimension_numbers=("NCHW", "OIHW", "NCHW"))
    if b is not None:
        out = out + b[None, :, None, None]
    return out


def _reference_forward(z, params):
    w0, b0 = params["first"]
    x = z.reshape(z.shape[0], z.shape[1], 1, 1)
    x = jax.nn.relu(_convt_ref(x, w0, b0, stride=1, padding=0))
    for w, b in params["convs"][:-1]:
        x = jax.nn.relu(_convt_ref(x, w, b, stride=2, padding=1))
    w_last, _ = params["convs"][-1]
    return _convt_ref(x, w_last, None, stride=2, padding=1)


if __name__ == "__main__":
    N, in_dim, width, out_channels = 2, 16, 8, 3

    key = jax.random.PRNGKey(0)
    kz, kp = jax.random.split(key)
    z = jax.random.normal(kz, (N, in_dim), jnp.float32)
    params = init_params(kp, in_dim, width, out_channels)
    kernel_ops = preprocess_params(params)

    def run(strided):
        return jax.block_until_ready(
            dcgan_decoder_forward(z, kernel_ops, width=width,
                                  out_channels=out_channels,
                                  strided_interleave=strided))

    try:
        out = run(True)
    except Exception:
        # TODO(synk): toolchain without strided sublane stores -> per-row scatter.
        out = run(False)

    assert out.shape == (N, out_channels, 64, 64), out.shape
    assert out.dtype == jnp.float32
    assert bool(jnp.all(jnp.isfinite(out)))

    # numerical check vs pure-XLA reference (bf16 matmul inputs => loose tol)
    ref = _reference_forward(z, params)
    scale = float(jnp.max(jnp.abs(ref)))
    err = float(jnp.max(jnp.abs(out - ref)))
    assert err <= 5e-2 * scale + 1e-5, (err, scale)

    print("KERNEL_OK")
</pallas_src>

<mosaic_0001>
module attributes {stable_mosaic.version = 11 : i64} {
  func.func @_decoder_kernel(%arg0: i32, %arg1: memref<1x1x16xf32, #tpu.memory_space<vmem>>, %arg2: memref<16x1024xbf16, #tpu.memory_space<vmem>>, %arg3: memref<1x1024xf32, #tpu.memory_space<vmem>>, %arg4: memref<2x2x256x256xbf16, #tpu.memory_space<vmem>>, %arg5: memref<1x256xf32, #tpu.memory_space<vmem>>, %arg6: memref<2x2x256x256xbf16, #tpu.memory_space<vmem>>, %arg7: memref<1x256xf32, #tpu.memory_space<vmem>>, %arg8: memref<2x2x256x256xbf16, #tpu.memory_space<vmem>>, %arg9: memref<1x256xf32, #tpu.memory_space<vmem>>, %arg10: memref<2x2x256x192xbf16, #tpu.memory_space<vmem>>, %arg11: memref<1x2x32x192xf32, #tpu.memory_space<vmem>>, %arg12: memref<6x256xf32, #tpu.memory_space<vmem>>, %arg13: memref<10x256xf32, #tpu.memory_space<vmem>>, %arg14: memref<18x256xf32, #tpu.memory_space<vmem>>, %arg15: memref<34x256xf32, #tpu.memory_space<vmem>>) attributes {dimension_semantics = [#tpu.dimension_semantics<parallel>], iteration_bounds = array<i64: 2>, scalar_prefetch = 0 : i64, scratch_operands = 4 : i64, tpu.core_type = #tpu.core_type<tc>, window_params = [{transform_indices = @transform_0, window_bounds = array<i64: 1, 1, 16>}, {pipeline_mode = #tpu.pipeline_mode<synchronous>, transform_indices = @transform_1, window_bounds = array<i64: 16, 1024>}, {pipeline_mode = #tpu.pipeline_mode<synchronous>, transform_indices = @transform_2, window_bounds = array<i64: 1, 1024>}, {pipeline_mode = #tpu.pipeline_mode<synchronous>, transform_indices = @transform_3, window_bounds = array<i64: 2, 2, 256, 256>}, {pipeline_mode = #tpu.pipeline_mode<synchronous>, transform_indices = @transform_4, window_bounds = array<i64: 1, 256>}, {pipeline_mode = #tpu.pipeline_mode<synchronous>, transform_indices = @transform_5, window_bounds = array<i64: 2, 2, 256, 256>}, {pipeline_mode = #tpu.pipeline_mode<synchronous>, transform_indices = @transform_6, window_bounds = array<i64: 1, 256>}, {pipeline_mode = #tpu.pipeline_mode<synchronous>, transform_indices = @transform_7, window_bounds = array<i64: 2, 2, 256, 256>}, {pipeline_mode = #tpu.pipeline_mode<synchronous>, transform_indices = @transform_8, window_bounds = array<i64: 1, 256>}, {pipeline_mode = #tpu.pipeline_mode<synchronous>, transform_indices = @transform_9, window_bounds = array<i64: 2, 2, 256, 192>}, {transform_indices = @transform_10, window_bounds = array<i64: 1, 2, 32, 192>}]} {
    %c0 = arith.constant 0 : index
    %c0_0 = arith.constant 0 : index
    %c0_1 = arith.constant 0 : index
    %0 = vector.load %arg1[%c0, %c0_0, %c0_1] : memref<1x1x16xf32, #tpu.memory_space<vmem>>, vector<1x1x16xf32>
    %1 = vector.shape_cast %0 : vector<1x1x16xf32> to vector<1x16xf32>
    %2 = arith.truncf %1 : vector<1x16xf32> to vector<1x16xbf16>
    %c0_2 = arith.constant 0 : index
    %c0_3 = arith.constant 0 : index
    %3 = vector.load %arg2[%c0_2, %c0_3] : memref<16x1024xbf16, #tpu.memory_space<vmem>>, vector<16x1024xbf16>
    %cst = arith.constant dense<0.000000e+00> : vector<1x1024xf32>
    %4 = tpu.matmul %2, %3, %cst {dimension_numbers = #tpu.dot_dimension_numbers<[1], [0], [0], [1], [0, 0, 1, 1], [], []>} : vector<1x16xbf16>, vector<16x1024xbf16>, vector<1x1024xf32> -> vector<1x1024xf32>
    %c0_4 = arith.constant 0 : index
    %c0_5 = arith.constant 0 : index
    %5 = vector.load %arg3[%c0_4, %c0_5] : memref<1x1024xf32, #tpu.memory_space<vmem>>, vector<1x1024xf32>
    %6 = arith.addf %4, %5 : vector<1x1024xf32>
    %cst_6 = arith.constant 0.000000e+00 : f32
    %7 = vector.broadcast %cst_6 : f32 to vector<1x1024xf32>
    %8 = arith.maximumf %6, %7 : vector<1x1024xf32>
    %cst_7 = arith.constant 0.000000e+00 : f32
    %9 = vector.broadcast %cst_7 : f32 to vector<1x256xf32>
    %c0_8 = arith.constant 0 : index
    %c0_9 = arith.constant 0 : index
    %10 = vector.load %arg12[%c0_8, %c0_9] : memref<6x256xf32, #tpu.memory_space<vmem>>, vector<1x256xf32>
    tpu.vector_store %arg12[%c0_8, %c0_9], %9 {strides = array<i32>} : memref<6x256xf32, #tpu.memory_space<vmem>>, vector<1x256xf32>,
    %c5 = arith.constant 5 : index
    %c0_10 = arith.constant 0 : index
    %11 = vector.load %arg12[%c5, %c0_10] : memref<6x256xf32, #tpu.memory_space<vmem>>, vector<1x256xf32>
    tpu.vector_store %arg12[%c5, %c0_10], %9 {strides = array<i32>} : memref<6x256xf32, #tpu.memory_space<vmem>>, vector<1x256xf32>,
    %12 = vector.extract_strided_slice %8 {offsets = [0, 0], sizes = [1, 256], strides = [1, 1]} : vector<1x1024xf32> to vector<1x256xf32>
    %c1 = arith.constant 1 : index
    %c0_11 = arith.constant 0 : index
    %13 = vector.load %arg12[%c1, %c0_11] : memref<6x256xf32, #tpu.memory_space<vmem>>, vector<1x256xf32>
    tpu.vector_store %arg12[%c1, %c0_11], %12 {strides = array<i32>} : memref<6x256xf32, #tpu.memory_space<vmem>>, vector<1x256xf32>,
    %14 = vector.extract_strided_slice %8 {offsets = [0, 256], sizes = [1, 256], strides = [1, 1]} : vector<1x1024xf32> to vector<1x256xf32>
    %c2 = arith.constant 2 : index
    %c0_12 = arith.constant 0 : index
    %15 = vector.load %arg12[%c2, %c0_12] : memref<6x256xf32, #tpu.memory_space<vmem>>, vector<1x256xf32>
    tpu.vector_store %arg12[%c2, %c0_12], %14 {strides = array<i32>} : memref<6x256xf32, #tpu.memory_space<vmem>>, vector<1x256xf32>,
    %16 = vector.extract_strided_slice %8 {offsets = [0, 512], sizes = [1, 256], strides = [1, 1]} : vector<1x1024xf32> to vector<1x256xf32>
    %c3 = arith.constant 3 : index
    %c0_13 = arith.constant 0 : index
    %17 = vector.load %arg12[%c3, %c0_13] : memref<6x256xf32, #tpu.memory_space<vmem>>, vector<1x256xf32>
    tpu.vector_store %arg12[%c3, %c0_13], %16 {strides = array<i32>} : memref<6x256xf32, #tpu.memory_space<vmem>>, vector<1x256xf32>,
    %18 = vector.extract_strided_slice %8 {offsets = [0, 768], sizes = [1, 256], strides = [1, 1]} : vector<1x1024xf32> to vector<1x256xf32>
    %c4 = arith.constant 4 : index
    %c0_14 = arith.constant 0 : index
    %19 = vector.load %arg12[%c4, %c0_14] : memref<6x256xf32, #tpu.memory_space<vmem>>, vector<1x256xf32>
    tpu.vector_store %arg12[%c4, %c0_14], %18 {strides = array<i32>} : memref<6x256xf32, #tpu.memory_space<vmem>>, vector<1x256xf32>,
    %c0_15 = arith.constant 0 : index
    %c0_16 = arith.constant 0 : index
    %20 = vector.load %arg12[%c0_15, %c0_16] : memref<6x256xf32, #tpu.memory_space<vmem>>, vector<4x256xf32>
    %21 = arith.truncf %20 : vector<4x256xf32> to vector<4x256xbf16>
    %c1_17 = arith.constant 1 : index
    %c0_18 = arith.constant 0 : index
    %22 = vector.load %arg12[%c1_17, %c0_18] : memref<6x256xf32, #tpu.memory_space<vmem>>, vector<4x256xf32>
    %23 = arith.truncf %22 : vector<4x256xf32> to vector<4x256xbf16>
    %c2_19 = arith.constant 2 : index
    %c0_20 = arith.constant 0 : index
    %24 = vector.load %arg12[%c2_19, %c0_20] : memref<6x256xf32, #tpu.memory_space<vmem>>, vector<4x256xf32>
    %25 = arith.truncf %24 : vector<4x256xf32> to vector<4x256xbf16>
    %c0_21 = arith.constant 0 : index
    %c0_22 = arith.constant 0 : index
    %c0_23 = arith.constant 0 : index
    %c0_24 = arith.constant 0 : index
    %26 = vector.load %arg4[%c0_21, %c0_22, %c0_23, %c0_24] : memref<2x2x256x256xbf16, #tpu.memory_space<vmem>>, vector<1x1x256x256xbf16>
    %27 = vector.shape_cast %26 : vector<1x1x256x256xbf16> to vector<256x256xbf16>
    %cst_25 = arith.constant dense<0.000000e+00> : vector<4x256xf32>
    %28 = tpu.matmul %21, %27, %cst_25 {dimension_numbers = #tpu.dot_dimension_numbers<[1], [0], [0], [1], [0, 0, 1, 1], [], []>} : vector<4x256xbf16>, vector<256x256xbf16>, vector<4x256xf32> -> vector<4x256xf32>
    %c0_26 = arith.constant 0 : index
    %c1_27 = arith.constant 1 : index
    %c0_28 = arith.constant 0 : index
    %c0_29 = arith.constant 0 : index
    %29 = vector.load %arg4[%c0_26, %c1_27, %c0_28, %c0_29] : memref<2x2x256x256xbf16, #tpu.memory_space<vmem>>, vector<1x1x256x256xbf16>
    %30 = vector.shape_cast %29 : vector<1x1x256x256xbf16> to vector<256x256xbf16>
    %cst_30 = arith.constant dense<0.000000e+00> : vector<4x256xf32>
    %31 = tpu.matmul %23, %30, %cst_30 {dimension_numbers = #tpu.dot_dimension_numbers<[1], [0], [0], [1], [0, 0, 1, 1], [], []>} : vector<4x256xbf16>, vector<256x256xbf16>, vector<4x256xf32> -> vector<4x256xf32>
    %32 = arith.addf %28, %31 : vector<4x256xf32>
    %c1_31 = arith.constant 1 : index
    %c0_32 = arith.constant 0 : index
    %c0_33 = arith.constant 0 : index
    %c0_34 = arith.constant 0 : index
    %33 = vector.load %arg4[%c1_31, %c0_32, %c0_33, %c0_34] : memref<2x2x256x256xbf16, #tpu.memory_space<vmem>>, vector<1x1x256x256xbf16>
    %34 = vector.shape_cast %33 : vector<1x1x256x256xbf16> to vector<256x256xbf16>
    %cst_35 = arith.constant dense<0.000000e+00> : vector<4x256xf32>
    %35 = tpu.matmul %23, %34, %cst_35 {dimension_numbers = #tpu.dot_dimension_numbers<[1], [0], [0], [1], [0, 0, 1, 1], [], []>} : vector<4x256xbf16>, vector<256x256xbf16>, vector<4x256xf32> -> vector<4x256xf32>
    %c1_36 = arith.constant 1 : index
    %c1_37 = arith.constant 1 : index
    %c0_38 = arith.constant 0 : index
    %c0_39 = arith.constant 0 : index
    %36 = vector.load %arg4[%c1_36, %c1_37, %c0_38, %c0_39] : memref<2x2x256x256xbf16, #tpu.memory_space<vmem>>, vector<1x1x256x256xbf16>
    %37 = vector.shape_cast %36 : vector<1x1x256x256xbf16> to vector<256x256xbf16>
    %cst_40 = arith.constant dense<0.000000e+00> : vector<4x256xf32>
    %38 = tpu.matmul %25, %37, %cst_40 {dimension_numbers = #tpu.dot_dimension_numbers<[1], [0], [0], [1], [0, 0, 1, 1], [], []>} : vector<4x256xbf16>, vector<256x256xbf16>, vector<4x256xf32> -> vector<4x256xf32>
    %39 = arith.addf %35, %38 : vector<4x256xf32>
    %c0_41 = arith.constant 0 : index
    %c0_42 = arith.constant 0 : index
    %40 = vector.load %arg5[%c0_41, %c0_42] : memref<1x256xf32, #tpu.memory_space<vmem>>, vector<1x256xf32>
    %41 = vector.broadcast %40 : vector<1x256xf32> to vector<4x256xf32>
    %42 = arith.addf %32, %41 : vector<4x256xf32>
    %cst_43 = arith.constant 0.000000e+00 : f32
    %43 = vector.broadcast %cst_43 : f32 to vector<4x256xf32>
    %44 = arith.maximumf %42, %43 : vector<4x256xf32>
    %45 = vector.broadcast %40 : vector<1x256xf32> to vector<4x256xf32>
    %46 = arith.addf %39, %45 : vector<4x256xf32>
    %cst_44 = arith.constant 0.000000e+00 : f32
    %47 = vector.broadcast %cst_44 : f32 to vector<4x256xf32>
    %48 = arith.maximumf %46, %47 : vector<4x256xf32>
    %cst_45 = arith.constant 0.000000e+00 : f32
    %49 = vector.broadcast %cst_45 : f32 to vector<1x256xf32>
    %c0_46 = arith.constant 0 : index
    %c0_47 = arith.constant 0 : index
    %50 = vector.load %arg13[%c0_46, %c0_47] : memref<10x256xf32, #tpu.memory_space<vmem>>, vector<1x256xf32>
    tpu.vector_store %arg13[%c0_46, %c0_47], %49 {strides = array<i32>} : memref<10x256xf32, #tpu.memory_space<vmem>>, vector<1x256xf32>,
    %c9 = arith.constant 9 : index
    %c0_48 = arith.constant 0 : index
    %51 = vector.load %arg13[%c9, %c0_48] : memref<10x256xf32, #tpu.memory_space<vmem>>, vector<1x256xf32>
    tpu.vector_store %arg13[%c9, %c0_48], %49 {strides = array<i32>} : memref<10x256xf32, #tpu.memory_space<vmem>>, vector<1x256xf32>,
    %c1_49 = arith.constant 1 : index
    %c0_50 = arith.constant 0 : index
    %52 = tpu.strided_load %arg13[%c1_49, %c0_50] {strides = array<i32: 2, 1>} : memref<10x256xf32, #tpu.memory_space<vmem>>, vector<4x256xf32>
    tpu.strided_store %arg13[%c1_49, %c0_50], %44 {strides = array<i32: 2, 1>} : memref<10x256xf32, #tpu.memory_space<vmem>>, vector<4x256xf32>
    %c2_51 = arith.constant 2 : index
    %c0_52 = arith.constant 0 : index
    %53 = tpu.strided_load %arg13[%c2_51, %c0_52] {strides = array<i32: 2, 1>} : memref<10x256xf32, #tpu.memory_space<vmem>>, vector<4x256xf32>
    tpu.strided_store %arg13[%c2_51, %c0_52], %48 {strides = array<i32: 2, 1>} : memref<10x256xf32, #tpu.memory_space<vmem>>, vector<4x256xf32>
    %c0_53 = arith.constant 0 : index
    %c0_54 = arith.constant 0 : index
    %54 = vector.load %arg13[%c0_53, %c0_54] : memref<10x256xf32, #tpu.memory_space<vmem>>, vector<8x256xf32>
    %55 = arith.truncf %54 : vector<8x256xf32> to vector<8x256xbf16>
    %c1_55 = arith.constant 1 : index
    %c0_56 = arith.constant 0 : index
    %56 = vector.load %arg13[%c1_55, %c0_56] : memref<10x256xf32, #tpu.memory_space<vmem>>, vector<8x256xf32>
    %57 = arith.truncf %56 : vector<8x256xf32> to vector<8x256xbf16>
    %c2_57 = arith.constant 2 : index
    %c0_58 = arith.constant 0 : index
    %58 = vector.load %arg13[%c2_57, %c0_58] : memref<10x256xf32, #tpu.memory_space<vmem>>, vector<8x256xf32>
    %59 = arith.truncf %58 : vector<8x256xf32> to vector<8x256xbf16>
    %c0_59 = arith.constant 0 : index
    %c0_60 = arith.constant 0 : index
    %c0_61 = arith.constant 0 : index
    %c0_62 = arith.constant 0 : index
    %60 = vector.load %arg6[%c0_59, %c0_60, %c0_61, %c0_62] : memref<2x2x256x256xbf16, #tpu.memory_space<vmem>>, vector<1x1x256x256xbf16>
    %61 = vector.shape_cast %60 : vector<1x1x256x256xbf16> to vector<256x256xbf16>
    %cst_63 = arith.constant dense<0.000000e+00> : vector<8x256xf32>
    %62 = tpu.matmul %55, %61, %cst_63 {dimension_numbers = #tpu.dot_dimension_numbers<[1], [0], [0], [1], [0, 0, 1, 1], [], []>} : vector<8x256xbf16>, vector<256x256xbf16>, vector<8x256xf32> -> vector<8x256xf32>
    %c0_64 = arith.constant 0 : index
    %c1_65 = arith.constant 1 : index
    %c0_66 = arith.constant 0 : index
    %c0_67 = arith.constant 0 : index
    %63 = vector.load %arg6[%c0_64, %c1_65, %c0_66, %c0_67] : memref<2x2x256x256xbf16, #tpu.memory_space<vmem>>, vector<1x1x256x256xbf16>
    %64 = vector.shape_cast %63 : vector<1x1x256x256xbf16> to vector<256x256xbf16>
    %cst_68 = arith.constant dense<0.000000e+00> : vector<8x256xf32>
    %65 = tpu.matmul %57, %64, %cst_68 {dimension_numbers = #tpu.dot_dimension_numbers<[1], [0], [0], [1], [0, 0, 1, 1], [], []>} : vector<8x256xbf16>, vector<256x256xbf16>, vector<8x256xf32> -> vector<8x256xf32>
    %66 = arith.addf %62, %65 : vector<8x256xf32>
    %c1_69 = arith.constant 1 : index
    %c0_70 = arith.constant 0 : index
    %c0_71 = arith.constant 0 : index
    %c0_72 = arith.constant 0 : index
    %67 = vector.load %arg6[%c1_69, %c0_70, %c0_71, %c0_72] : memref<2x2x256x256xbf16, #tpu.memory_space<vmem>>, vector<1x1x256x256xbf16>
    %68 = vector.shape_cast %67 : vector<1x1x256x256xbf16> to vector<256x256xbf16>
    %cst_73 = arith.constant dense<0.000000e+00> : vector<8x256xf32>
    %69 = tpu.matmul %57, %68, %cst_73 {dimension_numbers = #tpu.dot_dimension_numbers<[1], [0], [0], [1], [0, 0, 1, 1], [], []>} : vector<8x256xbf16>, vector<256x256xbf16>, vector<8x256xf32> -> vector<8x256xf32>
    %c1_74 = arith.constant 1 : index
    %c1_75 = arith.constant 1 : index
    %c0_76 = arith.constant 0 : index
    %c0_77 = arith.constant 0 : index
    %70 = vector.load %arg6[%c1_74, %c1_75, %c0_76, %c0_77] : memref<2x2x256x256xbf16, #tpu.memory_space<vmem>>, vector<1x1x256x256xbf16>
    %71 = vector.shape_cast %70 : vector<1x1x256x256xbf16> to vector<256x256xbf16>
    %cst_78 = arith.constant dense<0.000000e+00> : vector<8x256xf32>
    %72 = tpu.matmul %59, %71, %cst_78 {dimension_numbers = #tpu.dot_dimension_numbers<[1], [0], [0], [1], [0, 0, 1, 1], [], []>} : vector<8x256xbf16>, vector<256x256xbf16>, vector<8x256xf32> -> vector<8x256xf32>
    %73 = arith.addf %69, %72 : vector<8x256xf32>
    %c0_79 = arith.constant 0 : index
    %c0_80 = arith.constant 0 : index
    %74 = vector.load %arg7[%c0_79, %c0_80] : memref<1x256xf32, #tpu.memory_space<vmem>>, vector<1x256xf32>
    %75 = vector.broadcast %74 : vector<1x256xf32> to vector<8x256xf32>
    %76 = arith.addf %66, %75 : vector<8x256xf32>
    %cst_81 = arith.constant 0.000000e+00 : f32
    %77 = vector.broadcast %cst_81 : f32 to vector<8x256xf32>
    %78 = arith.maximumf %76, %77 : vector<8x256xf32>
    %79 = vector.broadcast %74 : vector<1x256xf32> to vector<8x256xf32>
    %80 = arith.addf %73, %79 : vector<8x256xf32>
    %cst_82 = arith.constant 0.000000e+00 : f32
    %81 = vector.broadcast %cst_82 : f32 to vector<8x256xf32>
    %82 = arith.maximumf %80, %81 : vector<8x256xf32>
    %cst_83 = arith.constant 0.000000e+00 : f32
    %83 = vector.broadcast %cst_83 : f32 to vector<1x256xf32>
    %c0_84 = arith.constant 0 : index
    %c0_85 = arith.constant 0 : index
    %84 = vector.load %arg14[%c0_84, %c0_85] : memref<18x256xf32, #tpu.memory_space<vmem>>, vector<1x256xf32>
    tpu.vector_store %arg14[%c0_84, %c0_85], %83 {strides = array<i32>} : memref<18x256xf32, #tpu.memory_space<vmem>>, vector<1x256xf32>,
    %c17 = arith.constant 17 : index
    %c0_86 = arith.constant 0 : index
    %85 = vector.load %arg14[%c17, %c0_86] : memref<18x256xf32, #tpu.memory_space<vmem>>, vector<1x256xf32>
    tpu.vector_store %arg14[%c17, %c0_86], %83 {strides = array<i32>} : memref<18x256xf32, #tpu.memory_space<vmem>>, vector<1x256xf32>,
    %c1_87 = arith.constant 1 : index
    %c0_88 = arith.constant 0 : index
    %86 = tpu.strided_load %arg14[%c1_87, %c0_88] {strides = array<i32: 2, 1>} : memref<18x256xf32, #tpu.memory_space<vmem>>, vector<8x256xf32>
    tpu.strided_store %arg14[%c1_87, %c0_88], %78 {strides = array<i32: 2, 1>} : memref<18x256xf32, #tpu.memory_space<vmem>>, vector<8x256xf32>
    %c2_89 = arith.constant 2 : index
    %c0_90 = arith.constant 0 : index
    %87 = tpu.strided_load %arg14[%c2_89, %c0_90] {strides = array<i32: 2, 1>} : memref<18x256xf32, #tpu.memory_space<vmem>>, vector<8x256xf32>
    tpu.strided_store %arg14[%c2_89, %c0_90], %82 {strides = array<i32: 2, 1>} : memref<18x256xf32, #tpu.memory_space<vmem>>, vector<8x256xf32>
    %c0_91 = arith.constant 0 : index
    %c0_92 = arith.constant 0 : index
    %88 = vector.load %arg14[%c0_91, %c0_92] : memref<18x256xf32, #tpu.memory_space<vmem>>, vector<16x256xf32>
    %89 = arith.truncf %88 : vector<16x256xf32> to vector<16x256xbf16>
    %c1_93 = arith.constant 1 : index
    %c0_94 = arith.constant 0 : index
    %90 = vector.load %arg14[%c1_93, %c0_94] : memref<18x256xf32, #tpu.memory_space<vmem>>, vector<16x256xf32>
    %91 = arith.truncf %90 : vector<16x256xf32> to vector<16x256xbf16>
    %c2_95 = arith.constant 2 : index
    %c0_96 = arith.constant 0 : index
    %92 = vector.load %arg14[%c2_95, %c0_96] : memref<18x256xf32, #tpu.memory_space<vmem>>, vector<16x256xf32>
    %93 = arith.truncf %92 : vector<16x256xf32> to vector<16x256xbf16>
    %c0_97 = arith.constant 0 : index
    %c0_98 = arith.constant 0 : index
    %c0_99 = arith.constant 0 : index
    %c0_100 = arith.constant 0 : index
    %94 = vector.load %arg8[%c0_97, %c0_98, %c0_99, %c0_100] : memref<2x2x256x256xbf16, #tpu.memory_space<vmem>>, vector<1x1x256x256xbf16>
    %95 = vector.shape_cast %94 : vector<1x1x256x256xbf16> to vector<256x256xbf16>
    %cst_101 = arith.constant dense<0.000000e+00> : vector<16x256xf32>
    %96 = tpu.matmul %89, %95, %cst_101 {dimension_numbers = #tpu.dot_dimension_numbers<[1], [0], [0], [1], [0, 0, 1, 1], [], []>} : vector<16x256xbf16>, vector<256x256xbf16>, vector<16x256xf32> -> vector<16x256xf32>
    %c0_102 = arith.constant 0 : index
    %c1_103 = arith.constant 1 : index
    %c0_104 = arith.constant 0 : index
    %c0_105 = arith.constant 0 : index
    %97 = vector.load %arg8[%c0_102, %c1_103, %c0_104, %c0_105] : memref<2x2x256x256xbf16, #tpu.memory_space<vmem>>, vector<1x1x256x256xbf16>
    %98 = vector.shape_cast %97 : vector<1x1x256x256xbf16> to vector<256x256xbf16>
    %cst_106 = arith.constant dense<0.000000e+00> : vector<16x256xf32>
    %99 = tpu.matmul %91, %98, %cst_106 {dimension_numbers = #tpu.dot_dimension_numbers<[1], [0], [0], [1], [0, 0, 1, 1], [], []>} : vector<16x256xbf16>, vector<256x256xbf16>, vector<16x256xf32> -> vector<16x256xf32>
    %100 = arith.addf %96, %99 : vector<16x256xf32>
    %c1_107 = arith.constant 1 : index
    %c0_108 = arith.constant 0 : index
    %c0_109 = arith.constant 0 : index
    %c0_110 = arith.constant 0 : index
    %101 = vector.load %arg8[%c1_107, %c0_108, %c0_109, %c0_110] : memref<2x2x256x256xbf16, #tpu.memory_space<vmem>>, vector<1x1x256x256xbf16>
    %102 = vector.shape_cast %101 : vector<1x1x256x256xbf16> to vector<256x256xbf16>
    %cst_111 = arith.constant dense<0.000000e+00> : vector<16x256xf32>
    %103 = tpu.matmul %91, %102, %cst_111 {dimension_numbers = #tpu.dot_dimension_numbers<[1], [0], [0], [1], [0, 0, 1, 1], [], []>} : vector<16x256xbf16>, vector<256x256xbf16>, vector<16x256xf32> -> vector<16x256xf32>
    %c1_112 = arith.constant 1 : index
    %c1_113 = arith.constant 1 : index
    %c0_114 = arith.constant 0 : index
    %c0_115 = arith.constant 0 : index
    %104 = vector.load %arg8[%c1_112, %c1_113, %c0_114, %c0_115] : memref<2x2x256x256xbf16, #tpu.memory_space<vmem>>, vector<1x1x256x256xbf16>
    %105 = vector.shape_cast %104 : vector<1x1x256x256xbf16> to vector<256x256xbf16>
    %cst_116 = arith.constant dense<0.000000e+00> : vector<16x256xf32>
    %106 = tpu.matmul %93, %105, %cst_116 {dimension_numbers = #tpu.dot_dimension_numbers<[1], [0], [0], [1], [0, 0, 1, 1], [], []>} : vector<16x256xbf16>, vector<256x256xbf16>, vector<16x256xf32> -> vector<16x256xf32>
    %107 = arith.addf %103, %106 : vector<16x256xf32>
    %c0_117 = arith.constant 0 : index
    %c0_118 = arith.constant 0 : index
    %108 = vector.load %arg9[%c0_117, %c0_118] : memref<1x256xf32, #tpu.memory_space<vmem>>, vector<1x256xf32>
    %109 = vector.broadcast %108 : vector<1x256xf32> to vector<16x256xf32>
    %110 = arith.addf %100, %109 : vector<16x256xf32>
    %cst_119 = arith.constant 0.000000e+00 : f32
    %111 = vector.broadcast %cst_119 : f32 to vector<16x256xf32>
    %112 = arith.maximumf %110, %111 : vector<16x256xf32>
    %113 = vector.broadcast %108 : vector<1x256xf32> to vector<16x256xf32>
    %114 = arith.addf %107, %113 : vector<16x256xf32>
    %cst_120 = arith.constant 0.000000e+00 : f32
    %115 = vector.broadcast %cst_120 : f32 to vector<16x256xf32>
    %116 = arith.maximumf %114, %115 : vector<16x256xf32>
    %cst_121 = arith.constant 0.000000e+00 : f32
    %117 = vector.broadcast %cst_121 : f32 to vector<1x256xf32>
    %c0_122 = arith.constant 0 : index
    %c0_123 = arith.constant 0 : index
    %118 = vector.load %arg15[%c0_122, %c0_123] : memref<34x256xf32, #tpu.memory_space<vmem>>, vector<1x256xf32>
    tpu.vector_store %arg15[%c0_122, %c0_123], %117 {strides = array<i32>} : memref<34x256xf32, #tpu.memory_space<vmem>>, vector<1x256xf32>,
    %c33 = arith.constant 33 : index
    %c0_124 = arith.constant 0 : index
    %119 = vector.load %arg15[%c33, %c0_124] : memref<34x256xf32, #tpu.memory_space<vmem>>, vector<1x256xf32>
    tpu.vector_store %arg15[%c33, %c0_124], %117 {strides = array<i32>} : memref<34x256xf32, #tpu.memory_space<vmem>>, vector<1x256xf32>,
    %c1_125 = arith.constant 1 : index
    %c0_126 = arith.constant 0 : index
    %120 = tpu.strided_load %arg15[%c1_125, %c0_126] {strides = array<i32: 2, 1>} : memref<34x256xf32, #tpu.memory_space<vmem>>, vector<16x256xf32>
    tpu.strided_store %arg15[%c1_125, %c0_126], %112 {strides = array<i32: 2, 1>} : memref<34x256xf32, #tpu.memory_space<vmem>>, vector<16x256xf32>
    %c2_127 = arith.constant 2 : index
    %c0_128 = arith.constant 0 : index
    %121 = tpu.strided_load %arg15[%c2_127, %c0_128] {strides = array<i32: 2, 1>} : memref<34x256xf32, #tpu.memory_space<vmem>>, vector<16x256xf32>
    tpu.strided_store %arg15[%c2_127, %c0_128], %116 {strides = array<i32: 2, 1>} : memref<34x256xf32, #tpu.memory_space<vmem>>, vector<16x256xf32>
    %c0_129 = arith.constant 0 : index
    %c0_130 = arith.constant 0 : index
    %122 = vector.load %arg15[%c0_129, %c0_130] : memref<34x256xf32, #tpu.memory_space<vmem>>, vector<32x256xf32>
    %123 = arith.truncf %122 : vector<32x256xf32> to vector<32x256xbf16>
    %c1_131 = arith.constant 1 : index
    %c0_132 = arith.constant 0 : index
    %124 = vector.load %arg15[%c1_131, %c0_132] : memref<34x256xf32, #tpu.memory_space<vmem>>, vector<32x256xf32>
    %125 = arith.truncf %124 : vector<32x256xf32> to vector<32x256xbf16>
    %c2_133 = arith.constant 2 : index
    %c0_134 = arith.constant 0 : index
    %126 = vector.load %arg15[%c2_133, %c0_134] : memref<34x256xf32, #tpu.memory_space<vmem>>, vector<32x256xf32>
    %127 = arith.truncf %126 : vector<32x256xf32> to vector<32x256xbf16>
    %c0_135 = arith.constant 0 : index
    %c0_136 = arith.constant 0 : index
    %c0_137 = arith.constant 0 : index
    %c0_138 = arith.constant 0 : index
    %128 = vector.load %arg10[%c0_135, %c0_136, %c0_137, %c0_138] : memref<2x2x256x192xbf16, #tpu.memory_space<vmem>>, vector<1x1x256x192xbf16>
    %129 = vector.shape_cast %128 : vector<1x1x256x192xbf16> to vector<256x192xbf16>
    %cst_139 = arith.constant dense<0.000000e+00> : vector<32x192xf32>
    %130 = tpu.matmul %123, %129, %cst_139 {dimension_numbers = #tpu.dot_dimension_numbers<[1], [0], [0], [1], [0, 0, 1, 1], [], []>} : vector<32x256xbf16>, vector<256x192xbf16>, vector<32x192xf32> -> vector<32x192xf32>
    %c0_140 = arith.constant 0 : index
    %c1_141 = arith.constant 1 : index
    %c0_142 = arith.constant 0 : index
    %c0_143 = arith.constant 0 : index
    %131 = vector.load %arg10[%c0_140, %c1_141, %c0_142, %c0_143] : memref<2x2x256x192xbf16, #tpu.memory_space<vmem>>, vector<1x1x256x192xbf16>
    %132 = vector.shape_cast %131 : vector<1x1x256x192xbf16> to vector<256x192xbf16>
    %cst_144 = arith.constant dense<0.000000e+00> : vector<32x192xf32>
    %133 = tpu.matmul %125, %132, %cst_144 {dimension_numbers = #tpu.dot_dimension_numbers<[1], [0], [0], [1], [0, 0, 1, 1], [], []>} : vector<32x256xbf16>, vector<256x192xbf16>, vector<32x192xf32> -> vector<32x192xf32>
    %134 = arith.addf %130, %133 : vector<32x192xf32>
    %c1_145 = arith.constant 1 : index
    %c0_146 = arith.constant 0 : index
    %c0_147 = arith.constant 0 : index
    %c0_148 = arith.constant 0 : index
    %135 = vector.load %arg10[%c1_145, %c0_146, %c0_147, %c0_148] : memref<2x2x256x192xbf16, #tpu.memory_space<vmem>>, vector<1x1x256x192xbf16>
    %136 = vector.shape_cast %135 : vector<1x1x256x192xbf16> to vector<256x192xbf16>
    %cst_149 = arith.constant dense<0.000000e+00> : vector<32x192xf32>
    %137 = tpu.matmul %125, %136, %cst_149 {dimension_numbers = #tpu.dot_dimension_numbers<[1], [0], [0], [1], [0, 0, 1, 1], [], []>} : vector<32x256xbf16>, vector<256x192xbf16>, vector<32x192xf32> -> vector<32x192xf32>
    %c1_150 = arith.constant 1 : index
    %c1_151 = arith.constant 1 : index
    %c0_152 = arith.constant 0 : index
    %c0_153 = arith.constant 0 : index
    %138 = vector.load %arg10[%c1_150, %c1_151, %c0_152, %c0_153] : memref<2x2x256x192xbf16, #tpu.memory_space<vmem>>, vector<1x1x256x192xbf16>
    %139 = vector.shape_cast %138 : vector<1x1x256x192xbf16> to vector<256x192xbf16>
    %cst_154 = arith.constant dense<0.000000e+00> : vector<32x192xf32>
    %140 = tpu.matmul %127, %139, %cst_154 {dimension_numbers = #tpu.dot_dimension_numbers<[1], [0], [0], [1], [0, 0, 1, 1], [], []>} : vector<32x256xbf16>, vector<256x192xbf16>, vector<32x192xf32> -> vector<32x192xf32>
    %141 = arith.addf %137, %140 : vector<32x192xf32>
    %c0_155 = arith.constant 0 : index
    %c0_156 = arith.constant 0 : index
    %c0_157 = arith.constant 0 : index
    %c0_158 = arith.constant 0 : index
    %142 = vector.load %arg11[%c0_155, %c0_156, %c0_157, %c0_158] : memref<1x2x32x192xf32, #tpu.memory_space<vmem>>, vector<1x1x32x192xf32>
    %143 = vector.shape_cast %142 : vector<1x1x32x192xf32> to vector<32x192xf32>
    %144 = vector.shape_cast %134 : vector<32x192xf32> to vector<1x1x32x192xf32>
    tpu.vector_store %arg11[%c0_155, %c0_156, %c0_157, %c0_158], %144 {strides = array<i32>} : memref<1x2x32x192xf32, #tpu.memory_space<vmem>>, vector<1x1x32x192xf32>,
    %c0_159 = arith.constant 0 : index
    %c1_160 = arith.constant 1 : index
    %c0_161 = arith.constant 0 : index
    %c0_162 = arith.constant 0 : index
    %145 = vector.load %arg11[%c0_159, %c1_160, %c0_161, %c0_162] : memref<1x2x32x192xf32, #tpu.memory_space<vmem>>, vector<1x1x32x192xf32>
    %146 = vector.shape_cast %145 : vector<1x1x32x192xf32> to vector<32x192xf32>
    %147 = vector.shape_cast %141 : vector<32x192xf32> to vector<1x1x32x192xf32>
    tpu.vector_store %arg11[%c0_159, %c1_160, %c0_161, %c0_162], %147 {strides = array<i32>} : memref<1x2x32x192xf32, #tpu.memory_space<vmem>>, vector<1x1x32x192xf32>,
    return
  }
  func.func @transform_0(%arg0: i32) -> (i32, i32, i32) {
    %c0_i32 = arith.constant 0 : i32
    %c0_i32_0 = arith.constant 0 : i32
    %c0_i32_1 = arith.constant 0 : i32
    return %arg0, %c0_i32, %c0_i32_0 : i32, i32, i32
  }
  func.func @transform_1(%arg0: i32) -> (i32, i32) {
    %c0_i32 = arith.constant 0 : i32
    %c0_i32_0 = arith.constant 0 : i32
    %c0_i32_1 = arith.constant 0 : i32
    return %c0_i32, %c0_i32_0 : i32, i32
  }
  func.func @transform_2(%arg0: i32) -> (i32, i32) {
    %c0_i32 = arith.constant 0 : i32
    %c0_i32_0 = arith.constant 0 : i32
    %c0_i32_1 = arith.constant 0 : i32
    return %c0_i32, %c0_i32_0 : i32, i32
  }
  func.func @transform_3(%arg0: i32) -> (i32, i32, i32, i32) {
    %c0_i32 = arith.constant 0 : i32
    %c0_i32_0 = arith.constant 0 : i32
    %c0_i32_1 = arith.constant 0 : i32
    %c0_i32_2 = arith.constant 0 : i32
    %c0_i32_3 = arith.constant 0 : i32
    return %c0_i32, %c0_i32_0, %c0_i32_1, %c0_i32_2 : i32, i32, i32, i32
  }
  func.func @transform_4(%arg0: i32) -> (i32, i32) {
    %c0_i32 = arith.constant 0 : i32
    %c0_i32_0 = arith.constant 0 : i32
    %c0_i32_1 = arith.constant 0 : i32
    return %c0_i32, %c0_i32_0 : i32, i32
  }
  func.func @transform_5(%arg0: i32) -> (i32, i32, i32, i32) {
    %c0_i32 = arith.constant 0 : i32
    %c0_i32_0 = arith.constant 0 : i32
    %c0_i32_1 = arith.constant 0 : i32
    %c0_i32_2 = arith.constant 0 : i32
    %c0_i32_3 = arith.constant 0 : i32
    return %c0_i32, %c0_i32_0, %c0_i32_1, %c0_i32_2 : i32, i32, i32, i32
  }
  func.func @transform_6(%arg0: i32) -> (i32, i32) {
    %c0_i32 = arith.constant 0 : i32
    %c0_i32_0 = arith.constant 0 : i32
    %c0_i32_1 = arith.constant 0 : i32
    return %c0_i32, %c0_i32_0 : i32, i32
  }
  func.func @transform_7(%arg0: i32) -> (i32, i32, i32, i32) {
    %c0_i32 = arith.constant 0 : i32
    %c0_i32_0 = arith.constant 0 : i32
    %c0_i32_1 = arith.constant 0 : i32
    %c0_i32_2 = arith.constant 0 : i32
    %c0_i32_3 = arith.constant 0 : i32
    return %c0_i32, %c0_i32_0, %c0_i32_1, %c0_i32_2 : i32, i32, i32, i32
  }
  func.func @transform_8(%arg0: i32) -> (i32, i32) {
    %c0_i32 = arith.constant 0 : i32
    %c0_i32_0 = arith.constant 0 : i32
    %c0_i32_1 = arith.constant 0 : i32
    return %c0_i32, %c0_i32_0 : i32, i32
  }
  func.func @transform_9(%arg0: i32) -> (i32, i32, i32, i32) {
    %c0_i32 = arith.constant 0 : i32
    %c0_i32_0 = arith.constant 0 : i32
    %c0_i32_1 = arith.constant 0 : i32
    %c0_i32_2 = arith.constant 0 : i32
    %c0_i32_3 = arith.constant 0 : i32
    return %c0_i32, %c0_i32_0, %c0_i32_1, %c0_i32_2 : i32, i32, i32, i32
  }
  func.func @transform_10(%arg0: i32) -> (i32, i32, i32, i32) {
    %c0_i32 = arith.constant 0 : i32
    %c0_i32_0 = arith.constant 0 : i32
    %c0_i32_1 = arith.constant 0 : i32
    %c0_i32_2 = arith.constant 0 : i32
    return %arg0, %c0_i32, %c0_i32_0, %c0_i32_1 : i32, i32, i32, i32
  }
}

module attributes {stable_mosaic.version = 11 : i64} {
  func.func @_decoder_kernel(%arg0: i32, %arg1: memref<1x1x16xf32, #tpu.memory_space<vmem>>, %arg2: memref<16x1024xbf16, #tpu.memory_space<vmem>>, %arg3: memref<1x1024xf32, #tpu.memory_space<vmem>>, %arg4: memref<2x2x256x256xbf16, #tpu.memory_space<vmem>>, %arg5: memref<1x256xf32, #tpu.memory_space<vmem>>, %arg6: memref<2x2x256x256xbf16, #tpu.memory_space<vmem>>, %arg7: memref<1x256xf32, #tpu.memory_space<vmem>>, %arg8: memref<2x2x256x256xbf16, #tpu.memory_space<vmem>>, %arg9: memref<1x256xf32, #tpu.memory_space<vmem>>, %arg10: memref<2x2x256x192xbf16, #tpu.memory_space<vmem>>, %arg11: memref<1x2x32x192xf32, #tpu.memory_space<vmem>>, %arg12: memref<6x256xf32, #tpu.memory_space<vmem>>, %arg13: memref<10x256xf32, #tpu.memory_space<vmem>>, %arg14: memref<18x256xf32, #tpu.memory_space<vmem>>, %arg15: memref<34x256xf32, #tpu.memory_space<vmem>>) attributes {dimension_semantics = [#tpu.dimension_semantics<parallel>], iteration_bounds = array<i64: 2>, scalar_prefetch = 0 : i64, scratch_operands = 4 : i64, tpu.core_type = #tpu.core_type<tc>, window_params = [{transform_indices = @transform_0, window_bounds = array<i64: 1, 1, 16>}, {pipeline_mode = #tpu.pipeline_mode<synchronous>, transform_indices = @transform_1, window_bounds = array<i64: 16, 1024>}, {pipeline_mode = #tpu.pipeline_mode<synchronous>, transform_indices = @transform_2, window_bounds = array<i64: 1, 1024>}, {pipeline_mode = #tpu.pipeline_mode<synchronous>, transform_indices = @transform_3, window_bounds = array<i64: 2, 2, 256, 256>}, {pipeline_mode = #tpu.pipeline_mode<synchronous>, transform_indices = @transform_4, window_bounds = array<i64: 1, 256>}, {pipeline_mode = #tpu.pipeline_mode<synchronous>, transform_indices = @transform_5, window_bounds = array<i64: 2, 2, 256, 256>}, {pipeline_mode = #tpu.pipeline_mode<synchronous>, transform_indices = @transform_6, window_bounds = array<i64: 1, 256>}, {pipeline_mode = #tpu.pipeline_mode<synchronous>, transform_indices = @transform_7, window_bounds = array<i64: 2, 2, 256, 256>}, {pipeline_mode = #tpu.pipeline_mode<synchronous>, transform_indices = @transform_8, window_bounds = array<i64: 1, 256>}, {pipeline_mode = #tpu.pipeline_mode<synchronous>, transform_indices = @transform_9, window_bounds = array<i64: 2, 2, 256, 192>}, {transform_indices = @transform_10, window_bounds = array<i64: 1, 2, 32, 192>}]} {
    %c0 = arith.constant 0 : index
    %c0_0 = arith.constant 0 : index
    %c0_1 = arith.constant 0 : index
    %0 = vector.load %arg1[%c0, %c0_0, %c0_1] : memref<1x1x16xf32, #tpu.memory_space<vmem>>, vector<1x1x16xf32>
    %1 = vector.shape_cast %0 : vector<1x1x16xf32> to vector<1x16xf32>
    %2 = arith.truncf %1 : vector<1x16xf32> to vector<1x16xbf16>
    %c0_2 = arith.constant 0 : index
    %c0_3 = arith.constant 0 : index
    %3 = vector.load %arg2[%c0_2, %c0_3] : memref<16x1024xbf16, #tpu.memory_space<vmem>>, vector<16x1024xbf16>
    %cst = arith.constant dense<0.000000e+00> : vector<1x1024xf32>
    %4 = tpu.matmul %2, %3, %cst {dimension_numbers = #tpu.dot_dimension_numbers<[1], [0], [0], [1], [0, 0, 1, 1], [], []>} : vector<1x16xbf16>, vector<16x1024xbf16>, vector<1x1024xf32> -> vector<1x1024xf32>
    %c0_4 = arith.constant 0 : index
    %c0_5 = arith.constant 0 : index
    %5 = vector.load %arg3[%c0_4, %c0_5] : memref<1x1024xf32, #tpu.memory_space<vmem>>, vector<1x1024xf32>
    %6 = arith.addf %4, %5 : vector<1x1024xf32>
    %cst_6 = arith.constant 0.000000e+00 : f32
    %7 = vector.broadcast %cst_6 : f32 to vector<1x1024xf32>
    %8 = arith.maximumf %6, %7 : vector<1x1024xf32>
    %cst_7 = arith.constant 0.000000e+00 : f32
    %9 = vector.broadcast %cst_7 : f32 to vector<1x256xf32>
    %c0_8 = arith.constant 0 : index
    %c0_9 = arith.constant 0 : index
    %10 = vector.load %arg12[%c0_8, %c0_9] : memref<6x256xf32, #tpu.memory_space<vmem>>, vector<1x256xf32>
    tpu.vector_store %arg12[%c0_8, %c0_9], %9 {strides = array<i32>} : memref<6x256xf32, #tpu.memory_space<vmem>>, vector<1x256xf32>,
    %c5 = arith.constant 5 : index
    %c0_10 = arith.constant 0 : index
    %11 = vector.load %arg12[%c5, %c0_10] : memref<6x256xf32, #tpu.memory_space<vmem>>, vector<1x256xf32>
    tpu.vector_store %arg12[%c5, %c0_10], %9 {strides = array<i32>} : memref<6x256xf32, #tpu.memory_space<vmem>>, vector<1x256xf32>,
    %12 = vector.extract_strided_slice %8 {offsets = [0, 0], sizes = [1, 256], strides = [1, 1]} : vector<1x1024xf32> to vector<1x256xf32>
    %c1 = arith.constant 1 : index
    %c0_11 = arith.constant 0 : index
    %13 = vector.load %arg12[%c1, %c0_11] : memref<6x256xf32, #tpu.memory_space<vmem>>, vector<1x256xf32>
    tpu.vector_store %arg12[%c1, %c0_11], %12 {strides = array<i32>} : memref<6x256xf32, #tpu.memory_space<vmem>>, vector<1x256xf32>,
    %14 = vector.extract_strided_slice %8 {offsets = [0, 256], sizes = [1, 256], strides = [1, 1]} : vector<1x1024xf32> to vector<1x256xf32>
    %c2 = arith.constant 2 : index
    %c0_12 = arith.constant 0 : index
    %15 = vector.load %arg12[%c2, %c0_12] : memref<6x256xf32, #tpu.memory_space<vmem>>, vector<1x256xf32>
    tpu.vector_store %arg12[%c2, %c0_12], %14 {strides = array<i32>} : memref<6x256xf32, #tpu.memory_space<vmem>>, vector<1x256xf32>,
    %16 = vector.extract_strided_slice %8 {offsets = [0, 512], sizes = [1, 256], strides = [1, 1]} : vector<1x1024xf32> to vector<1x256xf32>
    %c3 = arith.constant 3 : index
    %c0_13 = arith.constant 0 : index
    %17 = vector.load %arg12[%c3, %c0_13] : memref<6x256xf32, #tpu.memory_space<vmem>>, vector<1x256xf32>
    tpu.vector_store %arg12[%c3, %c0_13], %16 {strides = array<i32>} : memref<6x256xf32, #tpu.memory_space<vmem>>, vector<1x256xf32>,
    %18 = vector.extract_strided_slice %8 {offsets = [0, 768], sizes = [1, 256], strides = [1, 1]} : vector<1x1024xf32> to vector<1x256xf32>
    %c4 = arith.constant 4 : index
    %c0_14 = arith.constant 0 : index
    %19 = vector.load %arg12[%c4, %c0_14] : memref<6x256xf32, #tpu.memory_space<vmem>>, vector<1x256xf32>
    tpu.vector_store %arg12[%c4, %c0_14], %18 {strides = array<i32>} : memref<6x256xf32, #tpu.memory_space<vmem>>, vector<1x256xf32>,
    %c0_15 = arith.constant 0 : index
    %c0_16 = arith.constant 0 : index
    %20 = vector.load %arg12[%c0_15, %c0_16] : memref<6x256xf32, #tpu.memory_space<vmem>>, vector<4x256xf32>
    %21 = arith.truncf %20 : vector<4x256xf32> to vector<4x256xbf16>
    %c1_17 = arith.constant 1 : index
    %c0_18 = arith.constant 0 : index
    %22 = vector.load %arg12[%c1_17, %c0_18] : memref<6x256xf32, #tpu.memory_space<vmem>>, vector<4x256xf32>
    %23 = arith.truncf %22 : vector<4x256xf32> to vector<4x256xbf16>
    %c2_19 = arith.constant 2 : index
    %c0_20 = arith.constant 0 : index
    %24 = vector.load %arg12[%c2_19, %c0_20] : memref<6x256xf32, #tpu.memory_space<vmem>>, vector<4x256xf32>
    %25 = arith.truncf %24 : vector<4x256xf32> to vector<4x256xbf16>
    %c0_21 = arith.constant 0 : index
    %c0_22 = arith.constant 0 : index
    %c0_23 = arith.constant 0 : index
    %c0_24 = arith.constant 0 : index
    %26 = vector.load %arg4[%c0_21, %c0_22, %c0_23, %c0_24] : memref<2x2x256x256xbf16, #tpu.memory_space<vmem>>, vector<1x1x256x256xbf16>
    %27 = vector.shape_cast %26 : vector<1x1x256x256xbf16> to vector<256x256xbf16>
    %cst_25 = arith.constant dense<0.000000e+00> : vector<4x256xf32>
    %28 = tpu.matmul %21, %27, %cst_25 {dimension_numbers = #tpu.dot_dimension_numbers<[1], [0], [0], [1], [0, 0, 1, 1], [], []>} : vector<4x256xbf16>, vector<256x256xbf16>, vector<4x256xf32> -> vector<4x256xf32>
    %c0_26 = arith.constant 0 : index
    %c1_27 = arith.constant 1 : index
    %c0_28 = arith.constant 0 : index
    %c0_29 = arith.constant 0 : index
    %29 = vector.load %arg4[%c0_26, %c1_27, %c0_28, %c0_29] : memref<2x2x256x256xbf16, #tpu.memory_space<vmem>>, vector<1x1x256x256xbf16>
    %30 = vector.shape_cast %29 : vector<1x1x256x256xbf16> to vector<256x256xbf16>
    %cst_30 = arith.constant dense<0.000000e+00> : vector<4x256xf32>
    %31 = tpu.matmul %23, %30, %cst_30 {dimension_numbers = #tpu.dot_dimension_numbers<[1], [0], [0], [1], [0, 0, 1, 1], [], []>} : vector<4x256xbf16>, vector<256x256xbf16>, vector<4x256xf32> -> vector<4x256xf32>
    %32 = arith.addf %28, %31 : vector<4x256xf32>
    %c1_31 = arith.constant 1 : index
    %c0_32 = arith.constant 0 : index
    %c0_33 = arith.constant 0 : index
    %c0_34 = arith.constant 0 : index
    %33 = vector.load %arg4[%c1_31, %c0_32, %c0_33, %c0_34] : memref<2x2x256x256xbf16, #tpu.memory_space<vmem>>, vector<1x1x256x256xbf16>
    %34 = vector.shape_cast %33 : vector<1x1x256x256xbf16> to vector<256x256xbf16>
    %cst_35 = arith.constant dense<0.000000e+00> : vector<4x256xf32>
    %35 = tpu.matmul %23, %34, %cst_35 {dimension_numbers = #tpu.dot_dimension_numbers<[1], [0], [0], [1], [0, 0, 1, 1], [], []>} : vector<4x256xbf16>, vector<256x256xbf16>, vector<4x256xf32> -> vector<4x256xf32>
    %c1_36 = arith.constant 1 : index
    %c1_37 = arith.constant 1 : index
    %c0_38 = arith.constant 0 : index
    %c0_39 = arith.constant 0 : index
    %36 = vector.load %arg4[%c1_36, %c1_37, %c0_38, %c0_39] : memref<2x2x256x256xbf16, #tpu.memory_space<vmem>>, vector<1x1x256x256xbf16>
    %37 = vector.shape_cast %36 : vector<1x1x256x256xbf16> to vector<256x256xbf16>
    %cst_40 = arith.constant dense<0.000000e+00> : vector<4x256xf32>
    %38 = tpu.matmul %25, %37, %cst_40 {dimension_numbers = #tpu.dot_dimension_numbers<[1], [0], [0], [1], [0, 0, 1, 1], [], []>} : vector<4x256xbf16>, vector<256x256xbf16>, vector<4x256xf32> -> vector<4x256xf32>
    %39 = arith.addf %35, %38 : vector<4x256xf32>
    %c0_41 = arith.constant 0 : index
    %c0_42 = arith.constant 0 : index
    %40 = vector.load %arg5[%c0_41, %c0_42] : memref<1x256xf32, #tpu.memory_space<vmem>>, vector<1x256xf32>
    %41 = vector.broadcast %40 : vector<1x256xf32> to vector<4x256xf32>
    %42 = arith.addf %32, %41 : vector<4x256xf32>
    %cst_43 = arith.constant 0.000000e+00 : f32
    %43 = vector.broadcast %cst_43 : f32 to vector<4x256xf32>
    %44 = arith.maximumf %42, %43 : vector<4x256xf32>
    %45 = vector.broadcast %40 : vector<1x256xf32> to vector<4x256xf32>
    %46 = arith.addf %39, %45 : vector<4x256xf32>
    %cst_44 = arith.constant 0.000000e+00 : f32
    %47 = vector.broadcast %cst_44 : f32 to vector<4x256xf32>
    %48 = arith.maximumf %46, %47 : vector<4x256xf32>
    %cst_45 = arith.constant 0.000000e+00 : f32
    %49 = vector.broadcast %cst_45 : f32 to vector<1x256xf32>
    %c0_46 = arith.constant 0 : index
    %c0_47 = arith.constant 0 : index
    %50 = vector.load %arg13[%c0_46, %c0_47] : memref<10x256xf32, #tpu.memory_space<vmem>>, vector<1x256xf32>
    tpu.vector_store %arg13[%c0_46, %c0_47], %49 {strides = array<i32>} : memref<10x256xf32, #tpu.memory_space<vmem>>, vector<1x256xf32>,
    %c9 = arith.constant 9 : index
    %c0_48 = arith.constant 0 : index
    %51 = vector.load %arg13[%c9, %c0_48] : memref<10x256xf32, #tpu.memory_space<vmem>>, vector<1x256xf32>
    tpu.vector_store %arg13[%c9, %c0_48], %49 {strides = array<i32>} : memref<10x256xf32, #tpu.memory_space<vmem>>, vector<1x256xf32>,
    %52 = vector.extract_strided_slice %44 {offsets = [0, 0], sizes = [1, 256], strides = [1, 1]} : vector<4x256xf32> to vector<1x256xf32>
    %c1_49 = arith.constant 1 : index
    %c0_50 = arith.constant 0 : index
    %53 = vector.load %arg13[%c1_49, %c0_50] : memref<10x256xf32, #tpu.memory_space<vmem>>, vector<1x256xf32>
    tpu.vector_store %arg13[%c1_49, %c0_50], %52 {strides = array<i32>} : memref<10x256xf32, #tpu.memory_space<vmem>>, vector<1x256xf32>,
    %54 = vector.extract_strided_slice %48 {offsets = [0, 0], sizes = [1, 256], strides = [1, 1]} : vector<4x256xf32> to vector<1x256xf32>
    %c2_51 = arith.constant 2 : index
    %c0_52 = arith.constant 0 : index
    %55 = vector.load %arg13[%c2_51, %c0_52] : memref<10x256xf32, #tpu.memory_space<vmem>>, vector<1x256xf32>
    tpu.vector_store %arg13[%c2_51, %c0_52], %54 {strides = array<i32>} : memref<10x256xf32, #tpu.memory_space<vmem>>, vector<1x256xf32>,
    %56 = vector.extract_strided_slice %44 {offsets = [1, 0], sizes = [1, 256], strides = [1, 1]} : vector<4x256xf32> to vector<1x256xf32>
    %c3_53 = arith.constant 3 : index
    %c0_54 = arith.constant 0 : index
    %57 = vector.load %arg13[%c3_53, %c0_54] : memref<10x256xf32, #tpu.memory_space<vmem>>, vector<1x256xf32>
    tpu.vector_store %arg13[%c3_53, %c0_54], %56 {strides = array<i32>} : memref<10x256xf32, #tpu.memory_space<vmem>>, vector<1x256xf32>,
    %58 = vector.extract_strided_slice %48 {offsets = [1, 0], sizes = [1, 256], strides = [1, 1]} : vector<4x256xf32> to vector<1x256xf32>
    %c4_55 = arith.constant 4 : index
    %c0_56 = arith.constant 0 : index
    %59 = vector.load %arg13[%c4_55, %c0_56] : memref<10x256xf32, #tpu.memory_space<vmem>>, vector<1x256xf32>
    tpu.vector_store %arg13[%c4_55, %c0_56], %58 {strides = array<i32>} : memref<10x256xf32, #tpu.memory_space<vmem>>, vector<1x256xf32>,
    %60 = vector.extract_strided_slice %44 {offsets = [2, 0], sizes = [1, 256], strides = [1, 1]} : vector<4x256xf32> to vector<1x256xf32>
    %c5_57 = arith.constant 5 : index
    %c0_58 = arith.constant 0 : index
    %61 = vector.load %arg13[%c5_57, %c0_58] : memref<10x256xf32, #tpu.memory_space<vmem>>, vector<1x256xf32>
    tpu.vector_store %arg13[%c5_57, %c0_58], %60 {strides = array<i32>} : memref<10x256xf32, #tpu.memory_space<vmem>>, vector<1x256xf32>,
    %62 = vector.extract_strided_slice %48 {offsets = [2, 0], sizes = [1, 256], strides = [1, 1]} : vector<4x256xf32> to vector<1x256xf32>
    %c6 = arith.constant 6 : index
    %c0_59 = arith.constant 0 : index
    %63 = vector.load %arg13[%c6, %c0_59] : memref<10x256xf32, #tpu.memory_space<vmem>>, vector<1x256xf32>
    tpu.vector_store %arg13[%c6, %c0_59], %62 {strides = array<i32>} : memref<10x256xf32, #tpu.memory_space<vmem>>, vector<1x256xf32>,
    %64 = vector.extract_strided_slice %44 {offsets = [3, 0], sizes = [1, 256], strides = [1, 1]} : vector<4x256xf32> to vector<1x256xf32>
    %c7 = arith.constant 7 : index
    %c0_60 = arith.constant 0 : index
    %65 = vector.load %arg13[%c7, %c0_60] : memref<10x256xf32, #tpu.memory_space<vmem>>, vector<1x256xf32>
    tpu.vector_store %arg13[%c7, %c0_60], %64 {strides = array<i32>} : memref<10x256xf32, #tpu.memory_space<vmem>>, vector<1x256xf32>,
    %66 = vector.extract_strided_slice %48 {offsets = [3, 0], sizes = [1, 256], strides = [1, 1]} : vector<4x256xf32> to vector<1x256xf32>
    %c8 = arith.constant 8 : index
    %c0_61 = arith.constant 0 : index
    %67 = vector.load %arg13[%c8, %c0_61] : memref<10x256xf32, #tpu.memory_space<vmem>>, vector<1x256xf32>
    tpu.vector_store %arg13[%c8, %c0_61], %66 {strides = array<i32>} : memref<10x256xf32, #tpu.memory_space<vmem>>, vector<1x256xf32>,
    %c0_62 = arith.constant 0 : index
    %c0_63 = arith.constant 0 : index
    %68 = vector.load %arg13[%c0_62, %c0_63] : memref<10x256xf32, #tpu.memory_space<vmem>>, vector<8x256xf32>
    %69 = arith.truncf %68 : vector<8x256xf32> to vector<8x256xbf16>
    %c1_64 = arith.constant 1 : index
    %c0_65 = arith.constant 0 : index
    %70 = vector.load %arg13[%c1_64, %c0_65] : memref<10x256xf32, #tpu.memory_space<vmem>>, vector<8x256xf32>
    %71 = arith.truncf %70 : vector<8x256xf32> to vector<8x256xbf16>
    %c2_66 = arith.constant 2 : index
    %c0_67 = arith.constant 0 : index
    %72 = vector.load %arg13[%c2_66, %c0_67] : memref<10x256xf32, #tpu.memory_space<vmem>>, vector<8x256xf32>
    %73 = arith.truncf %72 : vector<8x256xf32> to vector<8x256xbf16>
    %c0_68 = arith.constant 0 : index
    %c0_69 = arith.constant 0 : index
    %c0_70 = arith.constant 0 : index
    %c0_71 = arith.constant 0 : index
    %74 = vector.load %arg6[%c0_68, %c0_69, %c0_70, %c0_71] : memref<2x2x256x256xbf16, #tpu.memory_space<vmem>>, vector<1x1x256x256xbf16>
    %75 = vector.shape_cast %74 : vector<1x1x256x256xbf16> to vector<256x256xbf16>
    %cst_72 = arith.constant dense<0.000000e+00> : vector<8x256xf32>
    %76 = tpu.matmul %69, %75, %cst_72 {dimension_numbers = #tpu.dot_dimension_numbers<[1], [0], [0], [1], [0, 0, 1, 1], [], []>} : vector<8x256xbf16>, vector<256x256xbf16>, vector<8x256xf32> -> vector<8x256xf32>
    %c0_73 = arith.constant 0 : index
    %c1_74 = arith.constant 1 : index
    %c0_75 = arith.constant 0 : index
    %c0_76 = arith.constant 0 : index
    %77 = vector.load %arg6[%c0_73, %c1_74, %c0_75, %c0_76] : memref<2x2x256x256xbf16, #tpu.memory_space<vmem>>, vector<1x1x256x256xbf16>
    %78 = vector.shape_cast %77 : vector<1x1x256x256xbf16> to vector<256x256xbf16>
    %cst_77 = arith.constant dense<0.000000e+00> : vector<8x256xf32>
    %79 = tpu.matmul %71, %78, %cst_77 {dimension_numbers = #tpu.dot_dimension_numbers<[1], [0], [0], [1], [0, 0, 1, 1], [], []>} : vector<8x256xbf16>, vector<256x256xbf16>, vector<8x256xf32> -> vector<8x256xf32>
    %80 = arith.addf %76, %79 : vector<8x256xf32>
    %c1_78 = arith.constant 1 : index
    %c0_79 = arith.constant 0 : index
    %c0_80 = arith.constant 0 : index
    %c0_81 = arith.constant 0 : index
    %81 = vector.load %arg6[%c1_78, %c0_79, %c0_80, %c0_81] : memref<2x2x256x256xbf16, #tpu.memory_space<vmem>>, vector<1x1x256x256xbf16>
    %82 = vector.shape_cast %81 : vector<1x1x256x256xbf16> to vector<256x256xbf16>
    %cst_82 = arith.constant dense<0.000000e+00> : vector<8x256xf32>
    %83 = tpu.matmul %71, %82, %cst_82 {dimension_numbers = #tpu.dot_dimension_numbers<[1], [0], [0], [1], [0, 0, 1, 1], [], []>} : vector<8x256xbf16>, vector<256x256xbf16>, vector<8x256xf32> -> vector<8x256xf32>
    %c1_83 = arith.constant 1 : index
    %c1_84 = arith.constant 1 : index
    %c0_85 = arith.constant 0 : index
    %c0_86 = arith.constant 0 : index
    %84 = vector.load %arg6[%c1_83, %c1_84, %c0_85, %c0_86] : memref<2x2x256x256xbf16, #tpu.memory_space<vmem>>, vector<1x1x256x256xbf16>
    %85 = vector.shape_cast %84 : vector<1x1x256x256xbf16> to vector<256x256xbf16>
    %cst_87 = arith.constant dense<0.000000e+00> : vector<8x256xf32>
    %86 = tpu.matmul %73, %85, %cst_87 {dimension_numbers = #tpu.dot_dimension_numbers<[1], [0], [0], [1], [0, 0, 1, 1], [], []>} : vector<8x256xbf16>, vector<256x256xbf16>, vector<8x256xf32> -> vector<8x256xf32>
    %87 = arith.addf %83, %86 : vector<8x256xf32>
    %c0_88 = arith.constant 0 : index
    %c0_89 = arith.constant 0 : index
    %88 = vector.load %arg7[%c0_88, %c0_89] : memref<1x256xf32, #tpu.memory_space<vmem>>, vector<1x256xf32>
    %89 = vector.broadcast %88 : vector<1x256xf32> to vector<8x256xf32>
    %90 = arith.addf %80, %89 : vector<8x256xf32>
    %cst_90 = arith.constant 0.000000e+00 : f32
    %91 = vector.broadcast %cst_90 : f32 to vector<8x256xf32>
    %92 = arith.maximumf %90, %91 : vector<8x256xf32>
    %93 = vector.broadcast %88 : vector<1x256xf32> to vector<8x256xf32>
    %94 = arith.addf %87, %93 : vector<8x256xf32>
    %cst_91 = arith.constant 0.000000e+00 : f32
    %95 = vector.broadcast %cst_91 : f32 to vector<8x256xf32>
    %96 = arith.maximumf %94, %95 : vector<8x256xf32>
    %cst_92 = arith.constant 0.000000e+00 : f32
    %97 = vector.broadcast %cst_92 : f32 to vector<1x256xf32>
    %c0_93 = arith.constant 0 : index
    %c0_94 = arith.constant 0 : index
    %98 = vector.load %arg14[%c0_93, %c0_94] : memref<18x256xf32, #tpu.memory_space<vmem>>, vector<1x256xf32>
    tpu.vector_store %arg14[%c0_93, %c0_94], %97 {strides = array<i32>} : memref<18x256xf32, #tpu.memory_space<vmem>>, vector<1x256xf32>,
    %c17 = arith.constant 17 : index
    %c0_95 = arith.constant 0 : index
    %99 = vector.load %arg14[%c17, %c0_95] : memref<18x256xf32, #tpu.memory_space<vmem>>, vector<1x256xf32>
    tpu.vector_store %arg14[%c17, %c0_95], %97 {strides = array<i32>} : memref<18x256xf32, #tpu.memory_space<vmem>>, vector<1x256xf32>,
    %100 = vector.extract_strided_slice %92 {offsets = [0, 0], sizes = [1, 256], strides = [1, 1]} : vector<8x256xf32> to vector<1x256xf32>
    %c1_96 = arith.constant 1 : index
    %c0_97 = arith.constant 0 : index
    %101 = vector.load %arg14[%c1_96, %c0_97] : memref<18x256xf32, #tpu.memory_space<vmem>>, vector<1x256xf32>
    tpu.vector_store %arg14[%c1_96, %c0_97], %100 {strides = array<i32>} : memref<18x256xf32, #tpu.memory_space<vmem>>, vector<1x256xf32>,
    %102 = vector.extract_strided_slice %96 {offsets = [0, 0], sizes = [1, 256], strides = [1, 1]} : vector<8x256xf32> to vector<1x256xf32>
    %c2_98 = arith.constant 2 : index
    %c0_99 = arith.constant 0 : index
    %103 = vector.load %arg14[%c2_98, %c0_99] : memref<18x256xf32, #tpu.memory_space<vmem>>, vector<1x256xf32>
    tpu.vector_store %arg14[%c2_98, %c0_99], %102 {strides = array<i32>} : memref<18x256xf32, #tpu.memory_space<vmem>>, vector<1x256xf32>,
    %104 = vector.extract_strided_slice %92 {offsets = [1, 0], sizes = [1, 256], strides = [1, 1]} : vector<8x256xf32> to vector<1x256xf32>
    %c3_100 = arith.constant 3 : index
    %c0_101 = arith.constant 0 : index
    %105 = vector.load %arg14[%c3_100, %c0_101] : memref<18x256xf32, #tpu.memory_space<vmem>>, vector<1x256xf32>
    tpu.vector_store %arg14[%c3_100, %c0_101], %104 {strides = array<i32>} : memref<18x256xf32, #tpu.memory_space<vmem>>, vector<1x256xf32>,
    %106 = vector.extract_strided_slice %96 {offsets = [1, 0], sizes = [1, 256], strides = [1, 1]} : vector<8x256xf32> to vector<1x256xf32>
    %c4_102 = arith.constant 4 : index
    %c0_103 = arith.constant 0 : index
    %107 = vector.load %arg14[%c4_102, %c0_103] : memref<18x256xf32, #tpu.memory_space<vmem>>, vector<1x256xf32>
    tpu.vector_store %arg14[%c4_102, %c0_103], %106 {strides = array<i32>} : memref<18x256xf32, #tpu.memory_space<vmem>>, vector<1x256xf32>,
    %108 = vector.extract_strided_slice %92 {offsets = [2, 0], sizes = [1, 256], strides = [1, 1]} : vector<8x256xf32> to vector<1x256xf32>
    %c5_104 = arith.constant 5 : index
    %c0_105 = arith.constant 0 : index
    %109 = vector.load %arg14[%c5_104, %c0_105] : memref<18x256xf32, #tpu.memory_space<vmem>>, vector<1x256xf32>
    tpu.vector_store %arg14[%c5_104, %c0_105], %108 {strides = array<i32>} : memref<18x256xf32, #tpu.memory_space<vmem>>, vector<1x256xf32>,
    %110 = vector.extract_strided_slice %96 {offsets = [2, 0], sizes = [1, 256], strides = [1, 1]} : vector<8x256xf32> to vector<1x256xf32>
    %c6_106 = arith.constant 6 : index
    %c0_107 = arith.constant 0 : index
    %111 = vector.load %arg14[%c6_106, %c0_107] : memref<18x256xf32, #tpu.memory_space<vmem>>, vector<1x256xf32>
    tpu.vector_store %arg14[%c6_106, %c0_107], %110 {strides = array<i32>} : memref<18x256xf32, #tpu.memory_space<vmem>>, vector<1x256xf32>,
    %112 = vector.extract_strided_slice %92 {offsets = [3, 0], sizes = [1, 256], strides = [1, 1]} : vector<8x256xf32> to vector<1x256xf32>
    %c7_108 = arith.constant 7 : index
    %c0_109 = arith.constant 0 : index
    %113 = vector.load %arg14[%c7_108, %c0_109] : memref<18x256xf32, #tpu.memory_space<vmem>>, vector<1x256xf32>
    tpu.vector_store %arg14[%c7_108, %c0_109], %112 {strides = array<i32>} : memref<18x256xf32, #tpu.memory_space<vmem>>, vector<1x256xf32>,
    %114 = vector.extract_strided_slice %96 {offsets = [3, 0], sizes = [1, 256], strides = [1, 1]} : vector<8x256xf32> to vector<1x256xf32>
    %c8_110 = arith.constant 8 : index
    %c0_111 = arith.constant 0 : index
    %115 = vector.load %arg14[%c8_110, %c0_111] : memref<18x256xf32, #tpu.memory_space<vmem>>, vector<1x256xf32>
    tpu.vector_store %arg14[%c8_110, %c0_111], %114 {strides = array<i32>} : memref<18x256xf32, #tpu.memory_space<vmem>>, vector<1x256xf32>,
    %116 = vector.extract_strided_slice %92 {offsets = [4, 0], sizes = [1, 256], strides = [1, 1]} : vector<8x256xf32> to vector<1x256xf32>
    %c9_112 = arith.constant 9 : index
    %c0_113 = arith.constant 0 : index
    %117 = vector.load %arg14[%c9_112, %c0_113] : memref<18x256xf32, #tpu.memory_space<vmem>>, vector<1x256xf32>
    tpu.vector_store %arg14[%c9_112, %c0_113], %116 {strides = array<i32>} : memref<18x256xf32, #tpu.memory_space<vmem>>, vector<1x256xf32>,
    %118 = vector.extract_strided_slice %96 {offsets = [4, 0], sizes = [1, 256], strides = [1, 1]} : vector<8x256xf32> to vector<1x256xf32>
    %c10 = arith.constant 10 : index
    %c0_114 = arith.constant 0 : index
    %119 = vector.load %arg14[%c10, %c0_114] : memref<18x256xf32, #tpu.memory_space<vmem>>, vector<1x256xf32>
    tpu.vector_store %arg14[%c10, %c0_114], %118 {strides = array<i32>} : memref<18x256xf32, #tpu.memory_space<vmem>>, vector<1x256xf32>,
    %120 = vector.extract_strided_slice %92 {offsets = [5, 0], sizes = [1, 256], strides = [1, 1]} : vector<8x256xf32> to vector<1x256xf32>
    %c11 = arith.constant 11 : index
    %c0_115 = arith.constant 0 : index
    %121 = vector.load %arg14[%c11, %c0_115] : memref<18x256xf32, #tpu.memory_space<vmem>>, vector<1x256xf32>
    tpu.vector_store %arg14[%c11, %c0_115], %120 {strides = array<i32>} : memref<18x256xf32, #tpu.memory_space<vmem>>, vector<1x256xf32>,
    %122 = vector.extract_strided_slice %96 {offsets = [5, 0], sizes = [1, 256], strides = [1, 1]} : vector<8x256xf32> to vector<1x256xf32>
    %c12 = arith.constant 12 : index
    %c0_116 = arith.constant 0 : index
    %123 = vector.load %arg14[%c12, %c0_116] : memref<18x256xf32, #tpu.memory_space<vmem>>, vector<1x256xf32>
    tpu.vector_store %arg14[%c12, %c0_116], %122 {strides = array<i32>} : memref<18x256xf32, #tpu.memory_space<vmem>>, vector<1x256xf32>,
    %124 = vector.extract_strided_slice %92 {offsets = [6, 0], sizes = [1, 256], strides = [1, 1]} : vector<8x256xf32> to vector<1x256xf32>
    %c13 = arith.constant 13 : index
    %c0_117 = arith.constant 0 : index
    %125 = vector.load %arg14[%c13, %c0_117] : memref<18x256xf32, #tpu.memory_space<vmem>>, vector<1x256xf32>
    tpu.vector_store %arg14[%c13, %c0_117], %124 {strides = array<i32>} : memref<18x256xf32, #tpu.memory_space<vmem>>, vector<1x256xf32>,
    %126 = vector.extract_strided_slice %96 {offsets = [6, 0], sizes = [1, 256], strides = [1, 1]} : vector<8x256xf32> to vector<1x256xf32>
    %c14 = arith.constant 14 : index
    %c0_118 = arith.constant 0 : index
    %127 = vector.load %arg14[%c14, %c0_118] : memref<18x256xf32, #tpu.memory_space<vmem>>, vector<1x256xf32>
    tpu.vector_store %arg14[%c14, %c0_118], %126 {strides = array<i32>} : memref<18x256xf32, #tpu.memory_space<vmem>>, vector<1x256xf32>,
    %128 = vector.extract_strided_slice %92 {offsets = [7, 0], sizes = [1, 256], strides = [1, 1]} : vector<8x256xf32> to vector<1x256xf32>
    %c15 = arith.constant 15 : index
    %c0_119 = arith.constant 0 : index
    %129 = vector.load %arg14[%c15, %c0_119] : memref<18x256xf32, #tpu.memory_space<vmem>>, vector<1x256xf32>
    tpu.vector_store %arg14[%c15, %c0_119], %128 {strides = array<i32>} : memref<18x256xf32, #tpu.memory_space<vmem>>, vector<1x256xf32>,
    %130 = vector.extract_strided_slice %96 {offsets = [7, 0], sizes = [1, 256], strides = [1, 1]} : vector<8x256xf32> to vector<1x256xf32>
    %c16 = arith.constant 16 : index
    %c0_120 = arith.constant 0 : index
    %131 = vector.load %arg14[%c16, %c0_120] : memref<18x256xf32, #tpu.memory_space<vmem>>, vector<1x256xf32>
    tpu.vector_store %arg14[%c16, %c0_120], %130 {strides = array<i32>} : memref<18x256xf32, #tpu.memory_space<vmem>>, vector<1x256xf32>,
    %c0_121 = arith.constant 0 : index
    %c0_122 = arith.constant 0 : index
    %132 = vector.load %arg14[%c0_121, %c0_122] : memref<18x256xf32, #tpu.memory_space<vmem>>, vector<16x256xf32>
    %133 = arith.truncf %132 : vector<16x256xf32> to vector<16x256xbf16>
    %c1_123 = arith.constant 1 : index
    %c0_124 = arith.constant 0 : index
    %134 = vector.load %arg14[%c1_123, %c0_124] : memref<18x256xf32, #tpu.memory_space<vmem>>, vector<16x256xf32>
    %135 = arith.truncf %134 : vector<16x256xf32> to vector<16x256xbf16>
    %c2_125 = arith.constant 2 : index
    %c0_126 = arith.constant 0 : index
    %136 = vector.load %arg14[%c2_125, %c0_126] : memref<18x256xf32, #tpu.memory_space<vmem>>, vector<16x256xf32>
    %137 = arith.truncf %136 : vector<16x256xf32> to vector<16x256xbf16>
    %c0_127 = arith.constant 0 : index
    %c0_128 = arith.constant 0 : index
    %c0_129 = arith.constant 0 : index
    %c0_130 = arith.constant 0 : index
    %138 = vector.load %arg8[%c0_127, %c0_128, %c0_129, %c0_130] : memref<2x2x256x256xbf16, #tpu.memory_space<vmem>>, vector<1x1x256x256xbf16>
    %139 = vector.shape_cast %138 : vector<1x1x256x256xbf16> to vector<256x256xbf16>
    %cst_131 = arith.constant dense<0.000000e+00> : vector<16x256xf32>
    %140 = tpu.matmul %133, %139, %cst_131 {dimension_numbers = #tpu.dot_dimension_numbers<[1], [0], [0], [1], [0, 0, 1, 1], [], []>} : vector<16x256xbf16>, vector<256x256xbf16>, vector<16x256xf32> -> vector<16x256xf32>
    %c0_132 = arith.constant 0 : index
    %c1_133 = arith.constant 1 : index
    %c0_134 = arith.constant 0 : index
    %c0_135 = arith.constant 0 : index
    %141 = vector.load %arg8[%c0_132, %c1_133, %c0_134, %c0_135] : memref<2x2x256x256xbf16, #tpu.memory_space<vmem>>, vector<1x1x256x256xbf16>
    %142 = vector.shape_cast %141 : vector<1x1x256x256xbf16> to vector<256x256xbf16>
    %cst_136 = arith.constant dense<0.000000e+00> : vector<16x256xf32>
    %143 = tpu.matmul %135, %142, %cst_136 {dimension_numbers = #tpu.dot_dimension_numbers<[1], [0], [0], [1], [0, 0, 1, 1], [], []>} : vector<16x256xbf16>, vector<256x256xbf16>, vector<16x256xf32> -> vector<16x256xf32>
    %144 = arith.addf %140, %143 : vector<16x256xf32>
    %c1_137 = arith.constant 1 : index
    %c0_138 = arith.constant 0 : index
    %c0_139 = arith.constant 0 : index
    %c0_140 = arith.constant 0 : index
    %145 = vector.load %arg8[%c1_137, %c0_138, %c0_139, %c0_140] : memref<2x2x256x256xbf16, #tpu.memory_space<vmem>>, vector<1x1x256x256xbf16>
    %146 = vector.shape_cast %145 : vector<1x1x256x256xbf16> to vector<256x256xbf16>
    %cst_141 = arith.constant dense<0.000000e+00> : vector<16x256xf32>
    %147 = tpu.matmul %135, %146, %cst_141 {dimension_numbers = #tpu.dot_dimension_numbers<[1], [0], [0], [1], [0, 0, 1, 1], [], []>} : vector<16x256xbf16>, vector<256x256xbf16>, vector<16x256xf32> -> vector<16x256xf32>
    %c1_142 = arith.constant 1 : index
    %c1_143 = arith.constant 1 : index
    %c0_144 = arith.constant 0 : index
    %c0_145 = arith.constant 0 : index
    %148 = vector.load %arg8[%c1_142, %c1_143, %c0_144, %c0_145] : memref<2x2x256x256xbf16, #tpu.memory_space<vmem>>, vector<1x1x256x256xbf16>
    %149 = vector.shape_cast %148 : vector<1x1x256x256xbf16> to vector<256x256xbf16>
    %cst_146 = arith.constant dense<0.000000e+00> : vector<16x256xf32>
    %150 = tpu.matmul %137, %149, %cst_146 {dimension_numbers = #tpu.dot_dimension_numbers<[1], [0], [0], [1], [0, 0, 1, 1], [], []>} : vector<16x256xbf16>, vector<256x256xbf16>, vector<16x256xf32> -> vector<16x256xf32>
    %151 = arith.addf %147, %150 : vector<16x256xf32>
    %c0_147 = arith.constant 0 : index
    %c0_148 = arith.constant 0 : index
    %152 = vector.load %arg9[%c0_147, %c0_148] : memref<1x256xf32, #tpu.memory_space<vmem>>, vector<1x256xf32>
    %153 = vector.broadcast %152 : vector<1x256xf32> to vector<16x256xf32>
    %154 = arith.addf %144, %153 : vector<16x256xf32>
    %cst_149 = arith.constant 0.000000e+00 : f32
    %155 = vector.broadcast %cst_149 : f32 to vector<16x256xf32>
    %156 = arith.maximumf %154, %155 : vector<16x256xf32>
    %157 = vector.broadcast %152 : vector<1x256xf32> to vector<16x256xf32>
    %158 = arith.addf %151, %157 : vector<16x256xf32>
    %cst_150 = arith.constant 0.000000e+00 : f32
    %159 = vector.broadcast %cst_150 : f32 to vector<16x256xf32>
    %160 = arith.maximumf %158, %159 : vector<16x256xf32>
    %cst_151 = arith.constant 0.000000e+00 : f32
    %161 = vector.broadcast %cst_151 : f32 to vector<1x256xf32>
    %c0_152 = arith.constant 0 : index
    %c0_153 = arith.constant 0 : index
    %162 = vector.load %arg15[%c0_152, %c0_153] : memref<34x256xf32, #tpu.memory_space<vmem>>, vector<1x256xf32>
    tpu.vector_store %arg15[%c0_152, %c0_153], %161 {strides = array<i32>} : memref<34x256xf32, #tpu.memory_space<vmem>>, vector<1x256xf32>,
    %c33 = arith.constant 33 : index
    %c0_154 = arith.constant 0 : index
    %163 = vector.load %arg15[%c33, %c0_154] : memref<34x256xf32, #tpu.memory_space<vmem>>, vector<1x256xf32>
    tpu.vector_store %arg15[%c33, %c0_154], %161 {strides = array<i32>} : memref<34x256xf32, #tpu.memory_space<vmem>>, vector<1x256xf32>,
    %164 = vector.extract_strided_slice %156 {offsets = [0, 0], sizes = [1, 256], strides = [1, 1]} : vector<16x256xf32> to vector<1x256xf32>
    %c1_155 = arith.constant 1 : index
    %c0_156 = arith.constant 0 : index
    %165 = vector.load %arg15[%c1_155, %c0_156] : memref<34x256xf32, #tpu.memory_space<vmem>>, vector<1x256xf32>
    tpu.vector_store %arg15[%c1_155, %c0_156], %164 {strides = array<i32>} : memref<34x256xf32, #tpu.memory_space<vmem>>, vector<1x256xf32>,
    %166 = vector.extract_strided_slice %160 {offsets = [0, 0], sizes = [1, 256], strides = [1, 1]} : vector<16x256xf32> to vector<1x256xf32>
    %c2_157 = arith.constant 2 : index
    %c0_158 = arith.constant 0 : index
    %167 = vector.load %arg15[%c2_157, %c0_158] : memref<34x256xf32, #tpu.memory_space<vmem>>, vector<1x256xf32>
    tpu.vector_store %arg15[%c2_157, %c0_158], %166 {strides = array<i32>} : memref<34x256xf32, #tpu.memory_space<vmem>>, vector<1x256xf32>,
    %168 = vector.extract_strided_slice %156 {offsets = [1, 0], sizes = [1, 256], strides = [1, 1]} : vector<16x256xf32> to vector<1x256xf32>
    %c3_159 = arith.constant 3 : index
    %c0_160 = arith.constant 0 : index
    %169 = vector.load %arg15[%c3_159, %c0_160] : memref<34x256xf32, #tpu.memory_space<vmem>>, vector<1x256xf32>
    tpu.vector_store %arg15[%c3_159, %c0_160], %168 {strides = array<i32>} : memref<34x256xf32, #tpu.memory_space<vmem>>, vector<1x256xf32>,
    %170 = vector.extract_strided_slice %160 {offsets = [1, 0], sizes = [1, 256], strides = [1, 1]} : vector<16x256xf32> to vector<1x256xf32>
    %c4_161 = arith.constant 4 : index
    %c0_162 = arith.constant 0 : index
    %171 = vector.load %arg15[%c4_161, %c0_162] : memref<34x256xf32, #tpu.memory_space<vmem>>, vector<1x256xf32>
    tpu.vector_store %arg15[%c4_161, %c0_162], %170 {strides = array<i32>} : memref<34x256xf32, #tpu.memory_space<vmem>>, vector<1x256xf32>,
    %172 = vector.extract_strided_slice %156 {offsets = [2, 0], sizes = [1, 256], strides = [1, 1]} : vector<16x256xf32> to vector<1x256xf32>
    %c5_163 = arith.constant 5 : index
    %c0_164 = arith.constant 0 : index
    %173 = vector.load %arg15[%c5_163, %c0_164] : memref<34x256xf32, #tpu.memory_space<vmem>>, vector<1x256xf32>
    tpu.vector_store %arg15[%c5_163, %c0_164], %172 {strides = array<i32>} : memref<34x256xf32, #tpu.memory_space<vmem>>, vector<1x256xf32>,
    %174 = vector.extract_strided_slice %160 {offsets = [2, 0], sizes = [1, 256], strides = [1, 1]} : vector<16x256xf32> to vector<1x256xf32>
    %c6_165 = arith.constant 6 : index
    %c0_166 = arith.constant 0 : index
    %175 = vector.load %arg15[%c6_165, %c0_166] : memref<34x256xf32, #tpu.memory_space<vmem>>, vector<1x256xf32>
    tpu.vector_store %arg15[%c6_165, %c0_166], %174 {strides = array<i32>} : memref<34x256xf32, #tpu.memory_space<vmem>>, vector<1x256xf32>,
    %176 = vector.extract_strided_slice %156 {offsets = [3, 0], sizes = [1, 256], strides = [1, 1]} : vector<16x256xf32> to vector<1x256xf32>
    %c7_167 = arith.constant 7 : index
    %c0_168 = arith.constant 0 : index
    %177 = vector.load %arg15[%c7_167, %c0_168] : memref<34x256xf32, #tpu.memory_space<vmem>>, vector<1x256xf32>
    tpu.vector_store %arg15[%c7_167, %c0_168], %176 {strides = array<i32>} : memref<34x256xf32, #tpu.memory_space<vmem>>, vector<1x256xf32>,
    %178 = vector.extract_strided_slice %160 {offsets = [3, 0], sizes = [1, 256], strides = [1, 1]} : vector<16x256xf32> to vector<1x256xf32>
    %c8_169 = arith.constant 8 : index
    %c0_170 = arith.constant 0 : index
    %179 = vector.load %arg15[%c8_169, %c0_170] : memref<34x256xf32, #tpu.memory_space<vmem>>, vector<1x256xf32>
    tpu.vector_store %arg15[%c8_169, %c0_170], %178 {strides = array<i32>} : memref<34x256xf32, #tpu.memory_space<vmem>>, vector<1x256xf32>,
    %180 = vector.extract_strided_slice %156 {offsets = [4, 0], sizes = [1, 256], strides = [1, 1]} : vector<16x256xf32> to vector<1x256xf32>
    %c9_171 = arith.constant 9 : index
    %c0_172 = arith.constant 0 : index
    %181 = vector.load %arg15[%c9_171, %c0_172] : memref<34x256xf32, #tpu.memory_space<vmem>>, vector<1x256xf32>
    tpu.vector_store %arg15[%c9_171, %c0_172], %180 {strides = array<i32>} : memref<34x256xf32, #tpu.memory_space<vmem>>, vector<1x256xf32>,
    %182 = vector.extract_strided_slice %160 {offsets = [4, 0], sizes = [1, 256], strides = [1, 1]} : vector<16x256xf32> to vector<1x256xf32>
    %c10_173 = arith.constant 10 : index
    %c0_174 = arith.constant 0 : index
    %183 = vector.load %arg15[%c10_173, %c0_174] : memref<34x256xf32, #tpu.memory_space<vmem>>, vector<1x256xf32>
    tpu.vector_store %arg15[%c10_173, %c0_174], %182 {strides = array<i32>} : memref<34x256xf32, #tpu.memory_space<vmem>>, vector<1x256xf32>,
    %184 = vector.extract_strided_slice %156 {offsets = [5, 0], sizes = [1, 256], strides = [1, 1]} : vector<16x256xf32> to vector<1x256xf32>
    %c11_175 = arith.constant 11 : index
    %c0_176 = arith.constant 0 : index
    %185 = vector.load %arg15[%c11_175, %c0_176] : memref<34x256xf32, #tpu.memory_space<vmem>>, vector<1x256xf32>
    tpu.vector_store %arg15[%c11_175, %c0_176], %184 {strides = array<i32>} : memref<34x256xf32, #tpu.memory_space<vmem>>, vector<1x256xf32>,
    %186 = vector.extract_strided_slice %160 {offsets = [5, 0], sizes = [1, 256], strides = [1, 1]} : vector<16x256xf32> to vector<1x256xf32>
    %c12_177 = arith.constant 12 : index
    %c0_178 = arith.constant 0 : index
    %187 = vector.load %arg15[%c12_177, %c0_178] : memref<34x256xf32, #tpu.memory_space<vmem>>, vector<1x256xf32>
    tpu.vector_store %arg15[%c12_177, %c0_178], %186 {strides = array<i32>} : memref<34x256xf32, #tpu.memory_space<vmem>>, vector<1x256xf32>,
    %188 = vector.extract_strided_slice %156 {offsets = [6, 0], sizes = [1, 256], strides = [1, 1]} : vector<16x256xf32> to vector<1x256xf32>
    %c13_179 = arith.constant 13 : index
    %c0_180 = arith.constant 0 : index
    %189 = vector.load %arg15[%c13_179, %c0_180] : memref<34x256xf32, #tpu.memory_space<vmem>>, vector<1x256xf32>
    tpu.vector_store %arg15[%c13_179, %c0_180], %188 {strides = array<i32>} : memref<34x256xf32, #tpu.memory_space<vmem>>, vector<1x256xf32>,
    %190 = vector.extract_strided_slice %160 {offsets = [6, 0], sizes = [1, 256], strides = [1, 1]} : vector<16x256xf32> to vector<1x256xf32>
    %c14_181 = arith.constant 14 : index
    %c0_182 = arith.constant 0 : index
    %191 = vector.load %arg15[%c14_181, %c0_182] : memref<34x256xf32, #tpu.memory_space<vmem>>, vector<1x256xf32>
    tpu.vector_store %arg15[%c14_181, %c0_182], %190 {strides = array<i32>} : memref<34x256xf32, #tpu.memory_space<vmem>>, vector<1x256xf32>,
    %192 = vector.extract_strided_slice %156 {offsets = [7, 0], sizes = [1, 256], strides = [1, 1]} : vector<16x256xf32> to vector<1x256xf32>
    %c15_183 = arith.constant 15 : index
    %c0_184 = arith.constant 0 : index
    %193 = vector.load %arg15[%c15_183, %c0_184] : memref<34x256xf32, #tpu.memory_space<vmem>>, vector<1x256xf32>
    tpu.vector_store %arg15[%c15_183, %c0_184], %192 {strides = array<i32>} : memref<34x256xf32, #tpu.memory_space<vmem>>, vector<1x256xf32>,
    %194 = vector.extract_strided_slice %160 {offsets = [7, 0], sizes = [1, 256], strides = [1, 1]} : vector<16x256xf32> to vector<1x256xf32>
    %c16_185 = arith.constant 16 : index
    %c0_186 = arith.constant 0 : index
    %195 = vector.load %arg15[%c16_185, %c0_186] : memref<34x256xf32, #tpu.memory_space<vmem>>, vector<1x256xf32>
    tpu.vector_store %arg15[%c16_185, %c0_186], %194 {strides = array<i32>} : memref<34x256xf32, #tpu.memory_space<vmem>>, vector<1x256xf32>,
    %196 = vector.extract_strided_slice %156 {offsets = [8, 0], sizes = [1, 256], strides = [1, 1]} : vector<16x256xf32> to vector<1x256xf32>
    %c17_187 = arith.constant 17 : index
    %c0_188 = arith.constant 0 : index
    %197 = vector.load %arg15[%c17_187, %c0_188] : memref<34x256xf32, #tpu.memory_space<vmem>>, vector<1x256xf32>
    tpu.vector_store %arg15[%c17_187, %c0_188], %196 {strides = array<i32>} : memref<34x256xf32, #tpu.memory_space<vmem>>, vector<1x256xf32>,
    %198 = vector.extract_strided_slice %160 {offsets = [8, 0], sizes = [1, 256], strides = [1, 1]} : vector<16x256xf32> to vector<1x256xf32>
    %c18 = arith.constant 18 : index
    %c0_189 = arith.constant 0 : index
    %199 = vector.load %arg15[%c18, %c0_189] : memref<34x256xf32, #tpu.memory_space<vmem>>, vector<1x256xf32>
    tpu.vector_store %arg15[%c18, %c0_189], %198 {strides = array<i32>} : memref<34x256xf32, #tpu.memory_space<vmem>>, vector<1x256xf32>,
    %200 = vector.extract_strided_slice %156 {offsets = [9, 0], sizes = [1, 256], strides = [1, 1]} : vector<16x256xf32> to vector<1x256xf32>
    %c19 = arith.constant 19 : index
    %c0_190 = arith.constant 0 : index
    %201 = vector.load %arg15[%c19, %c0_190] : memref<34x256xf32, #tpu.memory_space<vmem>>, vector<1x256xf32>
    tpu.vector_store %arg15[%c19, %c0_190], %200 {strides = array<i32>} : memref<34x256xf32, #tpu.memory_space<vmem>>, vector<1x256xf32>,
    %202 = vector.extract_strided_slice %160 {offsets = [9, 0], sizes = [1, 256], strides = [1, 1]} : vector<16x256xf32> to vector<1x256xf32>
    %c20 = arith.constant 20 : index
    %c0_191 = arith.constant 0 : index
    %203 = vector.load %arg15[%c20, %c0_191] : memref<34x256xf32, #tpu.memory_space<vmem>>, vector<1x256xf32>
    tpu.vector_store %arg15[%c20, %c0_191], %202 {strides = array<i32>} : memref<34x256xf32, #tpu.memory_space<vmem>>, vector<1x256xf32>,
    %204 = vector.extract_strided_slice %156 {offsets = [10, 0], sizes = [1, 256], strides = [1, 1]} : vector<16x256xf32> to vector<1x256xf32>
    %c21 = arith.constant 21 : index
    %c0_192 = arith.constant 0 : index
    %205 = vector.load %arg15[%c21, %c0_192] : memref<34x256xf32, #tpu.memory_space<vmem>>, vector<1x256xf32>
    tpu.vector_store %arg15[%c21, %c0_192], %204 {strides = array<i32>} : memref<34x256xf32, #tpu.memory_space<vmem>>, vector<1x256xf32>,
    %206 = vector.extract_strided_slice %160 {offsets = [10, 0], sizes = [1, 256], strides = [1, 1]} : vector<16x256xf32> to vector<1x256xf32>
    %c22 = arith.constant 22 : index
    %c0_193 = arith.constant 0 : index
    %207 = vector.load %arg15[%c22, %c0_193] : memref<34x256xf32, #tpu.memory_space<vmem>>, vector<1x256xf32>
    tpu.vector_store %arg15[%c22, %c0_193], %206 {strides = array<i32>} : memref<34x256xf32, #tpu.memory_space<vmem>>, vector<1x256xf32>,
    %208 = vector.extract_strided_slice %156 {offsets = [11, 0], sizes = [1, 256], strides = [1, 1]} : vector<16x256xf32> to vector<1x256xf32>
    %c23 = arith.constant 23 : index
    %c0_194 = arith.constant 0 : index
    %209 = vector.load %arg15[%c23, %c0_194] : memref<34x256xf32, #tpu.memory_space<vmem>>, vector<1x256xf32>
    tpu.vector_store %arg15[%c23, %c0_194], %208 {strides = array<i32>} : memref<34x256xf32, #tpu.memory_space<vmem>>, vector<1x256xf32>,
    %210 = vector.extract_strided_slice %160 {offsets = [11, 0], sizes = [1, 256], strides = [1, 1]} : vector<16x256xf32> to vector<1x256xf32>
    %c24 = arith.constant 24 : index
    %c0_195 = arith.constant 0 : index
    %211 = vector.load %arg15[%c24, %c0_195] : memref<34x256xf32, #tpu.memory_space<vmem>>, vector<1x256xf32>
    tpu.vector_store %arg15[%c24, %c0_195], %210 {strides = array<i32>} : memref<34x256xf32, #tpu.memory_space<vmem>>, vector<1x256xf32>,
    %212 = vector.extract_strided_slice %156 {offsets = [12, 0], sizes = [1, 256], strides = [1, 1]} : vector<16x256xf32> to vector<1x256xf32>
    %c25 = arith.constant 25 : index
    %c0_196 = arith.constant 0 : index
    %213 = vector.load %arg15[%c25, %c0_196] : memref<34x256xf32, #tpu.memory_space<vmem>>, vector<1x256xf32>
    tpu.vector_store %arg15[%c25, %c0_196], %212 {strides = array<i32>} : memref<34x256xf32, #tpu.memory_space<vmem>>, vector<1x256xf32>,
    %214 = vector.extract_strided_slice %160 {offsets = [12, 0], sizes = [1, 256], strides = [1, 1]} : vector<16x256xf32> to vector<1x256xf32>
    %c26 = arith.constant 26 : index
    %c0_197 = arith.constant 0 : index
    %215 = vector.load %arg15[%c26, %c0_197] : memref<34x256xf32, #tpu.memory_space<vmem>>, vector<1x256xf32>
    tpu.vector_store %arg15[%c26, %c0_197], %214 {strides = array<i32>} : memref<34x256xf32, #tpu.memory_space<vmem>>, vector<1x256xf32>,
    %216 = vector.extract_strided_slice %156 {offsets = [13, 0], sizes = [1, 256], strides = [1, 1]} : vector<16x256xf32> to vector<1x256xf32>
    %c27 = arith.constant 27 : index
    %c0_198 = arith.constant 0 : index
    %217 = vector.load %arg15[%c27, %c0_198] : memref<34x256xf32, #tpu.memory_space<vmem>>, vector<1x256xf32>
    tpu.vector_store %arg15[%c27, %c0_198], %216 {strides = array<i32>} : memref<34x256xf32, #tpu.memory_space<vmem>>, vector<1x256xf32>,
    %218 = vector.extract_strided_slice %160 {offsets = [13, 0], sizes = [1, 256], strides = [1, 1]} : vector<16x256xf32> to vector<1x256xf32>
    %c28 = arith.constant 28 : index
    %c0_199 = arith.constant 0 : index
    %219 = vector.load %arg15[%c28, %c0_199] : memref<34x256xf32, #tpu.memory_space<vmem>>, vector<1x256xf32>
    tpu.vector_store %arg15[%c28, %c0_199], %218 {strides = array<i32>} : memref<34x256xf32, #tpu.memory_space<vmem>>, vector<1x256xf32>,
    %220 = vector.extract_strided_slice %156 {offsets = [14, 0], sizes = [1, 256], strides = [1, 1]} : vector<16x256xf32> to vector<1x256xf32>
    %c29 = arith.constant 29 : index
    %c0_200 = arith.constant 0 : index
    %221 = vector.load %arg15[%c29, %c0_200] : memref<34x256xf32, #tpu.memory_space<vmem>>, vector<1x256xf32>
    tpu.vector_store %arg15[%c29, %c0_200], %220 {strides = array<i32>} : memref<34x256xf32, #tpu.memory_space<vmem>>, vector<1x256xf32>,
    %222 = vector.extract_strided_slice %160 {offsets = [14, 0], sizes = [1, 256], strides = [1, 1]} : vector<16x256xf32> to vector<1x256xf32>
    %c30 = arith.constant 30 : index
    %c0_201 = arith.constant 0 : index
    %223 = vector.load %arg15[%c30, %c0_201] : memref<34x256xf32, #tpu.memory_space<vmem>>, vector<1x256xf32>
    tpu.vector_store %arg15[%c30, %c0_201], %222 {strides = array<i32>} : memref<34x256xf32, #tpu.memory_space<vmem>>, vector<1x256xf32>,
    %224 = vector.extract_strided_slice %156 {offsets = [15, 0], sizes = [1, 256], strides = [1, 1]} : vector<16x256xf32> to vector<1x256xf32>
    %c31 = arith.constant 31 : index
    %c0_202 = arith.constant 0 : index
    %225 = vector.load %arg15[%c31, %c0_202] : memref<34x256xf32, #tpu.memory_space<vmem>>, vector<1x256xf32>
    tpu.vector_store %arg15[%c31, %c0_202], %224 {strides = array<i32>} : memref<34x256xf32, #tpu.memory_space<vmem>>, vector<1x256xf32>,
    %226 = vector.extract_strided_slice %160 {offsets = [15, 0], sizes = [1, 256], strides = [1, 1]} : vector<16x256xf32> to vector<1x256xf32>
    %c32 = arith.constant 32 : index
    %c0_203 = arith.constant 0 : index
    %227 = vector.load %arg15[%c32, %c0_203] : memref<34x256xf32, #tpu.memory_space<vmem>>, vector<1x256xf32>
    tpu.vector_store %arg15[%c32, %c0_203], %226 {strides = array<i32>} : memref<34x256xf32, #tpu.memory_space<vmem>>, vector<1x256xf32>,
    %c0_204 = arith.constant 0 : index
    %c0_205 = arith.constant 0 : index
    %228 = vector.load %arg15[%c0_204, %c0_205] : memref<34x256xf32, #tpu.memory_space<vmem>>, vector<32x256xf32>
    %229 = arith.truncf %228 : vector<32x256xf32> to vector<32x256xbf16>
    %c1_206 = arith.constant 1 : index
    %c0_207 = arith.constant 0 : index
    %230 = vector.load %arg15[%c1_206, %c0_207] : memref<34x256xf32, #tpu.memory_space<vmem>>, vector<32x256xf32>
    %231 = arith.truncf %230 : vector<32x256xf32> to vector<32x256xbf16>
    %c2_208 = arith.constant 2 : index
    %c0_209 = arith.constant 0 : index
    %232 = vector.load %arg15[%c2_208, %c0_209] : memref<34x256xf32, #tpu.memory_space<vmem>>, vector<32x256xf32>
    %233 = arith.truncf %232 : vector<32x256xf32> to vector<32x256xbf16>
    %c0_210 = arith.constant 0 : index
    %c0_211 = arith.constant 0 : index
    %c0_212 = arith.constant 0 : index
    %c0_213 = arith.constant 0 : index
    %234 = vector.load %arg10[%c0_210, %c0_211, %c0_212, %c0_213] : memref<2x2x256x192xbf16, #tpu.memory_space<vmem>>, vector<1x1x256x192xbf16>
    %235 = vector.shape_cast %234 : vector<1x1x256x192xbf16> to vector<256x192xbf16>
    %cst_214 = arith.constant dense<0.000000e+00> : vector<32x192xf32>
    %236 = tpu.matmul %229, %235, %cst_214 {dimension_numbers = #tpu.dot_dimension_numbers<[1], [0], [0], [1], [0, 0, 1, 1], [], []>} : vector<32x256xbf16>, vector<256x192xbf16>, vector<32x192xf32> -> vector<32x192xf32>
    %c0_215 = arith.constant 0 : index
    %c1_216 = arith.constant 1 : index
    %c0_217 = arith.constant 0 : index
    %c0_218 = arith.constant 0 : index
    %237 = vector.load %arg10[%c0_215, %c1_216, %c0_217, %c0_218] : memref<2x2x256x192xbf16, #tpu.memory_space<vmem>>, vector<1x1x256x192xbf16>
    %238 = vector.shape_cast %237 : vector<1x1x256x192xbf16> to vector<256x192xbf16>
    %cst_219 = arith.constant dense<0.000000e+00> : vector<32x192xf32>
    %239 = tpu.matmul %231, %238, %cst_219 {dimension_numbers = #tpu.dot_dimension_numbers<[1], [0], [0], [1], [0, 0, 1, 1], [], []>} : vector<32x256xbf16>, vector<256x192xbf16>, vector<32x192xf32> -> vector<32x192xf32>
    %240 = arith.addf %236, %239 : vector<32x192xf32>
    %c1_220 = arith.constant 1 : index
    %c0_221 = arith.constant 0 : index
    %c0_222 = arith.constant 0 : index
    %c0_223 = arith.constant 0 : index
    %241 = vector.load %arg10[%c1_220, %c0_221, %c0_222, %c0_223] : memref<2x2x256x192xbf16, #tpu.memory_space<vmem>>, vector<1x1x256x192xbf16>
    %242 = vector.shape_cast %241 : vector<1x1x256x192xbf16> to vector<256x192xbf16>
    %cst_224 = arith.constant dense<0.000000e+00> : vector<32x192xf32>
    %243 = tpu.matmul %231, %242, %cst_224 {dimension_numbers = #tpu.dot_dimension_numbers<[1], [0], [0], [1], [0, 0, 1, 1], [], []>} : vector<32x256xbf16>, vector<256x192xbf16>, vector<32x192xf32> -> vector<32x192xf32>
    %c1_225 = arith.constant 1 : index
    %c1_226 = arith.constant 1 : index
    %c0_227 = arith.constant 0 : index
    %c0_228 = arith.constant 0 : index
    %244 = vector.load %arg10[%c1_225, %c1_226, %c0_227, %c0_228] : memref<2x2x256x192xbf16, #tpu.memory_space<vmem>>, vector<1x1x256x192xbf16>
    %245 = vector.shape_cast %244 : vector<1x1x256x192xbf16> to vector<256x192xbf16>
    %cst_229 = arith.constant dense<0.000000e+00> : vector<32x192xf32>
    %246 = tpu.matmul %233, %245, %cst_229 {dimension_numbers = #tpu.dot_dimension_numbers<[1], [0], [0], [1], [0, 0, 1, 1], [], []>} : vector<32x256xbf16>, vector<256x192xbf16>, vector<32x192xf32> -> vector<32x192xf32>
    %247 = arith.addf %243, %246 : vector<32x192xf32>
    %c0_230 = arith.constant 0 : index
    %c0_231 = arith.constant 0 : index
    %c0_232 = arith.constant 0 : index
    %c0_233 = arith.constant 0 : index
    %248 = vector.load %arg11[%c0_230, %c0_231, %c0_232, %c0_233] : memref<1x2x32x192xf32, #tpu.memory_space<vmem>>, vector<1x1x32x192xf32>
    %249 = vector.shape_cast %248 : vector<1x1x32x192xf32> to vector<32x192xf32>
    %250 = vector.shape_cast %240 : vector<32x192xf32> to vector<1x1x32x192xf32>
    tpu.vector_store %arg11[%c0_230, %c0_231, %c0_232, %c0_233], %250 {strides = array<i32>} : memref<1x2x32x192xf32, #tpu.memory_space<vmem>>, vector<1x1x32x192xf32>,
    %c0_234 = arith.constant 0 : index
    %c1_235 = arith.constant 1 : index
    %c0_236 = arith.constant 0 : index
    %c0_237 = arith.constant 0 : index
    %251 = vector.load %arg11[%c0_234, %c1_235, %c0_236, %c0_237] : memref<1x2x32x192xf32, #tpu.memory_space<vmem>>, vector<1x1x32x192xf32>
    %252 = vector.shape_cast %251 : vector<1x1x32x192xf32> to vector<32x192xf32>
    %253 = vector.shape_cast %247 : vector<32x192xf32> to vector<1x1x32x192xf32>
    tpu.vector_store %arg11[%c0_234, %c1_235, %c0_236, %c0_237], %253 {strides = array<i32>} : memref<1x2x32x192xf32, #tpu.memory_space<vmem>>, vector<1x1x32x192xf32>,
    return
  }
  func.func @transform_0(%arg0: i32) -> (i32, i32, i32) {
    %c0_i32 = arith.constant 0 : i32
    %c0_i32_0 = arith.constant 0 : i32
    %c0_i32_1 = arith.constant 0 : i32
    return %arg0, %c0_i32, %c0_i32_0 : i32, i32, i32
  }
  func.func @transform_1(%arg0: i32) -> (i32, i32) {
    %c0_i32 = arith.constant 0 : i32
    %c0_i32_0 = arith.constant 0 : i32
    %c0_i32_1 = arith.constant 0 : i32
    return %c0_i32, %c0_i32_0 : i32, i32
  }
  func.func @transform_2(%arg0: i32) -> (i32, i32) {
    %c0_i32 = arith.constant 0 : i32
    %c0_i32_0 = arith.constant 0 : i32
    %c0_i32_1 = arith.constant 0 : i32
    return %c0_i32, %c0_i32_0 : i32, i32
  }
  func.func @transform_3(%arg0: i32) -> (i32, i32, i32, i32) {
    %c0_i32 = arith.constant 0 : i32
    %c0_i32_0 = arith.constant 0 : i32
    %c0_i32_1 = arith.constant 0 : i32
    %c0_i32_2 = arith.constant 0 : i32
    %c0_i32_3 = arith.constant 0 : i32
    return %c0_i32, %c0_i32_0, %c0_i32_1, %c0_i32_2 : i32, i32, i32, i32
  }
  func.func @transform_4(%arg0: i32) -> (i32, i32) {
    %c0_i32 = arith.constant 0 : i32
    %c0_i32_0 = arith.constant 0 : i32
    %c0_i32_1 = arith.constant 0 : i32
    return %c0_i32, %c0_i32_0 : i32, i32
  }
  func.func @transform_5(%arg0: i32) -> (i32, i32, i32, i32) {
    %c0_i32 = arith.constant 0 : i32
    %c0_i32_0 = arith.constant 0 : i32
    %c0_i32_1 = arith.constant 0 : i32
    %c0_i32_2 = arith.constant 0 : i32
    %c0_i32_3 = arith.constant 0 : i32
    return %c0_i32, %c0_i32_0, %c0_i32_1, %c0_i32_2 : i32, i32, i32, i32
  }
  func.func @transform_6(%arg0: i32) -> (i32, i32) {
    %c0_i32 = arith.constant 0 : i32
    %c0_i32_0 = arith.constant 0 : i32
    %c0_i32_1 = arith.constant 0 : i32
    return %c0_i32, %c0_i32_0 : i32, i32
  }
  func.func @transform_7(%arg0: i32) -> (i32, i32, i32, i32) {
    %c0_i32 = arith.constant 0 : i32
    %c0_i32_0 = arith.constant 0 : i32
    %c0_i32_1 = arith.constant 0 : i32
    %c0_i32_2 = arith.constant 0 : i32
    %c0_i32_3 = arith.constant 0 : i32
    return %c0_i32, %c0_i32_0, %c0_i32_1, %c0_i32_2 : i32, i32, i32, i32
  }
  func.func @transform_8(%arg0: i32) -> (i32, i32) {
    %c0_i32 = arith.constant 0 : i32
    %c0_i32_0 = arith.constant 0 : i32
    %c0_i32_1 = arith.constant 0 : i32
    return %c0_i32, %c0_i32_0 : i32, i32
  }
  func.func @transform_9(%arg0: i32) -> (i32, i32, i32, i32) {
    %c0_i32 = arith.constant 0 : i32
    %c0_i32_0 = arith.constant 0 : i32
    %c0_i32_1 = arith.constant 0 : i32
    %c0_i32_2 = arith.constant 0 : i32
    %c0_i32_3 = arith.constant 0 : i32
    return %c0_i32, %c0_i32_0, %c0_i32_1, %c0_i32_2 : i32, i32, i32, i32
  }
  func.func @transform_10(%arg0: i32) -> (i32, i32, i32, i32) {
    %c0_i32 = arith.constant 0 : i32
    %c0_i32_0 = arith.constant 0 : i32
    %c0_i32_1 = arith.constant 0 : i32
    %c0_i32_2 = arith.constant 0 : i32
    return %arg0, %c0_i32, %c0_i32_0, %c0_i32_1 : i32, i32, i32, i32
  }
}

</mosaic_0001>

<bundles_post_ra>
// kernel: tpu_custom_call.1
= control target key start
LH: loop header
LB: loop body
LE: loop exit
PB: predicated region body
PF: predicated region fallthrough
CT: control target
= control target key end

     0   :  { %15 = vsyncpa [#allocation7], 0  ;;  %s8624_s0 = inlined_call_operand.vmem [shape: f32[2,1,16], index: 0, kind: input, shape index: {}]   ;;  %s8625_s1 = inlined_call_operand.vmem [shape: bf16[16,1024], index: 1, kind: input, shape index: {}]   ;;  %s8626_s2 = inlined_call_operand.vmem [shape: f32[1,1024], index: 2, kind: input, shape index: {}]   ;;  %s8627_s3 = inlined_call_operand.vmem [shape: bf16[2,2,256,256], index: 3, kind: input, shape index: {}]   ;;  %s8628_s4 = inlined_call_operand.vmem [shape: f32[1,256], index: 4, kind: input, shape index: {}]   ;;  %s8629_s5 = inlined_call_operand.hbm [shape: bf16[2,2,256,256], index: 5, kind: input, shape index: {}]   ;;  %s8630_s6 = inlined_call_operand.vmem [shape: f32[1,256], index: 6, kind: input, shape index: {}]   ;;  %s8631_s7 = inlined_call_operand.hbm [shape: bf16[2,2,256,256], index: 7, kind: input, shape index: {}]   ;;  %s8632_s8 = inlined_call_operand.vmem [shape: f32[1,256], index: 8, kind: input, shape index: {}]   ;;  %s8633_s9 = inlined_call_operand.vmem [shape: bf16[2,2,256,192], index: 9, kind: input, shape index: {}]   ;;  %s8634_s10 = inlined_call_operand.hbm [shape: f32[2,2,32,192], index: 10, kind: output, shape index: {}]  }
   0x1   :  { %16 = vsyncpa [#allocation10], 0 }
   0x2   :  { %17 = vsyncpa [#allocation8], 0 }
   0x3   :  { %19 = vsyncpa [#allocation8 + $0x1], 0  ;;  %s7343_s13 = smov 0   ;;  %s7345_s14 = smov 0  }
   0x4   :  { %s7347_s15 = smov 0   ;;  %s7349_s16 = smov 0  }
   0x5 LB: > { %8642 = sst [smem:[#allocation15_spill]] %s7272_s15  ;;  %s7364_s17 = sadd.s32 4294967295, %s7276_s16   ;;  %s7276_s16 = sphi %s7349_s16, %s8660_s16   ;;  %s7272_s15 = sphi %s7347_s15, %s8662_s15   ;;  %s7268_s14 = sphi %s7345_s14, %s8664_s14   ;;  %s7264_s13 = sphi %s7343_s13, %s8663_s13  }
   0x6   : > { %s5552_s18 = sadd.s32 4294967294, %s7276_s16   ;;  %s7368_s19 = sadd.s32 1, %s7276_s16  }
   0x7   : > { %8643 = sst [smem:[#allocation16_spill]] %s7368_s19  ;;  %s247_s20 = sadd.s32 1, %s7272_s15 }
   0x8   : > { %s244_s21 = ssub.s32 %s7276_s16, %s7368_s19  ;;  %p257_p0 = scmp.ne.s32.totalorder %s7272_s15, %s7268_s14 }
   0x9   : > { %p245_p1 = scmp.eq.s32.totalorder %s244_s21, 0  ;;  %p258_p2 = scmp.eq.s32.totalorder %s7364_s17, 1 }
   0xa   : > { %p263_p3 = scmp.ne.s32.totalorder %s7268_s14, %s7264_s13  ;;  %p264_p4 = scmp.eq.s32.totalorder %s5552_s18, 1 }
   0xb   : > { %s7379_s22 = scalar_select %p245_p1, %s7272_s15, %s247_s20  }
   0xc   : > { %p7381_p5 = por %p258_p2, %p257_p0  ;;  %p7385_p6 = por %p264_p4, %p263_p3 }
   0xd   : > { %8644 = sst [smem:[#allocation17_spill]] %s7379_s22  ;;  %p5553_p7 = scmp.ge.s32.totalorder %s7276_s16, 1 }
   0xe   : > { %s8645_s23 = scalar_select %p7381_p5, 1, 0 }
   0xf   : > { %s8646_s24 = scalar_select %p7385_p6, 1, 0 }
  0x10   : > { %p271_p8 = scmp.lt.s32.totalorder %s7276_s16, 3  ;;  %p8635_p9 = scmp.eq.s32.totalorder %s7364_s17, 0 }
  0x11   : > { %8647 = sst [smem:[#allocation18_spill]] %s8646_s24  ;;  %s7278_s26 = smov [#allocation6]  }
  0x12   : > { %p7392_p10 = pnand %p5553_p7, %p271_p8  ;;  %s295_s27 = sshll.u32 %s7278_s26, 4  ;;  %s296_s27 = int_to_ptr.vmem [resolvable:$true] %s295_s27 }
  0x13   : > { %s7279_s29 = smov [#allocation9]   ;;  %s7150_s18 = scalar_lea.hbm %s8629_s5, 16384 }
  0x14   : > { %s8648_s25 = scalar_select %p7392_p10, 1, 0 }
  0x15   : > { %p6325_p11 = pneg %p7392_p10  ;;  %s311_s30 = sshll.u32 %s7279_s29, 4  ;;  %s7404_s30 = int_to_ptr.vmem [resolvable:$true] %s311_s30 }
  0x16   : > { %p7151_p13 = scmp.ne.s32.totalorder %s8629_s5, %s7150_s18  ;;  %p7157_p3 = scmp.lt.u32.totalorder %s7150_s18, %s8629_s5 }
  0x17   : > { %p7400_p12 = pnand %p8635_p9, %p6325_p11 }
  0x19   : > { %p7152_p0 = pneg %p7400_p12 }
  0x1b   : > { %p7153_p1 = pnand %p7152_p0, %p7151_p13 }
  0x1d   : > { %p7154_p2 = pneg %p7153_p1 }
  0x1f   : > { %p7159_p4 = pnand %p7157_p3, %p7154_p2 }
  0x21   : > { %7162 = shalt.err (!%p7159_p4)
}
  0x22   : > { %s7163_s29 = scalar_lea.vmem %s296_s27, 16384  ;;  %p7171_p9 = scmp.lt.s32.totalorder %s296_s27, %s296_s27 }
  0x23   : > { %p7164_p7 = scmp.ne.s32.totalorder %s296_s27, %s7163_s29  ;;  %p7172_p6 = scmp.lt.s32.totalorder %s7163_s29, %s7163_s29 }
  0x25   : > { %p7166_p8 = pnand %p7164_p7, %p7152_p0  ;;  %p7173_p5 = por %p7172_p6, %p7171_p9 }
  0x27   : > { %p7167_p11 = pneg %p7166_p8 }
  0x29   : > { %p7174_p10 = pnand %p7173_p5, %p7167_p11 }
  0x2b   : > { %7177 = shalt.err (!%p7174_p10)
}
  0x2c   : > { %s7280_s11 = smov 128   ;;  %s7281_s12 = smov 8  }
  0x2d   : > { %6328 = dma.hbm_to_vmem [thread:$0]  (!%p7400_p12), %s8629_s5, 16384, %s296_s27, [#allocation7], %s7280_s11, %s7280_s11, %s7281_s12  }
  0x2e   : > { %s7178_s26 = scalar_lea.hbm %s8631_s7, 16384 }
  0x2f   : > { %p7179_p13 = scmp.ne.s32.totalorder %s8631_s7, %s7178_s26  ;;  %p7185_p9 = scmp.lt.u32.totalorder %s7178_s26, %s8631_s7 }
  0x31   : > { %p7181_p5 = pnand %p7179_p13, %p7152_p0 }
  0x33   : > { %p7182_p6 = pneg %p7181_p5 }
  0x35   : > { %p7187_p10 = pnand %p7185_p9, %p7182_p6 }
  0x37   : > { %7190 = shalt.err (!%p7187_p10)
}
  0x38   : > { %s7191_s27 = scalar_lea.vmem %s7404_s30, 16384  ;;  %p7199_p4 = scmp.lt.s32.totalorder %s7404_s30, %s7404_s30 }
  0x39   : > { %p7192_p1 = scmp.ne.s32.totalorder %s7404_s30, %s7191_s27  ;;  %p7200_p7 = scmp.lt.s32.totalorder %s7191_s27, %s7191_s27 }
  0x3b   : > { %p7194_p2 = pnand %p7192_p1, %p7152_p0  ;;  %p7201_p8 = por %p7200_p7, %p7199_p4 }
  0x3d   : > { %p7195_p3 = pneg %p7194_p2 }
  0x3f   : > { %p7202_p11 = pnand %p7201_p8, %p7195_p3 }
  0x41   : > { %7205 = shalt.err (!%p7202_p11)
}
  0x42   : > { %6331 = dma.hbm_to_vmem [thread:$0]  (!%p7400_p12), %s8631_s7, 16384, %s7404_s30, [#allocation10], %s7280_s11, %s7280_s11, %s7281_s12  }
  0x43   : > { %p8650_p13 = scmp.ne.s32.totalorder %s8648_s25, 0 }
  0x44   : > { %p8651_p5 = scmp.eq.s32.totalorder (!%p8650_p13), %s7364_s17, 0 }
  0x45   : > { %339 = sbr.rel (%p8650_p13) target bundleno = 1580 (0x62c), region = 60 }
  0x4c   : > { %7251 = dma.done.wait (%p8651_p5), [#allocation7], 16384   ;;  %p8652_p0 = pmov %p8651_p5 }
  0x4e   : > { %7253 = vsyncadd (%p8652_p0), [#allocation7], 4294950912  ;;  %p8653_p6 = pmov %p8652_p0 }
  0x4f   : > { %p8654_p9 = pmov %p8652_p0 }
  0x50   : > { %7255 = dma.done.wait (%p8653_p6), [#allocation10], 16384  }
  0x51   : > { %7257 = vsyncadd (%p8654_p9), [#allocation10], 4294950912  ;;  %p379_p10 = scmp.lt.s32.totalorder %s7364_s17, 1  ;;  %v7282_v0 = vmov 0   ;;  %v385_v1 = vld [vmem:[%s8625_s1] sm:$0xff]  ;;  %v386_v3 = vld [vmem:[%s8625_s1 + $0x8] sm:$0xff] }
  0x52   : > { %511 = vmatprep.mubr.bf16.mxu0 %v7282_v0  ;;  %552 = vmatprep.mubr.bf16.mxu1 %v7282_v0  ;;  %v389_v2 = vld [vmem:[%s8625_s1 + $0x20] sm:$0xff]  ;;  %v390_v5 = vld [vmem:[%s8625_s1 + $0x28] sm:$0xff]  ;;  %v387_v8 = vld [vmem:[%s8625_s1 + $0x10] sm:$0xff]  ;;  %vm475_vm0 = vcmask 130048   ;;  %vm3580_vm2 = vcmask 1046528   ;;  %vm5440_vm4 = vcmask 523264  }
  0x53   : > { %s380_s24 = scalar_select %p379_p10, %s7364_s17, 1  ;;  %v5562_v4 = vcombine.high %v385_v1, %v389_v2  ;;  %v5561_v6 = vcombine.low %v385_v1, %v389_v2  ;;  %v5564_v9 = vcombine.high %v386_v3, %v390_v5  ;;  %v5563_v10 = vcombine.low %v386_v3, %v390_v5  ;;  %v391_v11 = vld [vmem:[%s8625_s1 + $0x30] sm:$0xff]  ;;  %v388_v12 = vld [vmem:[%s8625_s1 + $0x18] sm:$0xff]  ;;  %v6384_v19 = vld [vmem:[%s8627_s3 + $0x4] ss:$8 sps:$4 sm:$0xff]  }
  0x54   : > { %v392_v13 = vld [vmem:[%s8625_s1 + $0x38] sm:$0xff]  ;;  %v5566_v15 = vcombine.high %v387_v8, %v391_v11  ;;  %v5565_v17 = vcombine.low %v387_v8, %v391_v11  ;;  %v6390_v20 = vld [vmem:[%s8627_s3 + $0x104] ss:$8 sps:$4 sm:$0xff]   ;;  %v6388_v21 = vld [vmem:[%s8627_s3 + $0x100] ss:$8 sps:$4 sm:$0xff]   ;;  %s6290_s11 = sshll.u32 %s7364_s17, 11 }
  0x55   : > { %s381_s30 = scalar_lea.vmem %s8624_s0, %s380_s24  ;;  %479 = vmatprep.subr.bf16.mxu0 %v5562_v4  ;;  %v5568_v16 = vcombine.high %v388_v12, %v392_v13  ;;  %520 = vmatprep.subr.bf16.mxu1 %v5564_v9  ;;  %v5567_v18 = vcombine.low %v388_v12, %v392_v13  ;;  %v6382_v22 = vld [vmem:[%s8627_s3] ss:$8 sps:$4 sm:$0xff]   ;;  %v6396_v23 = vld [vmem:[%s8627_s3 + $0x114] ss:$8 sps:$4 sm:$0xff]   ;;  %v6394_v25 = vld [vmem:[%s8627_s3 + $0x110] ss:$8 sps:$4 sm:$0xff]   ;;  %s8570_s18 = scalar_lea.hbm %s8634_s10, %s6290_s11 }
  0x56   : > { %v383_v7 = vld [vmem:[%s381_s30] sm:$0x1]  ;;  %480 = vmatpush1.bf16.msra.mxu0 %v5561_v6  ;;  %521 = vmatpush1.bf16.msra.mxu1 %v5563_v10  ;;  %v6387_v24 = vld [vmem:[%s8627_s3 + $0x14] ss:$8 sps:$4 sm:$0xff]   ;;  %v6385_v26 = vld [vmem:[%s8627_s3 + $0x10] ss:$8 sps:$4 sm:$0xff]   ;;  %v435_v6 = vlaneseq }
  0x57   : > { %v384_v14 = vpack.c.bf16 %v383_v7, %v383_v7  ;;  %561 = vmatprep.subr.bf16.mxu0 %v5566_v15  ;;  %602 = vmatprep.subr.bf16.mxu1 %v5568_v16  ;;  %v6402_v27 = vld [vmem:[%s8627_s3 + $0x124] ss:$8 sps:$4 sm:$0xff]   ;;  %v6400_v29 = vld [vmem:[%s8627_s3 + $0x120] ss:$8 sps:$4 sm:$0xff]   ;;  %v6408_v31 = vld [vmem:[%s8627_s3 + $0x134] ss:$8 sps:$4 sm:$0xff]  }
  0x58   : > { %v6393_v28 = vld [vmem:[%s8627_s3 + $0x24] ss:$8 sps:$4 sm:$0xff]   ;;  %v6391_v30 = vld [vmem:[%s8627_s3 + $0x20] ss:$8 sps:$4 sm:$0xff]   ;;  %v6399_v32 = vld [vmem:[%s8627_s3 + $0x34] ss:$8 sps:$4 sm:$0xff]  }
  0x59   : > { %5569 = vmatmul.mubr.msk.bf16.vlgmr.msra.gmra.mrb[0].mxu0 %vm475_vm0, %v384_v14  ;;  %5570 = vmatmul.mubr.msk.bf16.vlgmr.msra.gmra.mrb[0].mxu1 %vm475_vm0, %v384_v14  ;;  %v6397_v33 = vld [vmem:[%s8627_s3 + $0x30] ss:$8 sps:$4 sm:$0xff]   ;;  %v6405_v34 = vld [vmem:[%s8627_s3 + $0x44] ss:$8 sps:$4 sm:$0xff]   ;;  %v6412_v37 = vld [vmem:[%s8627_s3 + $0x140] ss:$8 sps:$4 sm:$0xff]  }
  0x5a   : > { %562 = vmatpush1.bf16.msra.mxu0 %v5565_v17  ;;  %603 = vmatpush1.bf16.msra.mxu1 %v5567_v18  ;;  %v6406_v35 = vld [vmem:[%s8627_s3 + $0x130] ss:$8 sps:$4 sm:$0xff]   ;;  %v6414_v36 = vld [vmem:[%s8627_s3 + $0x144] ss:$8 sps:$4 sm:$0xff]   ;;  %v6403_v38 = vld [vmem:[%s8627_s3 + $0x40] ss:$8 sps:$4 sm:$0xff]  }
  0x5b   : > { %593 = vmatprep.mubr.bf16.mxu0 %v7282_v0  ;;  %634 = vmatprep.mubr.bf16.mxu1 %v7282_v0  ;;  %v6420_v39 = vld [vmem:[%s8627_s3 + $0x154] ss:$8 sps:$4 sm:$0xff]   ;;  %v6418_v41 = vld [vmem:[%s8627_s3 + $0x150] ss:$8 sps:$4 sm:$0xff]   ;;  %v6426_v43 = vld [vmem:[%s8627_s3 + $0x164] ss:$8 sps:$4 sm:$0xff]  }
  0x5c   : > { %1198 = vmatprep.subr.bf16.mxu1 %v6384_v19  ;;  %997 = vmatprep.subr.bf16.mxu0 %v6390_v20  ;;  %v6411_v40 = vld [vmem:[%s8627_s3 + $0x54] ss:$8 sps:$4 sm:$0xff]   ;;  %v6409_v42 = vld [vmem:[%s8627_s3 + $0x50] ss:$8 sps:$4 sm:$0xff]   ;;  %v6417_v44 = vld [vmem:[%s8627_s3 + $0x64] ss:$8 sps:$4 sm:$0xff]  }
  0x5d   : > { %v6424_v45 = vld [vmem:[%s8627_s3 + $0x160] ss:$8 sps:$4 sm:$0xff]   ;;  %v6423_v47 = vld [vmem:[%s8627_s3 + $0x74] ss:$8 sps:$4 sm:$0xff]   ;;  %v6421_v48 = vld [vmem:[%s8627_s3 + $0x70] ss:$8 sps:$4 sm:$0xff]  }
  0x5e   : > { %v6415_v46 = vld [vmem:[%s8627_s3 + $0x60] ss:$8 sps:$4 sm:$0xff]   ;;  %v6429_v49 = vld [vmem:[%s8627_s3 + $0x84] ss:$8 sps:$4 sm:$0xff]   ;;  %v6432_v51 = vld [vmem:[%s8627_s3 + $0x174] ss:$8 sps:$4 sm:$0xff]  }
  0x5f   : > { %v6427_v50 = vld [vmem:[%s8627_s3 + $0x80] ss:$8 sps:$4 sm:$0xff]   ;;  %v6430_v52 = vld [vmem:[%s8627_s3 + $0x170] ss:$8 sps:$4 sm:$0xff]   ;;  %v6435_v53 = vld [vmem:[%s8627_s3 + $0x94] ss:$8 sps:$4 sm:$0xff]  }
  0x60   : > { %v6433_v54 = vld [vmem:[%s8627_s3 + $0x90] ss:$8 sps:$4 sm:$0xff]   ;;  %v6438_v55 = vld [vmem:[%s8627_s3 + $0x184] ss:$8 sps:$4 sm:$0xff]   ;;  %v6436_v56 = vld [vmem:[%s8627_s3 + $0x180] ss:$8 sps:$4 sm:$0xff]  }
  0x61   : > { %5571 = vmatmul.mubr.msk.bf16.vlgmr.msra.gmra.mrb[4].mxu0 %vm475_vm0, %v384_v14  ;;  %5572 = vmatmul.mubr.msk.bf16.vlgmr.msra.gmra.mrb[4].mxu1 %vm475_vm0, %v384_v14  ;;  %v6441_v57 = vld [vmem:[%s8627_s3 + $0xa4] ss:$8 sps:$4 sm:$0xff]   ;;  %v6439_v58 = vld [vmem:[%s8627_s3 + $0xa0] ss:$8 sps:$4 sm:$0xff]   ;;  %v6444_v59 = vld [vmem:[%s8627_s3 + $0x194] ss:$8 sps:$4 sm:$0xff]  }
  0x62   : > { %998 = vmatpush1.bf16.msra.mxu0 %v6388_v21  ;;  %1199 = vmatpush1.bf16.msra.mxu1 %v6382_v22  ;;  %v6442_v60 = vld [vmem:[%s8627_s3 + $0x190] ss:$8 sps:$4 sm:$0xff]   ;;  %v6447_v61 = vld [vmem:[%s8627_s3 + $0xb4] ss:$8 sps:$4 sm:$0xff]   ;;  %v6450_v63 = vld [vmem:[%s8627_s3 + $0x1a4] ss:$8 sps:$4 sm:$0xff]  }
  0x63   : > { %999 = vmatprep.subr.bf16.mxu0 %v6396_v23  ;;  %1200 = vmatprep.subr.bf16.mxu1 %v6387_v24  ;;  %v6445_v62 = vld [vmem:[%s8627_s3 + $0xb0] ss:$8 sps:$4 sm:$0xff]   ;;  %v6448_v0 = vld [vmem:[%s8627_s3 + $0x1a0] ss:$8 sps:$4 sm:$0xff]   ;;  %v6453_v1 = vld [vmem:[%s8627_s3 + $0xc4] ss:$8 sps:$4 sm:$0xff]  }
  0x64   : > { %v6451_v2 = vld [vmem:[%s8627_s3 + $0xc0] ss:$8 sps:$4 sm:$0xff]   ;;  %v6456_v3 = vld [vmem:[%s8627_s3 + $0x1b4] ss:$8 sps:$4 sm:$0xff]   ;;  %v6454_v4 = vld [vmem:[%s8627_s3 + $0x1b0] ss:$8 sps:$4 sm:$0xff]  }
  0x65   : > { %v6459_v5 = vld [vmem:[%s8627_s3 + $0xd4] ss:$8 sps:$4 sm:$0xff]   ;;  %v6457_v7 = vld [vmem:[%s8627_s3 + $0xd0] ss:$8 sps:$4 sm:$0xff]   ;;  %v6462_v8 = vld [vmem:[%s8627_s3 + $0x1c4] ss:$8 sps:$4 sm:$0xff]  }
  0x66   : > { %1000 = vmatpush1.bf16.msra.mxu0 %v6394_v25  ;;  %1201 = vmatpush1.bf16.msra.mxu1 %v6385_v26  ;;  %vm7655_vm1 = vcmp.lt.s32.totalorder %v435_v6, 256  ;;  %v6460_v10 = vld [vmem:[%s8627_s3 + $0x1c0] ss:$8 sps:$4 sm:$0xff]   ;;  %v6465_v12 = vld [vmem:[%s8627_s3 + $0xe4] ss:$8 sps:$4 sm:$0xff]   ;;  %v7283_v13 = vmov 0.0  }
  0x67   : > { %1001 = vmatprep.subr.bf16.mxu0 %v6402_v27  ;;  %1202 = vmatprep.subr.bf16.mxu1 %v6393_v28  ;;  %v6463_v11 = vld [vmem:[%s8627_s3 + $0xe0] ss:$8 sps:$4 sm:$0xff]   ;;  %655 = vst.msk [vmem:[#allocation2] ss:$8 sm:$0x3] %vm7655_vm1, %v7283_v13  ;;  %v436_v24 = vshrl.u32 %v435_v6, 7 }
  0x68   : > { %658 = vst.msk [vmem:[#allocation2 + $0x5] ss:$8 sm:$0x3] %vm7655_vm1, %v7283_v13  ;;  %1733 = vst.msk [vmem:[#allocation3] ss:$8 sm:$0x3] %vm7655_vm1, %v7283_v13 }
  0x69   : > { %1736 = vst.msk [vmem:[#allocation3 + $0x11] ss:$8 sm:$0x3] %vm7655_vm1, %v7283_v13  ;;  %2817 = vst.msk [vmem:[#allocation4] ss:$8 sm:$0x3] %vm7655_vm1, %v7283_v13 }
  0x6a   : > { %1002 = vmatpush1.bf16.msra.mxu0 %v6400_v29  ;;  %1203 = vmatpush1.bf16.msra.mxu1 %v6391_v30  ;;  %2820 = vst.msk [vmem:[#allocation4 + $0x21] ss:$8 sm:$0x3] %vm7655_vm1, %v7283_v13  ;;  %4023 = vst.msk [vmem:[#allocation5] ss:$8 sm:$0x3] %vm7655_vm1, %v7283_v13 }
  0x6b   : > { %1003 = vmatprep.subr.bf16.mxu0 %v6408_v31  ;;  %1204 = vmatprep.subr.bf16.mxu1 %v6399_v32  ;;  %4026 = vst.msk [vmem:[#allocation5 + $0x41] ss:$8 sm:$0x3] %vm7655_vm1, %v7283_v13  ;;  %v6466_v14 = vld [vmem:[%s8627_s3 + $0x1d0] ss:$8 sps:$4 sm:$0xff]   ;;  %v393_v25 = vld [vmem:[%s8626_s2] sm:$0xff] }
  0x6c   : > { %v6468_v15 = vld [vmem:[%s8627_s3 + $0x1d4] ss:$8 sps:$4 sm:$0xff]   ;;  %v6469_v17 = vld [vmem:[%s8627_s3 + $0xf0] ss:$8 sps:$4 sm:$0xff]   ;;  %v6474_v18 = vld [vmem:[%s8627_s3 + $0x1e4] ss:$8 sps:$4 sm:$0xff]  }
  0x6d   : > { %v6471_v16 = vld [vmem:[%s8627_s3 + $0xf4] ss:$8 sps:$4 sm:$0xff]   ;;  %v6472_v19 = vld [vmem:[%s8627_s3 + $0x1e0] ss:$8 sps:$4 sm:$0xff]   ;;  %v6477_v20 = vld [vmem:[%s8627_s3 + $0x204] ss:$8 sps:$4 sm:$0xff]  }
  0x6e   : > { %1004 = vmatpush1.bf16.msra.mxu0 %v6406_v35  ;;  %1205 = vmatpush1.bf16.msra.mxu1 %v6397_v33  ;;  %v6480_v21 = vld [vmem:[%s8627_s3 + $0x1f4] ss:$8 sps:$4 sm:$0xff]   ;;  %v6478_v22 = vld [vmem:[%s8627_s3 + $0x1f0] ss:$8 sps:$4 sm:$0xff]   ;;  %v6486_v23 = vld [vmem:[%s8627_s3 + $0x304] ss:$8 sps:$4 sm:$0xff]  }
  0x6f   : > { %1005 = vmatprep.subr.bf16.mxu0 %v6414_v36  ;;  %1206 = vmatprep.subr.bf16.mxu1 %v6405_v34  ;;  %v7717_v26 = vsub.s32 0, %v436_v24  ;;  %v445_v27 = vsub.s32 2, %v436_v24  ;;  %v7719_v28 = vsub.s32 1, %v436_v24  ;;  %v449_v29 = vsub.s32 3, %v436_v24  ;;  %s376_s24 = sand.u32 1, %s7268_s14   ;;  %p8657_p1 = scmp.ne.s32.totalorder %s8645_s23, 0 }
  0x70   : > { %v7284_v30 = vmov 1966171168   ;;  %vm3077_vm3 = vsmask.f32 7424  ;;  %s5560_s25 = sshll.u32 %s376_s24, 7  ;;  %s8583_s17 = scalar_lea.sflag [#allocation8], %s376_s24 }
  0x71   : > { %v664_v31 = vunpack.c.l.s4 %v7284_v30  ;;  %v438_v32 = vrot.slane %v393_v25, %v7717_v26  ;;  %v446_v33 = vrot.slane %v393_v25, %v445_v27  ;;  %v442_v34 = vrot.slane %v393_v25, %v7719_v28  ;;  %s8546_s28 = scalar_lea.vmem [#allocation11], %s5560_s25  ;;  %s7285_s21 = smov [#allocation11]  }
  0x72   : > { %1006 = vmatpush1.bf16.msra.mxu0 %v6412_v37  ;;  %1207 = vmatpush1.bf16.msra.mxu1 %v6403_v38  ;;  %v450_v35 = vrot.slane %v393_v25, %v449_v29  ;;  %s5471_s12 = sshll.u32 %s8546_s28, 4  ;;  %s7210_s26 = sshll.u32 %s7285_s21, 4  ;;  %s8572_s12 = int_to_ptr.vmem [resolvable:$true] %s5471_s12  ;;  %s7211_s26 = int_to_ptr.vmem [resolvable:$false] %s7210_s26 }
  0x73   : > { %1007 = vmatprep.subr.bf16.mxu0 %v6420_v39  ;;  %1208 = vmatprep.subr.bf16.mxu1 %v6411_v40  ;;  %v665_v37 = vunpack.c.0.s8 %v664_v31  ;;  %s7206_s20 = scalar_lea.vmem %s8572_s12, 2048  ;;  %s7212_s29 = scalar_lea.vmem %s7211_s26, 4096 }
  0x74   : > { %p7207_p12 = scmp.ne.s32.totalorder %s8572_s12, %s7206_s20  ;;  %p7213_p4 = scmp.lt.s32.totalorder %s8572_s12, %s7211_s26 }
  0x75   : > { %p7214_p7 = scmp.lt.s32.totalorder %s7212_s29, %s7206_s20 }
  0x76   : > { %1008 = vmatpush1.bf16.msra.mxu0 %v6418_v41  ;;  %1209 = vmatpush1.bf16.msra.mxu1 %v6409_v42  ;;  %v453_v41 = vsub.s32 4, %v436_v24  ;;  %p7208_p2 = pnand %p7207_p12, %p8657_p1 }
  0x77   : > { %1009 = vmatprep.subr.bf16.mxu0 %v6426_v43  ;;  %1210 = vmatprep.subr.bf16.mxu1 %v6417_v44  ;;  %p7215_p8 = por %p7214_p7, %p7213_p4 }
  0x78   : > { %p7209_p3 = pneg %p7208_p2 }
  0x7a   : > { %1010 = vmatpush1.bf16.msra.mxu0 %v6424_v45  ;;  %1211 = vmatpush1.bf16.msra.mxu1 %v6415_v46  ;;  %v461_v46 = vsub.s32 6, %v436_v24  ;;  %p7216_p11 = pnand %p7215_p8, %p7209_p3 }
  0x7b   : > { %1212 = vmatprep.subr.bf16.mxu1 %v6423_v47  ;;  %1011 = vmatprep.subr.bf16.mxu0 %v6432_v51  ;;  %v457_v47 = vsub.s32 5, %v436_v24 }
  0x7e   : > { %1213 = vmatpush1.bf16.msra.mxu1 %v6421_v48  ;;  %1012 = vmatpush1.bf16.msra.mxu0 %v6430_v52  ;;  %v465_v52 = vsub.s32 7, %v436_v24 }
  0x7f   : > { %1214 = vmatprep.subr.bf16.mxu1 %v6429_v49  ;;  %1013 = vmatprep.subr.bf16.mxu0 %v6438_v55 }
  0x82   : > { %1215 = vmatpush1.bf16.msra.mxu1 %v6427_v50  ;;  %1014 = vmatpush1.bf16.msra.mxu0 %v6436_v56 }
  0x83   : > { %1216 = vmatprep.subr.bf16.mxu1 %v6435_v53  ;;  %1015 = vmatprep.subr.bf16.mxu0 %v6444_v59  ;;  %v7723_v53 = vsub.s32 %v665_v37, %v436_v24 }
  0x86   : > { %1217 = vmatpush1.bf16.msra.mxu1 %v6433_v54  ;;  %1016 = vmatpush1.bf16.msra.mxu0 %v6442_v60  ;;  %v462_v60 = vrot.slane %v393_v25, %v461_v46 }
  0x87   : > { %1218 = vmatprep.subr.bf16.mxu1 %v6441_v57  ;;  %1017 = vmatprep.subr.bf16.mxu0 %v6450_v63  ;;  %v466_v63 = vrot.slane %v393_v25, %v465_v52  ;;  %v6487_v52 = vld [vmem:[%s8627_s3 + $0x220] ss:$8 sps:$4 sm:$0xff]  }
  0x8a   : > { %1219 = vmatpush1.bf16.msra.mxu1 %v6439_v58  ;;  %1018 = vmatpush1.bf16.msra.mxu0 %v6448_v0  ;;  %v454_v58 = vrot.slane %v393_v25, %v453_v41 }
  0x8b   : > { %1220 = vmatprep.subr.bf16.mxu1 %v6447_v61  ;;  %1019 = vmatprep.subr.bf16.mxu0 %v6456_v3  ;;  %v458_v61 = vrot.slane %v393_v25, %v457_v47 }
  0x8e   : > { %1221 = vmatpush1.bf16.msra.mxu1 %v6445_v62  ;;  %1020 = vmatpush1.bf16.msra.mxu0 %v6454_v4 }
  0x8f   : > { %1222 = vmatprep.subr.bf16.mxu1 %v6453_v1  ;;  %1021 = vmatprep.subr.bf16.mxu0 %v6462_v8 }
  0x92   : > { %1223 = vmatpush1.bf16.msra.mxu1 %v6451_v2  ;;  %1022 = vmatpush1.bf16.msra.mxu0 %v6460_v10 }
  0x93   : > { %1224 = vmatprep.subr.bf16.mxu1 %v6459_v5  ;;  %1023 = vmatprep.subr.bf16.mxu0 %v6468_v15 }
  0x96   : > { %1225 = vmatpush1.bf16.msra.mxu1 %v6457_v7  ;;  %1024 = vmatpush1.bf16.msra.mxu0 %v6466_v14 }
  0x97   : > { %1226 = vmatprep.subr.bf16.mxu1 %v6465_v12  ;;  %1025 = vmatprep.subr.bf16.mxu0 %v6474_v18 }
  0x9a   : > { %1227 = vmatpush1.bf16.msra.mxu1 %v6463_v11  ;;  %1026 = vmatpush1.bf16.msra.mxu0 %v6472_v19 }
  0x9b   : > { %1228 = vmatprep.subr.bf16.mxu1 %v6471_v16  ;;  %1027 = vmatprep.subr.bf16.mxu0 %v6480_v21 }
  0x9e   : > { %1229 = vmatpush1.bf16.msra.mxu1 %v6469_v17  ;;  %1028 = vmatpush1.bf16.msra.mxu0 %v6478_v22 }
  0x9f   : > { %1672 = vmatprep.subr.bf16.mxu1 %v6477_v20  ;;  %1471 = vmatprep.subr.bf16.mxu0 %v6486_v23 }
 0x12c   : > { %v513_v36 = vpop.f32.mrb[0].mxu0  ;;  %v554_v39 = vpop.f32.mrb[0].mxu1 }
 0x12d   : > { %v514_v38 = vadd.f32 %v513_v36, %v438_v32  ;;  %v515_v40 = vpop.f32.mrb[1].mxu0  ;;  %v555_v42 = vadd.f32 %v554_v39, %v446_v33  ;;  %v556_v44 = vpop.f32.mrb[1].mxu1  ;;  %v6475_v32 = vld [vmem:[%s8627_s3 + $0x200] ss:$8 sps:$4 sm:$0xff]   ;;  %v6483_v36 = vld [vmem:[%s8627_s3 + $0x214] ss:$8 sps:$4 sm:$0xff]  }
 0x12e   : > { %v516_v43 = vadd.f32 %v515_v40, %v442_v34  ;;  %v517_v45 = vpop.f32.mrb[2].mxu0  ;;  %v557_v49 = vadd.f32 %v556_v44, %v450_v35  ;;  %v558_v50 = vpop.f32.mrb[2].mxu1 }
 0x12f   : > { %v643_v48 = vmax.f32 %v514_v38, 0.0  ;;  %v518_v51 = vpop.f32.mrb[3].mxu0  ;;  %v645_v54 = vmax.f32 %v555_v42, 0.0  ;;  %v559_v56 = vpop.f32.mrb[3].mxu1  ;;  %v6481_v42 = vld [vmem:[%s8627_s3 + $0x210] ss:$8 sps:$4 sm:$0xff]  }
 0x130   : > { %v644_v55 = vmax.f32 %v516_v43, 0.0  ;;  %v646_v57 = vmax.f32 %v557_v49, 0.0  ;;  %v6484_v50 = vld [vmem:[%s8627_s3 + $0x300] ss:$8 sps:$4 sm:$0xff]   ;;  %v6495_v56 = vld [vmem:[%s8627_s3 + $0x234] ss:$8 sps:$4 sm:$0xff]  }
 0x132   : > { %v662_v59 = vcombine.low %v643_v48, %v644_v55  ;;  %v683_v62 = vcombine.low %v645_v54, %v646_v57  ;;  %v6489_v48 = vld [vmem:[%s8627_s3 + $0x224] ss:$8 sps:$4 sm:$0xff]   ;;  %v6492_v54 = vld [vmem:[%s8627_s3 + $0x314] ss:$8 sps:$4 sm:$0xff]   ;;  %v6490_v57 = vld [vmem:[%s8627_s3 + $0x310] ss:$8 sps:$4 sm:$0xff]  }
 0x134   : > { %v669_v0 = vrot.slane %v662_v59, %v7723_v53  ;;  %v595_v1 = vpop.f32.mrb[4].mxu0  ;;  %v690_v2 = vrot.slane %v683_v62, %v7723_v53  ;;  %v636_v4 = vpop.f32.mrb[4].mxu1  ;;  %v6498_v59 = vld [vmem:[%s8627_s3 + $0x324] ss:$8 sps:$4 sm:$0xff]   ;;  %v6499_v62 = vld [vmem:[%s8627_s3 + $0x240] ss:$8 sps:$4 sm:$0xff]  }
 0x135   : > { %v596_v3 = vadd.f32 %v595_v1, %v454_v58  ;;  %v597_v5 = vpop.f32.mrb[5].mxu0  ;;  %v637_v7 = vadd.f32 %v636_v4, %v462_v60  ;;  %v638_v10 = vpop.f32.mrb[5].mxu1  ;;  %v6493_v58 = vld [vmem:[%s8627_s3 + $0x230] ss:$8 sps:$4 sm:$0xff]   ;;  %v6501_v60 = vld [vmem:[%s8627_s3 + $0x244] ss:$8 sps:$4 sm:$0xff]  }
 0x136   : > { %v676_v6 = vrot.slane %v669_v0, %v7723_v53  ;;  %v598_v8 = vadd.f32 %v597_v5, %v458_v61  ;;  %v599_v11 = vpop.f32.mrb[6].mxu0  ;;  %v697_v12 = vrot.slane %v690_v2, %v7723_v53  ;;  %v639_v14 = vadd.f32 %v638_v10, %v466_v63  ;;  %v640_v15 = vpop.f32.mrb[6].mxu1  ;;  %v6496_v61 = vld [vmem:[%s8627_s3 + $0x320] ss:$8 sps:$4 sm:$0xff]   ;;  %v6504_v63 = vld [vmem:[%s8627_s3 + $0x334] ss:$8 sps:$4 sm:$0xff]  }
 0x137   : > { %v647_v13 = vmax.f32 %v596_v3, 0.0  ;;  %v600_v16 = vpop.f32.mrb[7].mxu0  ;;  %v649_v17 = vmax.f32 %v637_v7, 0.0  ;;  %v641_v19 = vpop.f32.mrb[7].mxu1  ;;  %v6507_v0 = vld [vmem:[%s8627_s3 + $0x254] ss:$8 sps:$4 sm:$0xff]  }
 0x138   : > { %679 = vst.msk [vmem:[#allocation2 + $0x1] ss:$8 sm:$0x3] %vm7655_vm1, %v676_v6  ;;  %v648_v18 = vmax.f32 %v598_v8, 0.0  ;;  %v650_v20 = vmax.f32 %v639_v14, 0.0 }
 0x139   : > { %700 = vst.msk [vmem:[#allocation2 + $0x2] ss:$8 sm:$0x3] %vm7655_vm1, %v697_v12  ;;  %v6502_v1 = vld [vmem:[%s8627_s3 + $0x330] ss:$8 sps:$4 sm:$0xff]  }
 0x13a   : > { %v704_v21 = vcombine.low %v647_v13, %v648_v18  ;;  %v725_v22 = vcombine.low %v649_v17, %v650_v20  ;;  %v6505_v2 = vld [vmem:[%s8627_s3 + $0x250] ss:$8 sps:$4 sm:$0xff]   ;;  %v6510_v3 = vld [vmem:[%s8627_s3 + $0x344] ss:$8 sps:$4 sm:$0xff]   ;;  %v6508_v5 = vld [vmem:[%s8627_s3 + $0x340] ss:$8 sps:$4 sm:$0xff]  }
 0x13b   : > { %v6513_v4 = vld [vmem:[%s8627_s3 + $0x264] ss:$8 sps:$4 sm:$0xff]   ;;  %v6511_v6 = vld [vmem:[%s8627_s3 + $0x260] ss:$8 sps:$4 sm:$0xff]   ;;  %v6516_v7 = vld [vmem:[%s8627_s3 + $0x354] ss:$8 sps:$4 sm:$0xff]  }
 0x13c   : > { %v711_v23 = vrot.slane %v704_v21, %v7723_v53  ;;  %v732_v24 = vrot.slane %v725_v22, %v7723_v53  ;;  %v6519_v8 = vld [vmem:[%s8627_s3 + $0x274] ss:$8 sps:$4 sm:$0xff]   ;;  %v6514_v10 = vld [vmem:[%s8627_s3 + $0x350] ss:$8 sps:$4 sm:$0xff]   ;;  %v6522_v12 = vld [vmem:[%s8627_s3 + $0x364] ss:$8 sps:$4 sm:$0xff]  }
 0x13d   : > { %v6517_v11 = vld [vmem:[%s8627_s3 + $0x270] ss:$8 sps:$4 sm:$0xff]   ;;  %v6525_v13 = vld [vmem:[%s8627_s3 + $0x284] ss:$8 sps:$4 sm:$0xff]   ;;  %v6520_v14 = vld [vmem:[%s8627_s3 + $0x360] ss:$8 sps:$4 sm:$0xff]  }
 0x13e   : > { %v718_v25 = vrot.slane %v711_v23, %v7723_v53  ;;  %v739_v27 = vrot.slane %v732_v24, %v7723_v53  ;;  %v6523_v15 = vld [vmem:[%s8627_s3 + $0x280] ss:$8 sps:$4 sm:$0xff]   ;;  %v6528_v16 = vld [vmem:[%s8627_s3 + $0x374] ss:$8 sps:$4 sm:$0xff]   ;;  %v6526_v18 = vld [vmem:[%s8627_s3 + $0x370] ss:$8 sps:$4 sm:$0xff]  }
 0x13f   : > { %v6531_v17 = vld [vmem:[%s8627_s3 + $0x294] ss:$8 sps:$4 sm:$0xff]   ;;  %v6529_v19 = vld [vmem:[%s8627_s3 + $0x290] ss:$8 sps:$4 sm:$0xff]   ;;  %v6534_v20 = vld [vmem:[%s8627_s3 + $0x384] ss:$8 sps:$4 sm:$0xff]  }
 0x140   : > { %721 = vst.msk [vmem:[#allocation2 + $0x3] ss:$8 sm:$0x3] %vm7655_vm1, %v718_v25  ;;  %742 = vst.msk [vmem:[#allocation2 + $0x4] ss:$8 sm:$0x3] %vm7655_vm1, %v739_v27 }
 0x141   : > { %v6537_v21 = vld [vmem:[%s8627_s3 + $0x2a4] ss:$8 sps:$4 sm:$0xff]   ;;  %v6532_v22 = vld [vmem:[%s8627_s3 + $0x380] ss:$8 sps:$4 sm:$0xff]   ;;  %v6540_v24 = vld [vmem:[%s8627_s3 + $0x394] ss:$8 sps:$4 sm:$0xff]  }
 0x142   : > { %v6535_v23 = vld [vmem:[%s8627_s3 + $0x2a0] ss:$8 sps:$4 sm:$0xff]   ;;  %v6543_v25 = vld [vmem:[%s8627_s3 + $0x2b4] ss:$8 sps:$4 sm:$0xff]   ;;  %v6538_v27 = vld [vmem:[%s8627_s3 + $0x390] ss:$8 sps:$4 sm:$0xff]  }
 0x147   : > { %v745_v29 = vld [vmem:[#allocation2 + $0x8] sm:$0xf]  ;;  %v744_v30 = vld [vmem:[#allocation2] sm:$0xf] }
 0x148   : > { %v747_v31 = vpack.c.bf16 %v745_v29, %v745_v29  ;;  %v746_v33 = vpack.c.bf16 %v744_v30, %v744_v30  ;;  %v749_v34 = vld [vmem:[#allocation2 + $0x8] sm:$0x1e]  ;;  %v748_v35 = vld [vmem:[#allocation2] sm:$0x1e]  ;;  %v6541_v29 = vld [vmem:[%s8627_s3 + $0x2b0] ss:$8 sps:$4 sm:$0xff]  }
 0x149   : > { %v751_v37 = vpack.c.bf16 %v749_v34, %v749_v34  ;;  %v750_v38 = vpack.c.bf16 %v748_v35, %v748_v35  ;;  %v753_v39 = vld [vmem:[#allocation2 + $0x8] sm:$0x3c]  ;;  %v6552_v34 = vld [vmem:[%s8627_s3 + $0x3b4] ss:$8 sps:$4 sm:$0xff]  }
 0x14a   : > { %1230 = vmatprep.mubr.bf16.mxu1 %v747_v31  ;;  %v755_v43 = vpack.c.bf16 %v753_v39, %v753_v39  ;;  %v6546_v30 = vld [vmem:[%s8627_s3 + $0x3a4] ss:$8 sps:$4 sm:$0xff]   ;;  %v6555_v35 = vld [vmem:[%s8627_s3 + $0x2d4] ss:$8 sps:$4 sm:$0xff]  }
 0x14b   : > { %1231 = vmatmul.mubr.bf16.vlgmr.msra.gmra.mrb[8].mxu1 %v746_v33  ;;  %v831_v40 = vshll.u32 %v751_v37, 16  ;;  %v824_v41 = vshll.u32 %v750_v38, 16  ;;  %v829_v44 = vshrl.u32 %v751_v37, 16  ;;  %v822_v46 = vshrl.u32 %v750_v38, 16  ;;  %v6549_v31 = vld [vmem:[%s8627_s3 + $0x2c4] ss:$8 sps:$4 sm:$0xff]  }
 0x14c   : > { %1673 = vmatpush1.bf16.msra.mxu1 %v6475_v32  ;;  %v1308_v55 = vrot.slane %v755_v43, 1  ;;  %v6544_v32 = vld [vmem:[%s8627_s3 + $0x3a0] ss:$8 sps:$4 sm:$0xff]   ;;  %v6553_v37 = vld [vmem:[%s8627_s3 + $0x2d0] ss:$8 sps:$4 sm:$0xff]  }
 0x14d   : > { %1674 = vmatprep.subr.bf16.mxu1 %v6483_v36  ;;  %v833_v45 = vrot.slane %v831_v40, 1  ;;  %v826_v47 = vrot.slane %v824_v41, 1  ;;  %v6547_v33 = vld [vmem:[%s8627_s3 + $0x2c0] ss:$8 sps:$4 sm:$0xff]   ;;  %v6550_v36 = vld [vmem:[%s8627_s3 + $0x3b0] ss:$8 sps:$4 sm:$0xff]  }
 0x14e   : > { %v6558_v38 = vld [vmem:[%s8627_s3 + $0x3c4] ss:$8 sps:$4 sm:$0xff]   ;;  %v6556_v40 = vld [vmem:[%s8627_s3 + $0x3c0] ss:$8 sps:$4 sm:$0xff]   ;;  %v6567_v43 = vld [vmem:[%s8627_s3 + $0x2f4] ss:$8 sps:$4 sm:$0xff]  }
 0x14f   : > { %v834_v49 = vor.u32 %v833_v45, %v829_v44  ;;  %v7756_v51 = vor.u32 %v826_v47, %v822_v46  ;;  %v6561_v39 = vld [vmem:[%s8627_s3 + $0x2e4] ss:$8 sps:$4 sm:$0xff]   ;;  %v6559_v41 = vld [vmem:[%s8627_s3 + $0x2e0] ss:$8 sps:$4 sm:$0xff]   ;;  %v6562_v44 = vld [vmem:[%s8627_s3 + $0x3d0] ss:$8 sps:$4 sm:$0xff]  }
 0x150   : > { %1675 = vmatpush1.bf16.msra.mxu1 %v6481_v42  ;;  %v6564_v42 = vld [vmem:[%s8627_s3 + $0x3d4] ss:$8 sps:$4 sm:$0xff]   ;;  %v6565_v45 = vld [vmem:[%s8627_s3 + $0x2f0] ss:$8 sps:$4 sm:$0xff]   ;;  %v6570_v46 = vld [vmem:[%s8627_s3 + $0x3e4] ss:$8 sps:$4 sm:$0xff]  }
 0x151   : > { %1029 = vmatprep.mubr.bf16.mxu0 %v834_v49  ;;  %1704 = vmatprep.mubr.bf16.mxu1 %v834_v49  ;;  %v6568_v47 = vld [vmem:[%s8627_s3 + $0x3e0] ss:$8 sps:$4 sm:$0xff]  }
 0x152   : > { %1030 = vmatmul.mubr.bf16.vlgmr.msra.gmra.mrb[8].mxu0 %v7756_v51  ;;  %1676 = vmatprep.subr.bf16.mxu1 %v6489_v48  ;;  %v6573_v48 = vld [vmem:[%s8627_s3 + $0x3f4] ss:$8 sps:$4 sm:$0xff]   ;;  %v752_v49 = vld [vmem:[#allocation2] sm:$0x3c] }
 0x153   : > { %1472 = vmatpush1.bf16.msra.mxu0 %v6484_v50  ;;  %1503 = vmatprep.mubr.bf16.mxu0 %v1308_v55  ;;  %v6571_v50 = vld [vmem:[%s8627_s3 + $0x3f0] ss:$8 sps:$4 sm:$0xff]  }
 0x154   : > { %1677 = vmatpush1.bf16.msra.mxu1 %v6487_v52  ;;  %1473 = vmatprep.subr.bf16.mxu0 %v6492_v54  ;;  %v754_v52 = vpack.c.bf16 %v752_v49, %v752_v49  ;;  %v6574_v55 = vld [vmem:[#allocation6] ss:$8 sps:$4 sm:$0xff]   ;;  %v6660_v49 = vld [vmem:[#allocation6 + $0x1d4] ss:$8 sps:$4 sm:$0xff]  }
 0x155   : > { %1678 = vmatprep.subr.bf16.mxu1 %v6495_v56  ;;  %v6576_v56 = vld [vmem:[#allocation6 + $0x4] ss:$8 sps:$4 sm:$0xff]  }
 0x156   : > { %v1307_v54 = vrot.slane %v754_v52, 1  ;;  %v6663_v52 = vld [vmem:[#allocation6 + $0xf4] ss:$8 sps:$4 sm:$0xff]  }
 0x157   : > { %1474 = vmatpush1.bf16.msra.mxu0 %v6490_v57  ;;  %v6579_v57 = vld [vmem:[#allocation6 + $0x14] ss:$8 sps:$4 sm:$0xff]  }
 0x158   : > { %1679 = vmatpush1.bf16.msra.mxu1 %v6493_v58  ;;  %1475 = vmatprep.subr.bf16.mxu0 %v6498_v59  ;;  %v6580_v58 = vld [vmem:[#allocation6 + $0x100] ss:$8 sps:$4 sm:$0xff]   ;;  %v6582_v59 = vld [vmem:[#allocation6 + $0x104] ss:$8 sps:$4 sm:$0xff]  }
 0x159   : > { %1680 = vmatprep.subr.bf16.mxu1 %v6501_v60  ;;  %v6577_v60 = vld [vmem:[#allocation6 + $0x10] ss:$8 sps:$4 sm:$0xff]  }
 0x15b   : > { %1476 = vmatpush1.bf16.msra.mxu0 %v6496_v61  ;;  %v6588_v61 = vld [vmem:[#allocation6 + $0x114] ss:$8 sps:$4 sm:$0xff]  }
 0x15c   : > { %1681 = vmatpush1.bf16.msra.mxu1 %v6499_v62  ;;  %1477 = vmatprep.subr.bf16.mxu0 %v6504_v63  ;;  %v6586_v62 = vld [vmem:[#allocation6 + $0x110] ss:$8 sps:$4 sm:$0xff]   ;;  %v6594_v63 = vld [vmem:[#allocation6 + $0x124] ss:$8 sps:$4 sm:$0xff]  }
 0x15d   : > { %1682 = vmatprep.subr.bf16.mxu1 %v6507_v0  ;;  %v6583_v0 = vld [vmem:[#allocation6 + $0x20] ss:$8 sps:$4 sm:$0xff]  }
 0x15f   : > { %1478 = vmatpush1.bf16.msra.mxu0 %v6502_v1  ;;  %v6591_v1 = vld [vmem:[#allocation6 + $0x34] ss:$8 sps:$4 sm:$0xff]  }
 0x160   : > { %1683 = vmatpush1.bf16.msra.mxu1 %v6505_v2  ;;  %1479 = vmatprep.subr.bf16.mxu0 %v6510_v3  ;;  %v6592_v2 = vld [vmem:[#allocation6 + $0x120] ss:$8 sps:$4 sm:$0xff]   ;;  %v6600_v3 = vld [vmem:[#allocation6 + $0x134] ss:$8 sps:$4 sm:$0xff]  }
 0x161   : > { %1684 = vmatprep.subr.bf16.mxu1 %v6513_v4  ;;  %v6589_v4 = vld [vmem:[#allocation6 + $0x30] ss:$8 sps:$4 sm:$0xff]  }
 0x163   : > { %1480 = vmatpush1.bf16.msra.mxu0 %v6508_v5  ;;  %v6597_v5 = vld [vmem:[#allocation6 + $0x44] ss:$8 sps:$4 sm:$0xff]  }
 0x164   : > { %1685 = vmatpush1.bf16.msra.mxu1 %v6511_v6  ;;  %1481 = vmatprep.subr.bf16.mxu0 %v6516_v7  ;;  %v6598_v6 = vld [vmem:[#allocation6 + $0x130] ss:$8 sps:$4 sm:$0xff]   ;;  %v6606_v7 = vld [vmem:[#allocation6 + $0x144] ss:$8 sps:$4 sm:$0xff]  }
 0x165   : > { %1686 = vmatprep.subr.bf16.mxu1 %v6519_v8  ;;  %v6595_v8 = vld [vmem:[#allocation6 + $0x40] ss:$8 sps:$4 sm:$0xff]  }
 0x167   : > { %1482 = vmatpush1.bf16.msra.mxu0 %v6514_v10  ;;  %v6603_v10 = vld [vmem:[#allocation6 + $0x54] ss:$8 sps:$4 sm:$0xff]  }
 0x168   : > { %1687 = vmatpush1.bf16.msra.mxu1 %v6517_v11  ;;  %1483 = vmatprep.subr.bf16.mxu0 %v6522_v12  ;;  %v6604_v11 = vld [vmem:[#allocation6 + $0x140] ss:$8 sps:$4 sm:$0xff]   ;;  %v6612_v12 = vld [vmem:[#allocation6 + $0x154] ss:$8 sps:$4 sm:$0xff]  }
 0x169   : > { %1688 = vmatprep.subr.bf16.mxu1 %v6525_v13  ;;  %v6601_v13 = vld [vmem:[#allocation6 + $0x50] ss:$8 sps:$4 sm:$0xff]  }
 0x16b   : > { %1484 = vmatpush1.bf16.msra.mxu0 %v6520_v14  ;;  %v6609_v14 = vld [vmem:[#allocation6 + $0x64] ss:$8 sps:$4 sm:$0xff]  }
 0x16c   : > { %1689 = vmatpush1.bf16.msra.mxu1 %v6523_v15  ;;  %1485 = vmatprep.subr.bf16.mxu0 %v6528_v16  ;;  %v6610_v15 = vld [vmem:[#allocation6 + $0x150] ss:$8 sps:$4 sm:$0xff]   ;;  %v6607_v16 = vld [vmem:[#allocation6 + $0x60] ss:$8 sps:$4 sm:$0xff]  }
 0x16d   : > { %1690 = vmatprep.subr.bf16.mxu1 %v6531_v17  ;;  %v6615_v17 = vld [vmem:[#allocation6 + $0x74] ss:$8 sps:$4 sm:$0xff]  }
 0x16f   : > { %1486 = vmatpush1.bf16.msra.mxu0 %v6526_v18  ;;  %v6613_v18 = vld [vmem:[#allocation6 + $0x70] ss:$8 sps:$4 sm:$0xff]  }
 0x170   : > { %1691 = vmatpush1.bf16.msra.mxu1 %v6529_v19  ;;  %1487 = vmatprep.subr.bf16.mxu0 %v6534_v20  ;;  %v6618_v19 = vld [vmem:[#allocation6 + $0x164] ss:$8 sps:$4 sm:$0xff]  }
 0x171   : > { %1692 = vmatprep.subr.bf16.mxu1 %v6537_v21  ;;  %v6621_v20 = vld [vmem:[#allocation6 + $0x84] ss:$8 sps:$4 sm:$0xff]   ;;  %v6616_v21 = vld [vmem:[#allocation6 + $0x160] ss:$8 sps:$4 sm:$0xff]  }
 0x173   : > { %1488 = vmatpush1.bf16.msra.mxu0 %v6532_v22  ;;  %v6619_v22 = vld [vmem:[#allocation6 + $0x80] ss:$8 sps:$4 sm:$0xff]  }
 0x174   : > { %1693 = vmatpush1.bf16.msra.mxu1 %v6535_v23  ;;  %1489 = vmatprep.subr.bf16.mxu0 %v6540_v24  ;;  %v6622_v23 = vld [vmem:[#allocation6 + $0x170] ss:$8 sps:$4 sm:$0xff]   ;;  %v6624_v24 = vld [vmem:[#allocation6 + $0x174] ss:$8 sps:$4 sm:$0xff]  }
 0x175   : > { %1694 = vmatprep.subr.bf16.mxu1 %v6543_v25  ;;  %v6625_v25 = vld [vmem:[#allocation6 + $0x90] ss:$8 sps:$4 sm:$0xff]  }
 0x177   : > { %1490 = vmatpush1.bf16.msra.mxu0 %v6538_v27  ;;  %v6627_v27 = vld [vmem:[#allocation6 + $0x94] ss:$8 sps:$4 sm:$0xff]  }
 0x178   : > { %1695 = vmatpush1.bf16.msra.mxu1 %v6541_v29  ;;  %1491 = vmatprep.subr.bf16.mxu0 %v6546_v30  ;;  %v6630_v29 = vld [vmem:[#allocation6 + $0x184] ss:$8 sps:$4 sm:$0xff]  }
 0x179   : > { %1696 = vmatprep.subr.bf16.mxu1 %v6549_v31  ;;  %v6633_v30 = vld [vmem:[#allocation6 + $0xa4] ss:$8 sps:$4 sm:$0xff]   ;;  %v6628_v31 = vld [vmem:[#allocation6 + $0x180] ss:$8 sps:$4 sm:$0xff]  }
 0x17b   : > { %1492 = vmatpush1.bf16.msra.mxu0 %v6544_v32  ;;  %v6631_v32 = vld [vmem:[#allocation6 + $0xa0] ss:$8 sps:$4 sm:$0xff]  }
 0x17c   : > { %1697 = vmatpush1.bf16.msra.mxu1 %v6547_v33  ;;  %1493 = vmatprep.subr.bf16.mxu0 %v6552_v34  ;;  %v6636_v33 = vld [vmem:[#allocation6 + $0x194] ss:$8 sps:$4 sm:$0xff]  }
 0x17d   : > { %1698 = vmatprep.subr.bf16.mxu1 %v6555_v35  ;;  %v6639_v34 = vld [vmem:[#allocation6 + $0xb4] ss:$8 sps:$4 sm:$0xff]   ;;  %v6634_v35 = vld [vmem:[#allocation6 + $0x190] ss:$8 sps:$4 sm:$0xff]  }
 0x17f   : > { %1494 = vmatpush1.bf16.msra.mxu0 %v6550_v36  ;;  %v6637_v36 = vld [vmem:[#allocation6 + $0xb0] ss:$8 sps:$4 sm:$0xff]  }
 0x180   : > { %1699 = vmatpush1.bf16.msra.mxu1 %v6553_v37  ;;  %1495 = vmatprep.subr.bf16.mxu0 %v6558_v38  ;;  %v6642_v37 = vld [vmem:[#allocation6 + $0x1a4] ss:$8 sps:$4 sm:$0xff]  }
 0x181   : > { %1700 = vmatprep.subr.bf16.mxu1 %v6561_v39  ;;  %v6645_v38 = vld [vmem:[#allocation6 + $0xc4] ss:$8 sps:$4 sm:$0xff]   ;;  %v6640_v39 = vld [vmem:[#allocation6 + $0x1a0] ss:$8 sps:$4 sm:$0xff]  }
 0x183   : > { %1496 = vmatpush1.bf16.msra.mxu0 %v6556_v40  ;;  %v6643_v40 = vld [vmem:[#allocation6 + $0xc0] ss:$8 sps:$4 sm:$0xff]  }
 0x184   : > { %1701 = vmatpush1.bf16.msra.mxu1 %v6559_v41  ;;  %1497 = vmatprep.subr.bf16.mxu0 %v6564_v42  ;;  %v6648_v41 = vld [vmem:[#allocation6 + $0x1b4] ss:$8 sps:$4 sm:$0xff]  }
 0x185   : > { %1702 = vmatprep.subr.bf16.mxu1 %v6567_v43  ;;  %v6651_v42 = vld [vmem:[#allocation6 + $0xd4] ss:$8 sps:$4 sm:$0xff]   ;;  %v6646_v43 = vld [vmem:[#allocation6 + $0x1b0] ss:$8 sps:$4 sm:$0xff]  }
 0x187   : > { %1498 = vmatpush1.bf16.msra.mxu0 %v6562_v44  ;;  %v6649_v44 = vld [vmem:[#allocation6 + $0xd0] ss:$8 sps:$4 sm:$0xff]  }
 0x188   : > { %1703 = vmatpush1.bf16.msra.mxu1 %v6565_v45  ;;  %1499 = vmatprep.subr.bf16.mxu0 %v6570_v46  ;;  %v6654_v45 = vld [vmem:[#allocation6 + $0x1c4] ss:$8 sps:$4 sm:$0xff]  }
 0x189   : > { %2282 = vmatprep.subr.bf16.mxu1 %v6576_v56  ;;  %v6657_v46 = vld [vmem:[#allocation6 + $0xe4] ss:$8 sps:$4 sm:$0xff]   ;;  %v6664_v56 = vld [vmem:[#allocation6 + $0x1e0] ss:$8 sps:$4 sm:$0xff]  }
 0x18b   : > { %1500 = vmatpush1.bf16.msra.mxu0 %v6568_v47  ;;  %1705 = vmatmul.mubr.bf16.vlgmr.msra.gmra.mrb[12].mxu1 %v7756_v51  ;;  %v6585_v51 = vld [vmem:[#allocation6 + $0x24] ss:$8 sps:$4 sm:$0xff]   ;;  %v6652_v47 = vld [vmem:[#allocation6 + $0x1c0] ss:$8 sps:$4 sm:$0xff]  }
 0x18c   : > { %1501 = vmatprep.subr.bf16.mxu0 %v6573_v48  ;;  %2283 = vmatpush1.bf16.msra.mxu1 %v6574_v55  ;;  %v6655_v48 = vld [vmem:[#allocation6 + $0xe0] ss:$8 sps:$4 sm:$0xff]   ;;  %v6666_v55 = vld [vmem:[#allocation6 + $0x1e4] ss:$8 sps:$4 sm:$0xff]  }
 0x18d   : > { %2284 = vmatprep.subr.bf16.mxu1 %v6579_v57  ;;  %v6669_v57 = vld [vmem:[#allocation6 + $0x204] ss:$8 sps:$4 sm:$0xff]  }
 0x18f   : > { %1502 = vmatpush1.bf16.msra.mxu0 %v6571_v50  ;;  %v6658_v50 = vld [vmem:[#allocation6 + $0x1d0] ss:$8 sps:$4 sm:$0xff]  }
 0x190   : > { %2081 = vmatprep.subr.bf16.mxu0 %v6582_v59  ;;  %2285 = vmatpush1.bf16.msra.mxu1 %v6577_v60  ;;  %v6672_v59 = vld [vmem:[#allocation6 + $0x1f4] ss:$8 sps:$4 sm:$0xff]   ;;  %v6678_v60 = vld [vmem:[#allocation6 + $0x304] ss:$8 sps:$4 sm:$0xff]  }
 0x191   : > { %2286 = vmatprep.subr.bf16.mxu1 %v6585_v51 }
 0x192   : > { %1504 = vmatmul.mubr.bf16.vlgmr.msra.gmra.mrb[12].mxu0 %v1307_v54  ;;  %v6661_v54 = vld [vmem:[#allocation6 + $0xf0] ss:$8 sps:$4 sm:$0xff]  }
 0x193   : > { %2082 = vmatpush1.bf16.msra.mxu0 %v6580_v58  ;;  %v6670_v58 = vld [vmem:[#allocation6 + $0x1f0] ss:$8 sps:$4 sm:$0xff]  }
 0x194   : > { %2083 = vmatprep.subr.bf16.mxu0 %v6588_v61  ;;  %2287 = vmatpush1.bf16.msra.mxu1 %v6583_v0  ;;  %v1713_v0 = vld [vmem:[%s8628_s4] sm:$0x3] }
 0x195   : > { %2288 = vmatprep.subr.bf16.mxu1 %v6591_v1  ;;  %v1718_v1 = vrot.slane %v1713_v0, %v7717_v26 }
 0x197   : > { %2084 = vmatpush1.bf16.msra.mxu0 %v6586_v62 }
 0x198   : > { %2085 = vmatprep.subr.bf16.mxu0 %v6594_v63  ;;  %2289 = vmatpush1.bf16.msra.mxu1 %v6589_v4 }
 0x199   : > { %2290 = vmatprep.subr.bf16.mxu1 %v6597_v5 }
 0x19b   : > { %2086 = vmatpush1.bf16.msra.mxu0 %v6592_v2 }
 0x19c   : > { %2087 = vmatprep.subr.bf16.mxu0 %v6600_v3  ;;  %2291 = vmatpush1.bf16.msra.mxu1 %v6595_v8  ;;  %v1722_v3 = vrot.slane %v1713_v0, %v7719_v28 }
 0x19d   : > { %2292 = vmatprep.subr.bf16.mxu1 %v6603_v10 }
 0x19f   : > { %2088 = vmatpush1.bf16.msra.mxu0 %v6598_v6 }
 0x1a0   : > { %2089 = vmatprep.subr.bf16.mxu0 %v6606_v7  ;;  %2293 = vmatpush1.bf16.msra.mxu1 %v6601_v13 }
 0x1a1   : > { %2294 = vmatprep.subr.bf16.mxu1 %v6609_v14 }
 0x1a3   : > { %2090 = vmatpush1.bf16.msra.mxu0 %v6604_v11 }
 0x1a4   : > { %2091 = vmatprep.subr.bf16.mxu0 %v6612_v12  ;;  %2295 = vmatpush1.bf16.msra.mxu1 %v6607_v16 }
 0x1a5   : > { %2296 = vmatprep.subr.bf16.mxu1 %v6615_v17 }
 0x1a7   : > { %2092 = vmatpush1.bf16.msra.mxu0 %v6610_v15 }
 0x1a8   : > { %2297 = vmatpush1.bf16.msra.mxu1 %v6613_v18  ;;  %2093 = vmatprep.subr.bf16.mxu0 %v6618_v19 }
 0x1a9   : > { %2298 = vmatprep.subr.bf16.mxu1 %v6621_v20 }
 0x1ab   : > { %2094 = vmatpush1.bf16.msra.mxu0 %v6616_v21 }
 0x1ac   : > { %2299 = vmatpush1.bf16.msra.mxu1 %v6619_v22  ;;  %2095 = vmatprep.subr.bf16.mxu0 %v6624_v24 }
 0x1ad   : > { %2300 = vmatprep.subr.bf16.mxu1 %v6627_v27 }
 0x1af   : > { %2096 = vmatpush1.bf16.msra.mxu0 %v6622_v23 }
 0x1b0   : > { %2301 = vmatpush1.bf16.msra.mxu1 %v6625_v25  ;;  %2097 = vmatprep.subr.bf16.mxu0 %v6630_v29 }
 0x1b1   : > { %2302 = vmatprep.subr.bf16.mxu1 %v6633_v30 }
 0x1b3   : > { %2098 = vmatpush1.bf16.msra.mxu0 %v6628_v31 }
 0x1b4   : > { %2303 = vmatpush1.bf16.msra.mxu1 %v6631_v32  ;;  %2099 = vmatprep.subr.bf16.mxu0 %v6636_v33 }
 0x1b5   : > { %2304 = vmatprep.subr.bf16.mxu1 %v6639_v34 }
 0x1b7   : > { %2100 = vmatpush1.bf16.msra.mxu0 %v6634_v35 }
 0x1b8   : > { %2305 = vmatpush1.bf16.msra.mxu1 %v6637_v36  ;;  %2101 = vmatprep.subr.bf16.mxu0 %v6642_v37 }
 0x1b9   : > { %2306 = vmatprep.subr.bf16.mxu1 %v6645_v38 }
 0x1bb   : > { %2102 = vmatpush1.bf16.msra.mxu0 %v6640_v39 }
 0x1bc   : > { %2307 = vmatpush1.bf16.msra.mxu1 %v6643_v40  ;;  %2103 = vmatprep.subr.bf16.mxu0 %v6648_v41 }
 0x1bd   : > { %2308 = vmatprep.subr.bf16.mxu1 %v6651_v42 }
 0x1bf   : > { %2104 = vmatpush1.bf16.msra.mxu0 %v6646_v43 }
 0x1c0   : > { %2309 = vmatpush1.bf16.msra.mxu1 %v6649_v44  ;;  %2105 = vmatprep.subr.bf16.mxu0 %v6654_v45 }
 0x1c1   : > { %2310 = vmatprep.subr.bf16.mxu1 %v6657_v46 }
 0x1c3   : > { %2106 = vmatpush1.bf16.msra.mxu0 %v6652_v47  ;;  %v6667_v47 = vld [vmem:[#allocation6 + $0x200] ss:$8 sps:$4 sm:$0xff]  }
 0x1c4   : > { %2311 = vmatpush1.bf16.msra.mxu1 %v6655_v48  ;;  %2107 = vmatprep.subr.bf16.mxu0 %v6660_v49  ;;  %v6675_v49 = vld [vmem:[#allocation6 + $0x214] ss:$8 sps:$4 sm:$0xff]  }
 0x1c5   : > { %2312 = vmatprep.subr.bf16.mxu1 %v6663_v52 }
 0x1c7   : > { %2108 = vmatpush1.bf16.msra.mxu0 %v6658_v50 }
 0x1c8   : > { %2313 = vmatpush1.bf16.msra.mxu1 %v6661_v54  ;;  %2109 = vmatprep.subr.bf16.mxu0 %v6666_v55 }
 0x1c9   : > { %2756 = vmatprep.subr.bf16.mxu1 %v6669_v57 }
 0x1cb   : > { %2110 = vmatpush1.bf16.msra.mxu0 %v6664_v56 }
 0x1cc   : > { %2111 = vmatprep.subr.bf16.mxu0 %v6672_v59 }
 0x1cf   : > { %2112 = vmatpush1.bf16.msra.mxu0 %v6670_v58  ;;  %v6673_v58 = vld [vmem:[#allocation6 + $0x210] ss:$8 sps:$4 sm:$0xff]  }
 0x1d0   : > { %2555 = vmatprep.subr.bf16.mxu0 %v6678_v60 }
 0x21e   : > { %v1232_v61 = vpop.f32.mrb[8].mxu1 }
 0x21f   : > { %v1234_v51 = vpop.f32.mrb[9].mxu1 }
 0x220   : > { %v1236_v62 = vpop.f32.mrb[10].mxu1 }
 0x221   : > { %v1237_v63 = vpop.f32.mrb[11].mxu1 }
 0x225   : > { %v1031_v2 = vpop.f32.mrb[8].mxu0 }
 0x226   : > { %v1233_v4 = vadd.f32 %v1232_v61, %v1031_v2  ;;  %v1033_v5 = vpop.f32.mrb[9].mxu0 }
 0x227   : > { %v1235_v6 = vadd.f32 %v1234_v51, %v1033_v5  ;;  %v1035_v7 = vpop.f32.mrb[10].mxu0  ;;  %v6681_v51 = vld [vmem:[#allocation6 + $0x224] ss:$8 sps:$4 sm:$0xff]   ;;  %v6676_v5 = vld [vmem:[#allocation6 + $0x300] ss:$8 sps:$4 sm:$0xff]  }
 0x228   : > { %v1725_v8 = vadd.f32 %v1718_v1, %v1233_v4  ;;  %v1036_v10 = vpop.f32.mrb[11].mxu0 }
 0x229   : > { %v1726_v11 = vadd.f32 %v1722_v3, %v1235_v6  ;;  %v6679_v6 = vld [vmem:[#allocation6 + $0x220] ss:$8 sps:$4 sm:$0xff]   ;;  %v6687_v10 = vld [vmem:[#allocation6 + $0x234] ss:$8 sps:$4 sm:$0xff]  }
 0x22a   : > { %v1727_v12 = vmax.f32 %v1725_v8, 0.0  ;;  %v6684_v8 = vld [vmem:[#allocation6 + $0x314] ss:$8 sps:$4 sm:$0xff]  }
 0x22b   : > { %v1728_v13 = vmax.f32 %v1726_v11, 0.0 }
 0x22d   : > { %v1740_v14 = vcombine.low %v1727_v12, %v1728_v13  ;;  %v6682_v12 = vld [vmem:[#allocation6 + $0x310] ss:$8 sps:$4 sm:$0xff]  }
 0x22e   : > { %v6685_v13 = vld [vmem:[#allocation6 + $0x230] ss:$8 sps:$4 sm:$0xff]  }
 0x22f   : > { %v1747_v15 = vrot.slane %v1740_v14, %v7723_v53  ;;  %v6690_v14 = vld [vmem:[#allocation6 + $0x324] ss:$8 sps:$4 sm:$0xff]  }
 0x231   : > { %v1754_v16 = vrot.slane %v1747_v15, %v7723_v53  ;;  %v1780_v17 = vcombine.high %v1747_v15, %v1747_v15  ;;  %v6693_v15 = vld [vmem:[#allocation6 + $0x244] ss:$8 sps:$4 sm:$0xff]  }
 0x233   : > { %1757 = vst.msk [vmem:[#allocation3 + $0x1] ss:$8 sm:$0x3] %vm7655_vm1, %v1754_v16  ;;  %v1787_v18 = vrot.slane %v1780_v17, %v7723_v53  ;;  %v1804_v19 = vcombine.high %v1754_v16, %v1754_v16  ;;  %v6688_v16 = vld [vmem:[#allocation6 + $0x320] ss:$8 sps:$4 sm:$0xff]  }
 0x234   : > { %v6691_v17 = vld [vmem:[#allocation6 + $0x240] ss:$8 sps:$4 sm:$0xff]  }
 0x235   : > { %1790 = vst.msk [vmem:[#allocation3 + $0x3] ss:$8 sm:$0x3] %vm7655_vm1, %v1787_v18  ;;  %1807 = vst.msk [vmem:[#allocation3 + $0x5] ss:$8 sm:$0x3] %vm7655_vm1, %v1804_v19  ;;  %v1814_v20 = vcombine.high %v1787_v18, %v1787_v18 }
 0x236   : > { %v6696_v18 = vld [vmem:[#allocation6 + $0x334] ss:$8 sps:$4 sm:$0xff]  }
 0x237   : > { %1817 = vst.msk [vmem:[#allocation3 + $0x7] ss:$8 sm:$0x3] %vm7655_vm1, %v1814_v20  ;;  %v6699_v19 = vld [vmem:[#allocation6 + $0x254] ss:$8 sps:$4 sm:$0xff]  }
 0x238   : > { %v6694_v20 = vld [vmem:[#allocation6 + $0x330] ss:$8 sps:$4 sm:$0xff]  }
 0x25e   : > { %v1706_v21 = vpop.f32.mrb[12].mxu1 }
 0x25f   : > { %v1708_v22 = vpop.f32.mrb[13].mxu1 }
 0x260   : > { %v1710_v23 = vpop.f32.mrb[14].mxu1 }
 0x261   : > { %v1711_v24 = vpop.f32.mrb[15].mxu1  ;;  %v6705_v23 = vld [vmem:[#allocation6 + $0x264] ss:$8 sps:$4 sm:$0xff]  }
 0x262   : > { %v6700_v24 = vld [vmem:[#allocation6 + $0x340] ss:$8 sps:$4 sm:$0xff]  }
 0x265   : > { %v1505_v25 = vpop.f32.mrb[12].mxu0 }
 0x266   : > { %v1707_v27 = vadd.f32 %v1706_v21, %v1505_v25  ;;  %v1507_v29 = vpop.f32.mrb[13].mxu0  ;;  %v6697_v21 = vld [vmem:[#allocation6 + $0x250] ss:$8 sps:$4 sm:$0xff]   ;;  %v6703_v25 = vld [vmem:[#allocation6 + $0x260] ss:$8 sps:$4 sm:$0xff]  }
 0x267   : > { %v1709_v30 = vadd.f32 %v1708_v22, %v1507_v29  ;;  %v1509_v31 = vpop.f32.mrb[14].mxu0  ;;  %v6702_v22 = vld [vmem:[#allocation6 + $0x344] ss:$8 sps:$4 sm:$0xff]   ;;  %v6711_v29 = vld [vmem:[#allocation6 + $0x274] ss:$8 sps:$4 sm:$0xff]  }
 0x268   : > { %v1729_v32 = vadd.f32 %v1718_v1, %v1707_v27  ;;  %v1510_v33 = vpop.f32.mrb[15].mxu0  ;;  %v6708_v27 = vld [vmem:[#allocation6 + $0x354] ss:$8 sps:$4 sm:$0xff]   ;;  %v6709_v31 = vld [vmem:[#allocation6 + $0x270] ss:$8 sps:$4 sm:$0xff]  }
 0x269   : > { %v1730_v34 = vadd.f32 %v1722_v3, %v1709_v30  ;;  %v6706_v30 = vld [vmem:[#allocation6 + $0x350] ss:$8 sps:$4 sm:$0xff]   ;;  %v6717_v33 = vld [vmem:[#allocation6 + $0x284] ss:$8 sps:$4 sm:$0xff]  }
 0x26a   : > { %v1731_v35 = vmax.f32 %v1729_v32, 0.0  ;;  %v6714_v32 = vld [vmem:[#allocation6 + $0x364] ss:$8 sps:$4 sm:$0xff]  }
 0x26b   : > { %v1732_v36 = vmax.f32 %v1730_v34, 0.0  ;;  %v6712_v34 = vld [vmem:[#allocation6 + $0x360] ss:$8 sps:$4 sm:$0xff]  }
 0x26d   : > { %v1761_v37 = vcombine.low %v1731_v35, %v1732_v36  ;;  %v6715_v35 = vld [vmem:[#allocation6 + $0x280] ss:$8 sps:$4 sm:$0xff]   ;;  %v6720_v36 = vld [vmem:[#allocation6 + $0x374] ss:$8 sps:$4 sm:$0xff]  }
 0x26f   : > { %v1768_v38 = vrot.slane %v1761_v37, %v7723_v53  ;;  %v6723_v37 = vld [vmem:[#allocation6 + $0x294] ss:$8 sps:$4 sm:$0xff]  }
 0x271   : > { %v1775_v39 = vrot.slane %v1768_v38, %v7723_v53  ;;  %v1792_v40 = vcombine.high %v1768_v38, %v1768_v38  ;;  %v6718_v38 = vld [vmem:[#allocation6 + $0x370] ss:$8 sps:$4 sm:$0xff]  }
 0x273   : > { %1778 = vst.msk [vmem:[#allocation3 + $0x2] ss:$8 sm:$0x3] %vm7655_vm1, %v1775_v39  ;;  %v1799_v41 = vrot.slane %v1792_v40, %v7723_v53  ;;  %v1809_v42 = vcombine.high %v1775_v39, %v1775_v39  ;;  %v6721_v39 = vld [vmem:[#allocation6 + $0x290] ss:$8 sps:$4 sm:$0xff]  }
 0x274   : > { %v6726_v40 = vld [vmem:[#allocation6 + $0x384] ss:$8 sps:$4 sm:$0xff]  }
 0x275   : > { %1802 = vst.msk [vmem:[#allocation3 + $0x4] ss:$8 sm:$0x3] %vm7655_vm1, %v1799_v41  ;;  %1812 = vst.msk [vmem:[#allocation3 + $0x6] ss:$8 sm:$0x3] %vm7655_vm1, %v1809_v42  ;;  %v1819_v43 = vcombine.high %v1799_v41, %v1799_v41 }
 0x276   : > { %v6729_v41 = vld [vmem:[#allocation6 + $0x2a4] ss:$8 sps:$4 sm:$0xff]   ;;  %v6724_v42 = vld [vmem:[#allocation6 + $0x380] ss:$8 sps:$4 sm:$0xff]  }
 0x277   : > { %1822 = vst.msk [vmem:[#allocation3 + $0x10] ss:$8 sm:$0x3] %vm7655_vm1, %v1819_v43  ;;  %v6727_v43 = vld [vmem:[#allocation6 + $0x2a0] ss:$8 sps:$4 sm:$0xff]  }
 0x27c   : > { %v1825_v44 = vld [vmem:[#allocation3 + $0x8] sm:$0xff]  ;;  %v1824_v45 = vld [vmem:[#allocation3] sm:$0xff] }
 0x27d   : > { %v1827_v46 = vpack.c.bf16 %v1825_v44, %v1825_v44  ;;  %v1826_v48 = vpack.c.bf16 %v1824_v45, %v1824_v45  ;;  %v1829_v50 = vld [vmem:[#allocation3 + $0x8] sm:$0xfe]  ;;  %v1828_v54 = vld [vmem:[#allocation3] sm:$0xfe]  ;;  %v6732_v44 = vld [vmem:[#allocation6 + $0x394] ss:$8 sps:$4 sm:$0xff]  }
 0x27e   : > { %v1831_v52 = vld [vmem:[#allocation3 + $0x18] sm:$0x1]  ;;  %v1830_v55 = vld [vmem:[#allocation3 + $0x10] sm:$0x1]  ;;  %v1835_v2 = vld [vmem:[#allocation3 + $0x8] sm:$0xfc] }
 0x27f   : > { %2314 = vmatprep.mubr.bf16.mxu1 %v1827_v46  ;;  %v1833_v56 = vpack.c.bf16 %v1831_v52, %v1829_v50  ;;  %v1832_v57 = vpack.c.bf16 %v1830_v55, %v1828_v54  ;;  %v1837_v61 = vld [vmem:[#allocation3 + $0x18] sm:$0x3]  ;;  %v6735_v45 = vld [vmem:[#allocation6 + $0x2b4] ss:$8 sps:$4 sm:$0xff]   ;;  %v6736_v50 = vld [vmem:[#allocation6 + $0x3a0] ss:$8 sps:$4 sm:$0xff]  }
 0x280   : > { %2315 = vmatmul.mubr.bf16.vlgmr.msra.gmra.mrb[16].mxu1 %v1826_v48  ;;  %v1839_v3 = vpack.c.bf16 %v1837_v61, %v1835_v2  ;;  %v6730_v46 = vld [vmem:[#allocation6 + $0x390] ss:$8 sps:$4 sm:$0xff]   ;;  %v6738_v48 = vld [vmem:[#allocation6 + $0x3a4] ss:$8 sps:$4 sm:$0xff]   ;;  %v6739_v52 = vld [vmem:[#allocation6 + $0x2c0] ss:$8 sps:$4 sm:$0xff]  }
 0x281   : > { %2757 = vmatpush1.bf16.msra.mxu1 %v6667_v47  ;;  %v1915_v59 = vshll.u32 %v1833_v56, 16  ;;  %v1908_v60 = vshll.u32 %v1832_v57, 16  ;;  %v1913_v62 = vshrl.u32 %v1833_v56, 16  ;;  %v1906_v0 = vshrl.u32 %v1832_v57, 16  ;;  %v6733_v47 = vld [vmem:[#allocation6 + $0x2b0] ss:$8 sps:$4 sm:$0xff]  }
 0x282   : > { %2758 = vmatprep.subr.bf16.mxu1 %v6675_v49  ;;  %v2392_v11 = vrot.slane %v1839_v3, 1  ;;  %v6741_v49 = vld [vmem:[#allocation6 + $0x2c4] ss:$8 sps:$4 sm:$0xff]   ;;  %v6744_v54 = vld [vmem:[#allocation6 + $0x3b4] ss:$8 sps:$4 sm:$0xff]  }
 0x283   : > { %v1917_v63 = vrot.slane %v1915_v59, 1  ;;  %v1910_v1 = vrot.slane %v1908_v60, 1  ;;  %v6747_v55 = vld [vmem:[#allocation6 + $0x2d4] ss:$8 sps:$4 sm:$0xff]   ;;  %v6742_v56 = vld [vmem:[#allocation6 + $0x3b0] ss:$8 sps:$4 sm:$0xff]  }
 0x284   : > { %v6745_v57 = vld [vmem:[#allocation6 + $0x2d0] ss:$8 sps:$4 sm:$0xff]   ;;  %v6753_v59 = vld [vmem:[#allocation6 + $0x2e4] ss:$8 sps:$4 sm:$0xff]   ;;  %v6748_v60 = vld [vmem:[#allocation6 + $0x3c0] ss:$8 sps:$4 sm:$0xff]  }
 0x285   : > { %2759 = vmatpush1.bf16.msra.mxu1 %v6673_v58  ;;  %v1918_v4 = vor.u32 %v1917_v63, %v1913_v62  ;;  %v7958_v7 = vor.u32 %v1910_v1, %v1906_v0  ;;  %v6750_v58 = vld [vmem:[#allocation6 + $0x3c4] ss:$8 sps:$4 sm:$0xff]   ;;  %v6751_v61 = vld [vmem:[#allocation6 + $0x2e0] ss:$8 sps:$4 sm:$0xff]   ;;  %v6759_v62 = vld [vmem:[#allocation6 + $0x2f4] ss:$8 sps:$4 sm:$0xff]  }
 0x286   : > { %2760 = vmatprep.subr.bf16.mxu1 %v6681_v51  ;;  %v6756_v51 = vld [vmem:[#allocation6 + $0x3d4] ss:$8 sps:$4 sm:$0xff]   ;;  %v6754_v63 = vld [vmem:[#allocation6 + $0x3d0] ss:$8 sps:$4 sm:$0xff]   ;;  %v6762_v1 = vld [vmem:[#allocation6 + $0x3e4] ss:$8 sps:$4 sm:$0xff]  }
 0x287   : > { %2113 = vmatprep.mubr.bf16.mxu0 %v1918_v4  ;;  %2788 = vmatprep.mubr.bf16.mxu1 %v1918_v4  ;;  %v6757_v0 = vld [vmem:[#allocation6 + $0x2f0] ss:$8 sps:$4 sm:$0xff]   ;;  %v6760_v2 = vld [vmem:[#allocation6 + $0x3e0] ss:$8 sps:$4 sm:$0xff]   ;;  %v6765_v3 = vld [vmem:[#allocation6 + $0x3f4] ss:$8 sps:$4 sm:$0xff]  }
 0x288   : > { %2114 = vmatmul.mubr.bf16.vlgmr.msra.gmra.mrb[16].mxu0 %v7958_v7  ;;  %v1836_v4 = vld [vmem:[#allocation3 + $0x10] sm:$0x3] }
 0x289   : > { %2556 = vmatpush1.bf16.msra.mxu0 %v6676_v5  ;;  %2761 = vmatpush1.bf16.msra.mxu1 %v6679_v6  ;;  %v6763_v5 = vld [vmem:[#allocation6 + $0x3f0] ss:$8 sps:$4 sm:$0xff]   ;;  %v1834_v6 = vld [vmem:[#allocation3] sm:$0xfc] }
 0x28a   : > { %2587 = vmatprep.mubr.bf16.mxu0 %v2392_v11  ;;  %2557 = vmatprep.subr.bf16.mxu0 %v6684_v8  ;;  %v1838_v8 = vpack.c.bf16 %v1836_v4, %v1834_v6  ;;  %v6766_v11 = vld [vmem:[#allocation9 + $0x300] ss:$8 sps:$4 sm:$0xff]   ;;  %v6852_v4 = vld [vmem:[#allocation9 + $0x3e4] ss:$8 sps:$4 sm:$0xff]  }
 0x28b   : > { %2762 = vmatprep.subr.bf16.mxu1 %v6687_v10  ;;  %v6850_v6 = vld [vmem:[#allocation9 + $0x3e0] ss:$8 sps:$4 sm:$0xff]  }
 0x28c   : > { %v2391_v10 = vrot.slane %v1838_v8, 1  ;;  %v6855_v8 = vld [vmem:[#allocation9 + $0x1e4] ss:$8 sps:$4 sm:$0xff]  }
 0x28d   : > { %2558 = vmatpush1.bf16.msra.mxu0 %v6682_v12  ;;  %2763 = vmatpush1.bf16.msra.mxu1 %v6685_v13  ;;  %v6768_v12 = vld [vmem:[#allocation9 + $0x304] ss:$8 sps:$4 sm:$0xff]   ;;  %v6769_v13 = vld [vmem:[#allocation9 + $0x100] ss:$8 sps:$4 sm:$0xff]  }
 0x28e   : > { %2559 = vmatprep.subr.bf16.mxu0 %v6690_v14  ;;  %2764 = vmatprep.subr.bf16.mxu1 %v6693_v15  ;;  %v6771_v14 = vld [vmem:[#allocation9 + $0x104] ss:$8 sps:$4 sm:$0xff]   ;;  %v6774_v15 = vld [vmem:[#allocation9 + $0x314] ss:$8 sps:$4 sm:$0xff]  }
 0x291   : > { %2560 = vmatpush1.bf16.msra.mxu0 %v6688_v16  ;;  %2765 = vmatpush1.bf16.msra.mxu1 %v6691_v17  ;;  %v6777_v16 = vld [vmem:[#allocation9 + $0x114] ss:$8 sps:$4 sm:$0xff]   ;;  %v6772_v17 = vld [vmem:[#allocation9 + $0x310] ss:$8 sps:$4 sm:$0xff]  }
 0x292   : > { %2561 = vmatprep.subr.bf16.mxu0 %v6696_v18  ;;  %2766 = vmatprep.subr.bf16.mxu1 %v6699_v19  ;;  %v6780_v18 = vld [vmem:[#allocation9 + $0x324] ss:$8 sps:$4 sm:$0xff]  }
 0x293   : > { %v6783_v19 = vld [vmem:[#allocation9 + $0x124] ss:$8 sps:$4 sm:$0xff]  }
 0x295   : > { %2562 = vmatpush1.bf16.msra.mxu0 %v6694_v20  ;;  %2767 = vmatpush1.bf16.msra.mxu1 %v6697_v21  ;;  %v6778_v20 = vld [vmem:[#allocation9 + $0x320] ss:$8 sps:$4 sm:$0xff]  }
 0x296   : > { %2563 = vmatprep.subr.bf16.mxu0 %v6702_v22  ;;  %2768 = vmatprep.subr.bf16.mxu1 %v6705_v23  ;;  %v6781_v21 = vld [vmem:[#allocation9 + $0x120] ss:$8 sps:$4 sm:$0xff]   ;;  %v6786_v22 = vld [vmem:[#allocation9 + $0x334] ss:$8 sps:$4 sm:$0xff]  }
 0x297   : > { %v6789_v23 = vld [vmem:[#allocation9 + $0x134] ss:$8 sps:$4 sm:$0xff]  }
 0x299   : > { %2564 = vmatpush1.bf16.msra.mxu0 %v6700_v24  ;;  %2769 = vmatpush1.bf16.msra.mxu1 %v6703_v25  ;;  %v6784_v24 = vld [vmem:[#allocation9 + $0x330] ss:$8 sps:$4 sm:$0xff]  }
 0x29a   : > { %2565 = vmatprep.subr.bf16.mxu0 %v6708_v27  ;;  %2770 = vmatprep.subr.bf16.mxu1 %v6711_v29  ;;  %v6787_v25 = vld [vmem:[#allocation9 + $0x130] ss:$8 sps:$4 sm:$0xff]   ;;  %v6792_v27 = vld [vmem:[#allocation9 + $0x344] ss:$8 sps:$4 sm:$0xff]  }
 0x29b   : > { %v6795_v29 = vld [vmem:[#allocation9 + $0x144] ss:$8 sps:$4 sm:$0xff]  }
 0x29d   : > { %2566 = vmatpush1.bf16.msra.mxu0 %v6706_v30  ;;  %2771 = vmatpush1.bf16.msra.mxu1 %v6709_v31  ;;  %v6790_v30 = vld [vmem:[#allocation9 + $0x340] ss:$8 sps:$4 sm:$0xff]  }
 0x29e   : > { %2567 = vmatprep.subr.bf16.mxu0 %v6714_v32  ;;  %2772 = vmatprep.subr.bf16.mxu1 %v6717_v33  ;;  %v6793_v31 = vld [vmem:[#allocation9 + $0x140] ss:$8 sps:$4 sm:$0xff]   ;;  %v6798_v32 = vld [vmem:[#allocation9 + $0x354] ss:$8 sps:$4 sm:$0xff]  }
 0x29f   : > { %v6801_v33 = vld [vmem:[#allocation9 + $0x154] ss:$8 sps:$4 sm:$0xff]  }
 0x2a1   : > { %2568 = vmatpush1.bf16.msra.mxu0 %v6712_v34  ;;  %2773 = vmatpush1.bf16.msra.mxu1 %v6715_v35  ;;  %v6796_v34 = vld [vmem:[#allocation9 + $0x350] ss:$8 sps:$4 sm:$0xff]  }
 0x2a2   : > { %2569 = vmatprep.subr.bf16.mxu0 %v6720_v36  ;;  %2774 = vmatprep.subr.bf16.mxu1 %v6723_v37  ;;  %v6799_v35 = vld [vmem:[#allocation9 + $0x150] ss:$8 sps:$4 sm:$0xff]   ;;  %v6804_v36 = vld [vmem:[#allocation9 + $0x364] ss:$8 sps:$4 sm:$0xff]   ;;  %v6802_v37 = vld [vmem:[#allocation9 + $0x360] ss:$8 sps:$4 sm:$0xff]  }
 0x2a5   : > { %2570 = vmatpush1.bf16.msra.mxu0 %v6718_v38  ;;  %2775 = vmatpush1.bf16.msra.mxu1 %v6721_v39  ;;  %v6807_v38 = vld [vmem:[#allocation9 + $0x164] ss:$8 sps:$4 sm:$0xff]   ;;  %v6810_v39 = vld [vmem:[#allocation9 + $0x374] ss:$8 sps:$4 sm:$0xff]  }
 0x2a6   : > { %2571 = vmatprep.subr.bf16.mxu0 %v6726_v40  ;;  %2776 = vmatprep.subr.bf16.mxu1 %v6729_v41  ;;  %v6805_v40 = vld [vmem:[#allocation9 + $0x160] ss:$8 sps:$4 sm:$0xff]   ;;  %v6808_v41 = vld [vmem:[#allocation9 + $0x370] ss:$8 sps:$4 sm:$0xff]  }
 0x2a9   : > { %2572 = vmatpush1.bf16.msra.mxu0 %v6724_v42  ;;  %2777 = vmatpush1.bf16.msra.mxu1 %v6727_v43  ;;  %v6813_v42 = vld [vmem:[#allocation9 + $0x174] ss:$8 sps:$4 sm:$0xff]   ;;  %v6811_v43 = vld [vmem:[#allocation9 + $0x170] ss:$8 sps:$4 sm:$0xff]  }
 0x2aa   : > { %2573 = vmatprep.subr.bf16.mxu0 %v6732_v44  ;;  %2778 = vmatprep.subr.bf16.mxu1 %v6735_v45  ;;  %v6814_v44 = vld [vmem:[#allocation9 + $0x380] ss:$8 sps:$4 sm:$0xff]   ;;  %v6816_v45 = vld [vmem:[#allocation9 + $0x384] ss:$8 sps:$4 sm:$0xff]  }
 0x2ad   : > { %2574 = vmatpush1.bf16.msra.mxu0 %v6730_v46  ;;  %2779 = vmatpush1.bf16.msra.mxu1 %v6733_v47  ;;  %v6819_v46 = vld [vmem:[#allocation9 + $0x184] ss:$8 sps:$4 sm:$0xff]   ;;  %v6822_v47 = vld [vmem:[#allocation9 + $0x394] ss:$8 sps:$4 sm:$0xff]  }
 0x2ae   : > { %2575 = vmatprep.subr.bf16.mxu0 %v6738_v48  ;;  %2780 = vmatprep.subr.bf16.mxu1 %v6741_v49  ;;  %v6817_v48 = vld [vmem:[#allocation9 + $0x180] ss:$8 sps:$4 sm:$0xff]   ;;  %v6820_v49 = vld [vmem:[#allocation9 + $0x390] ss:$8 sps:$4 sm:$0xff]  }
 0x2b1   : > { %2576 = vmatpush1.bf16.msra.mxu0 %v6736_v50  ;;  %2781 = vmatpush1.bf16.msra.mxu1 %v6739_v52  ;;  %v6825_v50 = vld [vmem:[#allocation9 + $0x194] ss:$8 sps:$4 sm:$0xff]   ;;  %v6828_v52 = vld [vmem:[#allocation9 + $0x3a4] ss:$8 sps:$4 sm:$0xff]  }
 0x2b2   : > { %2577 = vmatprep.subr.bf16.mxu0 %v6744_v54  ;;  %2782 = vmatprep.subr.bf16.mxu1 %v6747_v55  ;;  %v6823_v54 = vld [vmem:[#allocation9 + $0x190] ss:$8 sps:$4 sm:$0xff]   ;;  %v6826_v55 = vld [vmem:[#allocation9 + $0x3a0] ss:$8 sps:$4 sm:$0xff]  }
 0x2b5   : > { %2578 = vmatpush1.bf16.msra.mxu0 %v6742_v56  ;;  %2783 = vmatpush1.bf16.msra.mxu1 %v6745_v57  ;;  %v6831_v56 = vld [vmem:[#allocation9 + $0x1a4] ss:$8 sps:$4 sm:$0xff]   ;;  %v6834_v57 = vld [vmem:[#allocation9 + $0x3b4] ss:$8 sps:$4 sm:$0xff]  }
 0x2b6   : > { %2579 = vmatprep.subr.bf16.mxu0 %v6750_v58  ;;  %2784 = vmatprep.subr.bf16.mxu1 %v6753_v59  ;;  %v6829_v58 = vld [vmem:[#allocation9 + $0x1a0] ss:$8 sps:$4 sm:$0xff]   ;;  %v6832_v59 = vld [vmem:[#allocation9 + $0x3b0] ss:$8 sps:$4 sm:$0xff]  }
 0x2b9   : > { %2580 = vmatpush1.bf16.msra.mxu0 %v6748_v60  ;;  %2785 = vmatpush1.bf16.msra.mxu1 %v6751_v61  ;;  %v6837_v60 = vld [vmem:[#allocation9 + $0x1b4] ss:$8 sps:$4 sm:$0xff]   ;;  %v6840_v61 = vld [vmem:[#allocation9 + $0x3c4] ss:$8 sps:$4 sm:$0xff]  }
 0x2ba   : > { %2581 = vmatprep.subr.bf16.mxu0 %v6756_v51  ;;  %2786 = vmatprep.subr.bf16.mxu1 %v6759_v62  ;;  %v6835_v51 = vld [vmem:[#allocation9 + $0x1b0] ss:$8 sps:$4 sm:$0xff]   ;;  %v6838_v62 = vld [vmem:[#allocation9 + $0x3c0] ss:$8 sps:$4 sm:$0xff]  }
 0x2bd   : > { %2582 = vmatpush1.bf16.msra.mxu0 %v6754_v63  ;;  %2787 = vmatpush1.bf16.msra.mxu1 %v6757_v0  ;;  %v6843_v63 = vld [vmem:[#allocation9 + $0x1c4] ss:$8 sps:$4 sm:$0xff]   ;;  %v6846_v0 = vld [vmem:[#allocation9 + $0x3d4] ss:$8 sps:$4 sm:$0xff]  }
 0x2be   : > { %2583 = vmatprep.subr.bf16.mxu0 %v6762_v1  ;;  %3749 = vmatprep.subr.bf16.mxu1 %v6768_v12  ;;  %v6841_v1 = vld [vmem:[#allocation9 + $0x1c0] ss:$8 sps:$4 sm:$0xff]   ;;  %v6856_v12 = vld [vmem:[#allocation9 + $0x3f0] ss:$8 sps:$4 sm:$0xff]  }
 0x2c0   : > { %2789 = vmatmul.mubr.bf16.vlgmr.msra.gmra.mrb[20].mxu1 %v7958_v7  ;;  %v6775_v7 = vld [vmem:[#allocation9 + $0x110] ss:$8 sps:$4 sm:$0xff]  }
 0x2c1   : > { %2584 = vmatpush1.bf16.msra.mxu0 %v6760_v2  ;;  %3750 = vmatpush1.bf16.msra.mxu1 %v6766_v11  ;;  %v6844_v2 = vld [vmem:[#allocation9 + $0x3d0] ss:$8 sps:$4 sm:$0xff]   ;;  %v6853_v11 = vld [vmem:[#allocation9 + $0x1e0] ss:$8 sps:$4 sm:$0xff]  }
 0x2c2   : > { %2585 = vmatprep.subr.bf16.mxu0 %v6765_v3  ;;  %3751 = vmatprep.subr.bf16.mxu1 %v6774_v15  ;;  %v6849_v3 = vld [vmem:[#allocation9 + $0x1d4] ss:$8 sps:$4 sm:$0xff]   ;;  %v6864_v15 = vld [vmem:[#allocation9 + $0x204] ss:$8 sps:$4 sm:$0xff]  }
 0x2c5   : > { %2586 = vmatpush1.bf16.msra.mxu0 %v6763_v5  ;;  %3752 = vmatpush1.bf16.msra.mxu1 %v6772_v17  ;;  %v6847_v5 = vld [vmem:[#allocation9 + $0x1d0] ss:$8 sps:$4 sm:$0xff]  }
 0x2c6   : > { %3264 = vmatprep.subr.bf16.mxu0 %v6771_v14  ;;  %3753 = vmatprep.subr.bf16.mxu1 %v6780_v18  ;;  %v6859_v14 = vld [vmem:[#allocation9 + $0x1f0] ss:$8 sps:$4 sm:$0xff]  }
 0x2c8   : > { %2588 = vmatmul.mubr.bf16.vlgmr.msra.gmra.mrb[20].mxu0 %v2391_v10  ;;  %v6858_v10 = vld [vmem:[#allocation9 + $0x3f4] ss:$8 sps:$4 sm:$0xff]  }
 0x2c9   : > { %3265 = vmatpush1.bf16.msra.mxu0 %v6769_v13  ;;  %3754 = vmatpush1.bf16.msra.mxu1 %v6778_v20  ;;  %v6861_v13 = vld [vmem:[#allocation9 + $0x1f4] ss:$8 sps:$4 sm:$0xff]   ;;  %v2797_v20 = vld [vmem:[%s8630_s6] sm:$0x3] }
 0x2ca   : > { %3266 = vmatprep.subr.bf16.mxu0 %v6777_v16  ;;  %3755 = vmatprep.subr.bf16.mxu1 %v6786_v22  ;;  %v6867_v16 = vld [vmem:[#allocation9 + $0x4] ss:$8 sps:$4 sm:$0xff]  }
 0x2cd   : > { %3267 = vmatpush1.bf16.msra.mxu0 %v6775_v7  ;;  %3756 = vmatpush1.bf16.msra.mxu1 %v6784_v24 }
 0x2ce   : > { %3268 = vmatprep.subr.bf16.mxu0 %v6783_v19  ;;  %3757 = vmatprep.subr.bf16.mxu1 %v6792_v27 }
 0x2d1   : > { %3269 = vmatpush1.bf16.msra.mxu0 %v6781_v21  ;;  %3758 = vmatpush1.bf16.msra.mxu1 %v6790_v30  ;;  %v2802_v21 = vrot.slane %v2797_v20, %v7717_v26 }
 0x2d2   : > { %3270 = vmatprep.subr.bf16.mxu0 %v6789_v23  ;;  %3759 = vmatprep.subr.bf16.mxu1 %v6798_v32  ;;  %v2806_v23 = vrot.slane %v2797_v20, %v7719_v28 }
 0x2d5   : > { %3271 = vmatpush1.bf16.msra.mxu0 %v6787_v25  ;;  %3760 = vmatpush1.bf16.msra.mxu1 %v6796_v34 }
 0x2d6   : > { %3272 = vmatprep.subr.bf16.mxu0 %v6795_v29  ;;  %3761 = vmatprep.subr.bf16.mxu1 %v6804_v36 }
 0x2d9   : > { %3273 = vmatpush1.bf16.msra.mxu0 %v6793_v31  ;;  %3762 = vmatpush1.bf16.msra.mxu1 %v6802_v37 }
 0x2da   : > { %3274 = vmatprep.subr.bf16.mxu0 %v6801_v33  ;;  %3763 = vmatprep.subr.bf16.mxu1 %v6810_v39 }
 0x2dd   : > { %3275 = vmatpush1.bf16.msra.mxu0 %v6799_v35  ;;  %3764 = vmatpush1.bf16.msra.mxu1 %v6808_v41 }
 0x2de   : > { %3276 = vmatprep.subr.bf16.mxu0 %v6807_v38  ;;  %3765 = vmatprep.subr.bf16.mxu1 %v6816_v45 }
 0x2e1   : > { %3277 = vmatpush1.bf16.msra.mxu0 %v6805_v40  ;;  %3766 = vmatpush1.bf16.msra.mxu1 %v6814_v44 }
 0x2e2   : > { %3278 = vmatprep.subr.bf16.mxu0 %v6813_v42  ;;  %3767 = vmatprep.subr.bf16.mxu1 %v6822_v47 }
 0x2e5   : > { %3279 = vmatpush1.bf16.msra.mxu0 %v6811_v43  ;;  %3768 = vmatpush1.bf16.msra.mxu1 %v6820_v49 }
 0x2e6   : > { %3280 = vmatprep.subr.bf16.mxu0 %v6819_v46  ;;  %3769 = vmatprep.subr.bf16.mxu1 %v6828_v52 }
 0x2e9   : > { %3281 = vmatpush1.bf16.msra.mxu0 %v6817_v48  ;;  %3770 = vmatpush1.bf16.msra.mxu1 %v6826_v55 }
 0x2ea   : > { %3282 = vmatprep.subr.bf16.mxu0 %v6825_v50  ;;  %3771 = vmatprep.subr.bf16.mxu1 %v6834_v57 }
 0x2ed   : > { %3283 = vmatpush1.bf16.msra.mxu0 %v6823_v54  ;;  %3772 = vmatpush1.bf16.msra.mxu1 %v6832_v59 }
 0x2ee   : > { %3284 = vmatprep.subr.bf16.mxu0 %v6831_v56  ;;  %3773 = vmatprep.subr.bf16.mxu1 %v6840_v61 }
 0x2f1   : > { %3285 = vmatpush1.bf16.msra.mxu0 %v6829_v58  ;;  %3774 = vmatpush1.bf16.msra.mxu1 %v6838_v62 }
 0x2f2   : > { %3286 = vmatprep.subr.bf16.mxu0 %v6837_v60  ;;  %3775 = vmatprep.subr.bf16.mxu1 %v6846_v0 }
 0x2f5   : > { %3287 = vmatpush1.bf16.msra.mxu0 %v6835_v51  ;;  %3776 = vmatpush1.bf16.msra.mxu1 %v6844_v2 }
 0x2f6   : > { %3288 = vmatprep.subr.bf16.mxu0 %v6843_v63  ;;  %3777 = vmatprep.subr.bf16.mxu1 %v6852_v4 }
 0x2f9   : > { %3289 = vmatpush1.bf16.msra.mxu0 %v6841_v1  ;;  %3778 = vmatpush1.bf16.msra.mxu1 %v6850_v6 }
 0x2fa   : > { %3290 = vmatprep.subr.bf16.mxu0 %v6849_v3  ;;  %3779 = vmatprep.subr.bf16.mxu1 %v6858_v10 }
 0x2fd   : > { %3291 = vmatpush1.bf16.msra.mxu0 %v6847_v5  ;;  %3780 = vmatpush1.bf16.msra.mxu1 %v6856_v12 }
 0x2fe   : > { %3292 = vmatprep.subr.bf16.mxu0 %v6855_v8  ;;  %3952 = vmatprep.subr.bf16.mxu1 %v6864_v15 }
 0x301   : > { %3293 = vmatpush1.bf16.msra.mxu0 %v6853_v11 }
 0x302   : > { %3294 = vmatprep.subr.bf16.mxu0 %v6861_v13 }
 0x305   : > { %3295 = vmatpush1.bf16.msra.mxu0 %v6859_v14 }
 0x306   : > { %3467 = vmatprep.subr.bf16.mxu0 %v6867_v16 }
 0x353   : > { %v2316_v17 = vpop.f32.mrb[16].mxu1 }
 0x354   : > { %v2318_v7 = vpop.f32.mrb[17].mxu1 }
 0x355   : > { %v2320_v18 = vpop.f32.mrb[18].mxu1 }
 0x356   : > { %v2321_v19 = vpop.f32.mrb[19].mxu1 }
 0x35b   : > { %v2115_v22 = vpop.f32.mrb[16].mxu0 }
 0x35c   : > { %v2317_v24 = vadd.f32 %v2316_v17, %v2115_v22  ;;  %v2117_v25 = vpop.f32.mrb[17].mxu0 }
 0x35d   : > { %v2319_v27 = vadd.f32 %v2318_v7, %v2117_v25  ;;  %v2119_v29 = vpop.f32.mrb[18].mxu0 }
 0x35e   : > { %v2809_v30 = vadd.f32 %v2802_v21, %v2317_v24  ;;  %v2120_v31 = vpop.f32.mrb[19].mxu0 }
 0x35f   : > { %v2810_v32 = vadd.f32 %v2806_v23, %v2319_v27 }
 0x360   : > { %v2811_v33 = vmax.f32 %v2809_v30, 0.0 }
 0x361   : > { %v2812_v34 = vmax.f32 %v2810_v32, 0.0 }
 0x363   : > { %v2824_v35 = vcombine.low %v2811_v33, %v2812_v34  ;;  %v2908_v36 = vcombine.high %v2811_v33, %v2812_v34 }
 0x365   : > { %v2831_v37 = vrot.slane %v2824_v35, %v7723_v53  ;;  %v2915_v38 = vrot.slane %v2908_v36, %v7723_v53 }
 0x367   : > { %v2838_v39 = vrot.slane %v2831_v37, %v7723_v53  ;;  %v2864_v40 = vcombine.high %v2831_v37, %v2831_v37  ;;  %v2922_v41 = vrot.slane %v2915_v38, %v7723_v53  ;;  %v2946_v42 = vcombine.high %v2915_v38, %v2915_v38  ;;  %v6862_v38 = vld [vmem:[#allocation9 + $0x200] ss:$8 sps:$4 sm:$0xff]  }
 0x369   : > { %2841 = vst.msk [vmem:[#allocation4 + $0x1] ss:$8 sm:$0x3] %vm7655_vm1, %v2838_v39  ;;  %v2871_v43 = vrot.slane %v2864_v40, %v7723_v53  ;;  %v2888_v44 = vcombine.high %v2838_v39, %v2838_v39  ;;  %2925 = vst.msk [vmem:[#allocation4 + $0x11] ss:$8 sm:$0x3] %vm7655_vm1, %v2922_v41  ;;  %v2953_v45 = vrot.slane %v2946_v42, %v7723_v53 }
 0x36a   : > { %v2970_v46 = vcombine.high %v2922_v41, %v2922_v41 }
 0x36b   : > { %2874 = vst.msk [vmem:[#allocation4 + $0x3] ss:$8 sm:$0x3] %vm7655_vm1, %v2871_v43  ;;  %2891 = vst.msk [vmem:[#allocation4 + $0x5] ss:$8 sm:$0x3] %vm7655_vm1, %v2888_v44  ;;  %v2898_v47 = vcombine.high %v2871_v43, %v2871_v43  ;;  %v2980_v48 = vcombine.high %v2953_v45, %v2953_v45 }
 0x36c   : > { %2956 = vst.msk [vmem:[#allocation4 + $0x13] ss:$8 sm:$0x3] %vm7655_vm1, %v2953_v45  ;;  %2973 = vst.msk [vmem:[#allocation4 + $0x15] ss:$8 sm:$0x3] %vm7655_vm1, %v2970_v46 }
 0x36d   : > { %2901 = vst.msk [vmem:[#allocation4 + $0x7] ss:$8 sm:$0x3] %vm7655_vm1, %v2898_v47  ;;  %2983 = vst.msk [vmem:[#allocation4 + $0x17] ss:$8 sm:$0x3] %vm7655_vm1, %v2980_v48 }
 0x36e   : > { %v6870_v43 = vld [vmem:[#allocation9 + $0x214] ss:$8 sps:$4 sm:$0xff]  }
 0x393   : > { %v2790_v49 = vpop.f32.mrb[20].mxu1 }
 0x394   : > { %v2792_v50 = vpop.f32.mrb[21].mxu1 }
 0x395   : > { %v2794_v52 = vpop.f32.mrb[22].mxu1 }
 0x396   : > { %v2795_v54 = vpop.f32.mrb[23].mxu1 }
 0x39b   : > { %v2589_v55 = vpop.f32.mrb[20].mxu0 }
 0x39c   : > { %v2791_v56 = vadd.f32 %v2790_v49, %v2589_v55  ;;  %v2591_v57 = vpop.f32.mrb[21].mxu0  ;;  %v6868_v55 = vld [vmem:[#allocation9 + $0x210] ss:$8 sps:$4 sm:$0xff]  }
 0x39d   : > { %v2793_v58 = vadd.f32 %v2792_v50, %v2591_v57  ;;  %v2593_v59 = vpop.f32.mrb[22].mxu0 }
 0x39e   : > { %v2813_v60 = vadd.f32 %v2802_v21, %v2791_v56  ;;  %v2594_v61 = vpop.f32.mrb[23].mxu0  ;;  %v6865_v56 = vld [vmem:[#allocation9] ss:$8 sps:$4 sm:$0xff]  }
 0x39f   : > { %v2814_v51 = vadd.f32 %v2806_v23, %v2793_v58  ;;  %v6873_v61 = vld [vmem:[#allocation9 + $0x14] ss:$8 sps:$4 sm:$0xff]  }
 0x3a0   : > { %v2815_v62 = vmax.f32 %v2813_v60, 0.0 }
 0x3a1   : > { %v2816_v63 = vmax.f32 %v2814_v51, 0.0  ;;  %v6876_v51 = vld [vmem:[#allocation9 + $0x224] ss:$8 sps:$4 sm:$0xff]  }
 0x3a3   : > { %v2845_v0 = vcombine.low %v2815_v62, %v2816_v63  ;;  %v2927_v1 = vcombine.high %v2815_v62, %v2816_v63 }
 0x3a5   : > { %v2852_v2 = vrot.slane %v2845_v0, %v7723_v53  ;;  %v2934_v3 = vrot.slane %v2927_v1, %v7723_v53  ;;  %v6874_v0 = vld [vmem:[#allocation9 + $0x220] ss:$8 sps:$4 sm:$0xff]   ;;  %v6871_v1 = vld [vmem:[#allocation9 + $0x10] ss:$8 sps:$4 sm:$0xff]  }
 0x3a7   : > { %v2859_v4 = vrot.slane %v2852_v2, %v7723_v53  ;;  %v2876_v5 = vcombine.high %v2852_v2, %v2852_v2  ;;  %v2941_v6 = vrot.slane %v2934_v3, %v7723_v53  ;;  %v2958_v8 = vcombine.high %v2934_v3, %v2934_v3  ;;  %v6882_v2 = vld [vmem:[#allocation9 + $0x234] ss:$8 sps:$4 sm:$0xff]   ;;  %v6879_v3 = vld [vmem:[#allocation9 + $0x24] ss:$8 sps:$4 sm:$0xff]  }
 0x3a9   : > { %2862 = vst.msk [vmem:[#allocation4 + $0x2] ss:$8 sm:$0x3] %vm7655_vm1, %v2859_v4  ;;  %v2883_v10 = vrot.slane %v2876_v5, %v7723_v53  ;;  %v2893_v11 = vcombine.high %v2859_v4, %v2859_v4  ;;  %2944 = vst.msk [vmem:[#allocation4 + $0x12] ss:$8 sm:$0x3] %vm7655_vm1, %v2941_v6  ;;  %v2965_v12 = vrot.slane %v2958_v8, %v7723_v53 }
 0x3aa   : > { %v2975_v13 = vcombine.high %v2941_v6, %v2941_v6  ;;  %v6880_v4 = vld [vmem:[#allocation9 + $0x230] ss:$8 sps:$4 sm:$0xff]   ;;  %v6877_v5 = vld [vmem:[#allocation9 + $0x20] ss:$8 sps:$4 sm:$0xff]   ;;  %v6888_v6 = vld [vmem:[#allocation9 + $0x244] ss:$8 sps:$4 sm:$0xff]  }
 0x3ab   : > { %2886 = vst.msk [vmem:[#allocation4 + $0x4] ss:$8 sm:$0x3] %vm7655_vm1, %v2883_v10  ;;  %2896 = vst.msk [vmem:[#allocation4 + $0x6] ss:$8 sm:$0x3] %vm7655_vm1, %v2893_v11  ;;  %v2903_v14 = vcombine.high %v2883_v10, %v2883_v10  ;;  %v2985_v15 = vcombine.high %v2965_v12, %v2965_v12 }
 0x3ac   : > { %2968 = vst.msk [vmem:[#allocation4 + $0x14] ss:$8 sm:$0x3] %vm7655_vm1, %v2965_v12  ;;  %2978 = vst.msk [vmem:[#allocation4 + $0x16] ss:$8 sm:$0x3] %vm7655_vm1, %v2975_v13 }
 0x3ad   : > { %2906 = vst.msk [vmem:[#allocation4 + $0x10] ss:$8 sm:$0x3] %vm7655_vm1, %v2903_v14  ;;  %2988 = vst.msk [vmem:[#allocation4 + $0x20] ss:$8 sm:$0x3] %vm7655_vm1, %v2985_v15 }
 0x3ae   : > { %v6885_v8 = vld [vmem:[#allocation9 + $0x34] ss:$8 sps:$4 sm:$0xff]   ;;  %v6886_v10 = vld [vmem:[#allocation9 + $0x240] ss:$8 sps:$4 sm:$0xff]   ;;  %v6883_v11 = vld [vmem:[#allocation9 + $0x30] ss:$8 sps:$4 sm:$0xff]  }
 0x3af   : > { %v6894_v12 = vld [vmem:[#allocation9 + $0x254] ss:$8 sps:$4 sm:$0xff]   ;;  %v6891_v13 = vld [vmem:[#allocation9 + $0x44] ss:$8 sps:$4 sm:$0xff]   ;;  %v6892_v14 = vld [vmem:[#allocation9 + $0x250] ss:$8 sps:$4 sm:$0xff]  }
 0x3b0   : > { %v6889_v15 = vld [vmem:[#allocation9 + $0x40] ss:$8 sps:$4 sm:$0xff]  }
 0x3b2   : > { %v3005_v16 = vld [vmem:[#allocation4 + $0x8] sm:$0xfc]  ;;  %v3004_v17 = vld [vmem:[#allocation4] sm:$0xfc] }
 0x3b3   : > { %v2997_v7 = vld [vmem:[#allocation4 + $0x8] sm:$0xfe]  ;;  %v2996_v18 = vld [vmem:[#allocation4] sm:$0xfe] }
 0x3b4   : > { %v2993_v19 = vld [vmem:[#allocation4 + $0x18] sm:$0xff]  ;;  %v3007_v20 = vld [vmem:[#allocation4 + $0x28] sm:$0x3]  ;;  %v8011_v21 = vld [vmem:[#allocation4 + $0x10] sm:$0xff] }
 0x3b5   : > { %v3009_v22 = vpack.c.bf16 %v2993_v19, %v3005_v16  ;;  %v3011_v23 = vpack.c.bf16 %v3007_v20, %v3007_v20  ;;  %v3006_v24 = vld [vmem:[#allocation4 + $0x20] sm:$0x3]  ;;  %v3008_v25 = vpack.c.bf16 %v8011_v21, %v3004_v17  ;;  %v2999_v27 = vld [vmem:[#allocation4 + $0x28] sm:$0x1]  ;;  %v3001_v29 = vpack.c.bf16 %v2993_v19, %v2997_v7  ;;  %v6900_v16 = vld [vmem:[#allocation9 + $0x264] ss:$8 sps:$4 sm:$0xff]  }
 0x3b6   : > { %v2998_v30 = vld [vmem:[#allocation4 + $0x20] sm:$0x1]  ;;  %v3010_v31 = vpack.c.bf16 %v3006_v24, %v3006_v24  ;;  %v3003_v32 = vpack.c.bf16 %v2999_v27, %v2999_v27  ;;  %v3000_v33 = vpack.c.bf16 %v8011_v21, %v2996_v18  ;;  %v2991_v60 = vld [vmem:[#allocation4 + $0x8] sm:$0xff]  ;;  %v6897_v17 = vld [vmem:[#allocation9 + $0x54] ss:$8 sps:$4 sm:$0xff]  }
 0x3b7   : > { %v3002_v34 = vpack.c.bf16 %v2998_v30, %v2998_v30  ;;  %v3584_v35 = vrot.slane %v3009_v22, 1  ;;  %v3585_v36 = vrot.slane %v3011_v23, 1  ;;  %v3581_v37 = vrot.slane %v3008_v25, 1  ;;  %v6898_v7 = vld [vmem:[#allocation9 + $0x260] ss:$8 sps:$4 sm:$0xff]  }
 0x3b8   : > { %v3582_v39 = vrot.slane %v3010_v31, 1  ;;  %v3093_v40 = vshll.u32 %v3001_v29, 16  ;;  %v3098_v41 = vshll.u32 %v3003_v32, 16  ;;  %v3081_v44 = vshll.u32 %v3000_v33, 16  ;;  %v6895_v18 = vld [vmem:[#allocation9 + $0x50] ss:$8 sps:$4 sm:$0xff]  }
 0x3b9   : > { %v3586_v42 = vsel %vm3580_vm2, %v3584_v35, %v3585_v36  ;;  %v3086_v45 = vshll.u32 %v3002_v34, 16  ;;  %v3091_v47 = vshrl.u32 %v3001_v29, 16  ;;  %v3079_v49 = vshrl.u32 %v3000_v33, 16  ;;  %v6903_v20 = vld [vmem:[#allocation9 + $0x64] ss:$8 sps:$4 sm:$0xff]  }
 0x3ba   : > { %3781 = vmatprep.mubr.bf16.mxu1 %v3586_v42  ;;  %v3583_v46 = vsel %vm3580_vm2, %v3581_v37, %v3582_v39  ;;  %v3095_v48 = vrot.slane %v3093_v40, 1  ;;  %v3083_v50 = vrot.slane %v3081_v44, 1  ;;  %v3100_v54 = vrot.slane %v3098_v41, 1  ;;  %v6904_v22 = vld [vmem:[#allocation9 + $0x270] ss:$8 sps:$4 sm:$0xff]  }
 0x3bb   : > { %3782 = vmatmul.mubr.bf16.vlgmr.msra.gmra.mrb[24].mxu1 %v3583_v46  ;;  %v3088_v58 = vrot.slane %v3086_v45, 1  ;;  %v2995_v63 = vpack.c.bf16 %v2993_v19, %v2991_v60  ;;  %v6906_v19 = vld [vmem:[#allocation9 + $0x274] ss:$8 sps:$4 sm:$0xff]   ;;  %v6901_v23 = vld [vmem:[#allocation9 + $0x60] ss:$8 sps:$4 sm:$0xff]  }
 0x3bc   : > { %3953 = vmatpush1.bf16.msra.mxu1 %v6862_v38  ;;  %v3096_v52 = vor.u32 %v3095_v48, %v3091_v47  ;;  %v3084_v57 = vor.u32 %v3083_v50, %v3079_v49  ;;  %v6912_v24 = vld [vmem:[#allocation9 + $0x284] ss:$8 sps:$4 sm:$0xff]   ;;  %v6909_v25 = vld [vmem:[#allocation9 + $0x74] ss:$8 sps:$4 sm:$0xff]   ;;  %v6910_v27 = vld [vmem:[#allocation9 + $0x280] ss:$8 sps:$4 sm:$0xff]  }
 0x3bd   : > { %3954 = vmatprep.subr.bf16.mxu1 %v6870_v43  ;;  %v6907_v29 = vld [vmem:[#allocation9 + $0x70] ss:$8 sps:$4 sm:$0xff]   ;;  %v6918_v30 = vld [vmem:[#allocation9 + $0x294] ss:$8 sps:$4 sm:$0xff]   ;;  %v6915_v31 = vld [vmem:[#allocation9 + $0x84] ss:$8 sps:$4 sm:$0xff]  }
 0x3be   : > { %v3101_v59 = vsel %vm3077_vm3, %v3096_v52, %v3100_v54  ;;  %v8019_v62 = vsel %vm3077_vm3, %v3084_v57, %v3088_v58  ;;  %v6916_v32 = vld [vmem:[#allocation9 + $0x290] ss:$8 sps:$4 sm:$0xff]   ;;  %v6913_v33 = vld [vmem:[#allocation9 + $0x80] ss:$8 sps:$4 sm:$0xff]   ;;  %v6924_v34 = vld [vmem:[#allocation9 + $0x2a4] ss:$8 sps:$4 sm:$0xff]  }
 0x3bf   : > { %3296 = vmatprep.mubr.bf16.mxu0 %v3101_v59  ;;  %3984 = vmatprep.mubr.bf16.mxu1 %v3101_v59  ;;  %v6921_v35 = vld [vmem:[#allocation9 + $0x94] ss:$8 sps:$4 sm:$0xff]   ;;  %v6922_v36 = vld [vmem:[#allocation9 + $0x2a0] ss:$8 sps:$4 sm:$0xff]   ;;  %v6919_v37 = vld [vmem:[#allocation9 + $0x90] ss:$8 sps:$4 sm:$0xff]  }
 0x3c0   : > { %3297 = vmatmul.mubr.bf16.vlgmr.msra.gmra.mrb[24].mxu0 %v8019_v62  ;;  %3955 = vmatpush1.bf16.msra.mxu1 %v6868_v55  ;;  %v6930_v38 = vld [vmem:[#allocation9 + $0x2b4] ss:$8 sps:$4 sm:$0xff]   ;;  %v6927_v39 = vld [vmem:[#allocation9 + $0xa4] ss:$8 sps:$4 sm:$0xff]   ;;  %v6928_v40 = vld [vmem:[#allocation9 + $0x2b0] ss:$8 sps:$4 sm:$0xff]  }
 0x3c1   : > { %3468 = vmatpush1.bf16.msra.mxu0 %v6865_v56  ;;  %3499 = vmatprep.mubr.bf16.mxu0 %v2995_v63  ;;  %v6925_v41 = vld [vmem:[#allocation9 + $0xa0] ss:$8 sps:$4 sm:$0xff]   ;;  %v6936_v42 = vld [vmem:[#allocation9 + $0x2c4] ss:$8 sps:$4 sm:$0xff]   ;;  %v6933_v43 = vld [vmem:[#allocation9 + $0xb4] ss:$8 sps:$4 sm:$0xff]  }
 0x3c2   : > { %3469 = vmatprep.subr.bf16.mxu0 %v6873_v61  ;;  %3956 = vmatprep.subr.bf16.mxu1 %v6876_v51  ;;  %v6934_v44 = vld [vmem:[#allocation9 + $0x2c0] ss:$8 sps:$4 sm:$0xff]   ;;  %v6931_v45 = vld [vmem:[#allocation9 + $0xb0] ss:$8 sps:$4 sm:$0xff]   ;;  %v6942_v46 = vld [vmem:[#allocation9 + $0x2d4] ss:$8 sps:$4 sm:$0xff]  }
 0x3c3   : > { %v6939_v47 = vld [vmem:[#allocation9 + $0xc4] ss:$8 sps:$4 sm:$0xff]   ;;  %v6940_v48 = vld [vmem:[#allocation9 + $0x2d0] ss:$8 sps:$4 sm:$0xff]   ;;  %v6937_v49 = vld [vmem:[#allocation9 + $0xc0] ss:$8 sps:$4 sm:$0xff]  }
 0x3c4   : > { %3957 = vmatpush1.bf16.msra.mxu1 %v6874_v0  ;;  %v6948_v50 = vld [vmem:[#allocation9 + $0x2e4] ss:$8 sps:$4 sm:$0xff]   ;;  %v6945_v52 = vld [vmem:[#allocation9 + $0xd4] ss:$8 sps:$4 sm:$0xff]   ;;  %v6946_v54 = vld [vmem:[#allocation9 + $0x2e0] ss:$8 sps:$4 sm:$0xff]  }
 0x3c5   : > { %3470 = vmatpush1.bf16.msra.mxu0 %v6871_v1  ;;  %3958 = vmatprep.subr.bf16.mxu1 %v6882_v2  ;;  %v6943_v55 = vld [vmem:[#allocation9 + $0xd0] ss:$8 sps:$4 sm:$0xff]   ;;  %v6954_v56 = vld [vmem:[#allocation9 + $0x2f4] ss:$8 sps:$4 sm:$0xff]   ;;  %v6951_v57 = vld [vmem:[#allocation9 + $0xe4] ss:$8 sps:$4 sm:$0xff]  }
 0x3c6   : > { %3471 = vmatprep.subr.bf16.mxu0 %v6879_v3  ;;  %v6952_v58 = vld [vmem:[#allocation9 + $0x2f0] ss:$8 sps:$4 sm:$0xff]   ;;  %v6949_v59 = vld [vmem:[#allocation9 + $0xe0] ss:$8 sps:$4 sm:$0xff]   ;;  %v6960_v60 = vld [vmem:[%s8633_s9 + $0x304] ss:$8 sps:$4 sm:$0xff]  }
 0x3c7   : > { %v6957_v61 = vld [vmem:[#allocation9 + $0xf4] ss:$8 sps:$4 sm:$0xff]   ;;  %v6958_v51 = vld [vmem:[%s8633_s9 + $0x300] ss:$8 sps:$4 sm:$0xff]   ;;  %v6966_v0 = vld [vmem:[%s8633_s9 + $0x314] ss:$8 sps:$4 sm:$0xff]  }
 0x3c8   : > { %3959 = vmatpush1.bf16.msra.mxu1 %v6880_v4  ;;  %v6955_v63 = vld [vmem:[#allocation9 + $0xf0] ss:$8 sps:$4 sm:$0xff]   ;;  %v6963_v1 = vld [vmem:[%s8633_s9 + $0x104] ss:$8 sps:$4 sm:$0xff]   ;;  %v6964_v2 = vld [vmem:[%s8633_s9 + $0x310] ss:$8 sps:$4 sm:$0xff]  }
 0x3c9   : > { %3472 = vmatpush1.bf16.msra.mxu0 %v6877_v5  ;;  %3960 = vmatprep.subr.bf16.mxu1 %v6888_v6  ;;  %v2990_v3 = vld [vmem:[#allocation4] sm:$0xff]  ;;  %v6961_v4 = vld [vmem:[%s8633_s9 + $0x100] ss:$8 sps:$4 sm:$0xff]   ;;  %v6972_v5 = vld [vmem:[%s8633_s9 + $0x324] ss:$8 sps:$4 sm:$0xff]  }
 0x3ca   : > { %3473 = vmatprep.subr.bf16.mxu0 %v6885_v8  ;;  %v2994_v6 = vpack.c.bf16 %v8011_v21, %v2990_v3  ;;  %v6970_v8 = vld [vmem:[%s8633_s9 + $0x320] ss:$8 sps:$4 sm:$0xff]   ;;  %v6978_v21 = vld [vmem:[%s8633_s9 + $0x334] ss:$8 sps:$4 sm:$0xff]   ;;  %v7051_v3 = vld [vmem:[%s8633_s9 + $0x1f0] ss:$8 sps:$4 sm:$0xff]  }
 0x3cc   : > { %3961 = vmatpush1.bf16.msra.mxu1 %v6886_v10  ;;  %v6967_v10 = vld [vmem:[%s8633_s9 + $0x110] ss:$8 sps:$4 sm:$0xff]  }
 0x3cd   : > { %3474 = vmatpush1.bf16.msra.mxu0 %v6883_v11  ;;  %3962 = vmatprep.subr.bf16.mxu1 %v6894_v12  ;;  %v6975_v11 = vld [vmem:[%s8633_s9 + $0x124] ss:$8 sps:$4 sm:$0xff]   ;;  %v6976_v12 = vld [vmem:[%s8633_s9 + $0x330] ss:$8 sps:$4 sm:$0xff]  }
 0x3ce   : > { %3475 = vmatprep.subr.bf16.mxu0 %v6891_v13  ;;  %v6973_v13 = vld [vmem:[%s8633_s9 + $0x120] ss:$8 sps:$4 sm:$0xff]  }
 0x3d0   : > { %3963 = vmatpush1.bf16.msra.mxu1 %v6892_v14  ;;  %v6984_v14 = vld [vmem:[%s8633_s9 + $0x344] ss:$8 sps:$4 sm:$0xff]  }
 0x3d1   : > { %3476 = vmatpush1.bf16.msra.mxu0 %v6889_v15  ;;  %3964 = vmatprep.subr.bf16.mxu1 %v6900_v16  ;;  %v6981_v15 = vld [vmem:[%s8633_s9 + $0x134] ss:$8 sps:$4 sm:$0xff]   ;;  %v6982_v16 = vld [vmem:[%s8633_s9 + $0x340] ss:$8 sps:$4 sm:$0xff]  }
 0x3d2   : > { %3477 = vmatprep.subr.bf16.mxu0 %v6897_v17  ;;  %v6979_v17 = vld [vmem:[%s8633_s9 + $0x130] ss:$8 sps:$4 sm:$0xff]  }
 0x3d4   : > { %3965 = vmatpush1.bf16.msra.mxu1 %v6898_v7  ;;  %v6990_v7 = vld [vmem:[%s8633_s9 + $0x354] ss:$8 sps:$4 sm:$0xff]  }
 0x3d5   : > { %3478 = vmatpush1.bf16.msra.mxu0 %v6895_v18  ;;  %3966 = vmatprep.subr.bf16.mxu1 %v6906_v19  ;;  %v6987_v18 = vld [vmem:[%s8633_s9 + $0x144] ss:$8 sps:$4 sm:$0xff]   ;;  %v6988_v19 = vld [vmem:[%s8633_s9 + $0x350] ss:$8 sps:$4 sm:$0xff]  }
 0x3d6   : > { %3479 = vmatprep.subr.bf16.mxu0 %v6903_v20  ;;  %v6985_v20 = vld [vmem:[%s8633_s9 + $0x140] ss:$8 sps:$4 sm:$0xff]  }
 0x3d8   : > { %3967 = vmatpush1.bf16.msra.mxu1 %v6904_v22  ;;  %v6996_v22 = vld [vmem:[%s8633_s9 + $0x364] ss:$8 sps:$4 sm:$0xff]  }
 0x3d9   : > { %3480 = vmatpush1.bf16.msra.mxu0 %v6901_v23  ;;  %3968 = vmatprep.subr.bf16.mxu1 %v6912_v24  ;;  %v6993_v23 = vld [vmem:[%s8633_s9 + $0x154] ss:$8 sps:$4 sm:$0xff]   ;;  %v6994_v24 = vld [vmem:[%s8633_s9 + $0x360] ss:$8 sps:$4 sm:$0xff]  }
 0x3da   : > { %3481 = vmatprep.subr.bf16.mxu0 %v6909_v25  ;;  %v6991_v25 = vld [vmem:[%s8633_s9 + $0x150] ss:$8 sps:$4 sm:$0xff]  }
 0x3dc   : > { %3969 = vmatpush1.bf16.msra.mxu1 %v6910_v27  ;;  %v7002_v27 = vld [vmem:[%s8633_s9 + $0x374] ss:$8 sps:$4 sm:$0xff]  }
 0x3dd   : > { %3482 = vmatpush1.bf16.msra.mxu0 %v6907_v29  ;;  %3970 = vmatprep.subr.bf16.mxu1 %v6918_v30  ;;  %v6999_v29 = vld [vmem:[%s8633_s9 + $0x164] ss:$8 sps:$4 sm:$0xff]   ;;  %v7000_v30 = vld [vmem:[%s8633_s9 + $0x370] ss:$8 sps:$4 sm:$0xff]  }
 0x3de   : > { %3483 = vmatprep.subr.bf16.mxu0 %v6915_v31  ;;  %v6997_v31 = vld [vmem:[%s8633_s9 + $0x160] ss:$8 sps:$4 sm:$0xff]  }
 0x3e0   : > { %3971 = vmatpush1.bf16.msra.mxu1 %v6916_v32  ;;  %v7005_v32 = vld [vmem:[%s8633_s9 + $0x174] ss:$8 sps:$4 sm:$0xff]  }
 0x3e1   : > { %3484 = vmatpush1.bf16.msra.mxu0 %v6913_v33  ;;  %3972 = vmatprep.subr.bf16.mxu1 %v6924_v34  ;;  %v7003_v33 = vld [vmem:[%s8633_s9 + $0x170] ss:$8 sps:$4 sm:$0xff]   ;;  %v7008_v34 = vld [vmem:[%s8633_s9 + $0x384] ss:$8 sps:$4 sm:$0xff]  }
 0x3e2   : > { %3485 = vmatprep.subr.bf16.mxu0 %v6921_v35  ;;  %v7006_v35 = vld [vmem:[%s8633_s9 + $0x380] ss:$8 sps:$4 sm:$0xff]  }
 0x3e4   : > { %3973 = vmatpush1.bf16.msra.mxu1 %v6922_v36  ;;  %v7011_v36 = vld [vmem:[%s8633_s9 + $0x184] ss:$8 sps:$4 sm:$0xff]  }
 0x3e5   : > { %3486 = vmatpush1.bf16.msra.mxu0 %v6919_v37  ;;  %3974 = vmatprep.subr.bf16.mxu1 %v6930_v38  ;;  %v7009_v37 = vld [vmem:[%s8633_s9 + $0x180] ss:$8 sps:$4 sm:$0xff]   ;;  %v7014_v38 = vld [vmem:[%s8633_s9 + $0x394] ss:$8 sps:$4 sm:$0xff]  }
 0x3e6   : > { %3487 = vmatprep.subr.bf16.mxu0 %v6927_v39  ;;  %v7012_v39 = vld [vmem:[%s8633_s9 + $0x390] ss:$8 sps:$4 sm:$0xff]  }
 0x3e8   : > { %3975 = vmatpush1.bf16.msra.mxu1 %v6928_v40  ;;  %v7017_v40 = vld [vmem:[%s8633_s9 + $0x194] ss:$8 sps:$4 sm:$0xff]  }
 0x3e9   : > { %3488 = vmatpush1.bf16.msra.mxu0 %v6925_v41  ;;  %3976 = vmatprep.subr.bf16.mxu1 %v6936_v42  ;;  %v7015_v41 = vld [vmem:[%s8633_s9 + $0x190] ss:$8 sps:$4 sm:$0xff]   ;;  %v7020_v42 = vld [vmem:[%s8633_s9 + $0x3a4] ss:$8 sps:$4 sm:$0xff]  }
 0x3ea   : > { %3489 = vmatprep.subr.bf16.mxu0 %v6933_v43  ;;  %v7018_v43 = vld [vmem:[%s8633_s9 + $0x3a0] ss:$8 sps:$4 sm:$0xff]  }
 0x3ec   : > { %3977 = vmatpush1.bf16.msra.mxu1 %v6934_v44  ;;  %v7023_v44 = vld [vmem:[%s8633_s9 + $0x1a4] ss:$8 sps:$4 sm:$0xff]  }
 0x3ed   : > { %3490 = vmatpush1.bf16.msra.mxu0 %v6931_v45  ;;  %3978 = vmatprep.subr.bf16.mxu1 %v6942_v46  ;;  %v7021_v45 = vld [vmem:[%s8633_s9 + $0x1a0] ss:$8 sps:$4 sm:$0xff]   ;;  %v7026_v46 = vld [vmem:[%s8633_s9 + $0x3b4] ss:$8 sps:$4 sm:$0xff]  }
 0x3ee   : > { %3491 = vmatprep.subr.bf16.mxu0 %v6939_v47  ;;  %v7024_v47 = vld [vmem:[%s8633_s9 + $0x3b0] ss:$8 sps:$4 sm:$0xff]  }
 0x3f0   : > { %3979 = vmatpush1.bf16.msra.mxu1 %v6940_v48  ;;  %v7029_v48 = vld [vmem:[%s8633_s9 + $0x1b4] ss:$8 sps:$4 sm:$0xff]  }
 0x3f1   : > { %3492 = vmatpush1.bf16.msra.mxu0 %v6937_v49  ;;  %3980 = vmatprep.subr.bf16.mxu1 %v6948_v50  ;;  %v7027_v49 = vld [vmem:[%s8633_s9 + $0x1b0] ss:$8 sps:$4 sm:$0xff]   ;;  %v7032_v50 = vld [vmem:[%s8633_s9 + $0x3c4] ss:$8 sps:$4 sm:$0xff]  }
 0x3f2   : > { %3493 = vmatprep.subr.bf16.mxu0 %v6945_v52  ;;  %v7030_v52 = vld [vmem:[%s8633_s9 + $0x3c0] ss:$8 sps:$4 sm:$0xff]  }
 0x3f4   : > { %3981 = vmatpush1.bf16.msra.mxu1 %v6946_v54  ;;  %v7035_v54 = vld [vmem:[%s8633_s9 + $0x1c4] ss:$8 sps:$4 sm:$0xff]  }
 0x3f5   : > { %3494 = vmatpush1.bf16.msra.mxu0 %v6943_v55  ;;  %3982 = vmatprep.subr.bf16.mxu1 %v6954_v56  ;;  %v7033_v55 = vld [vmem:[%s8633_s9 + $0x1c0] ss:$8 sps:$4 sm:$0xff]   ;;  %v7036_v56 = vld [vmem:[%s8633_s9 + $0x3d0] ss:$8 sps:$4 sm:$0xff]  }
 0x3f6   : > { %3495 = vmatprep.subr.bf16.mxu0 %v6951_v57  ;;  %v7038_v57 = vld [vmem:[%s8633_s9 + $0x3d4] ss:$8 sps:$4 sm:$0xff]  }
 0x3f8   : > { %3983 = vmatpush1.bf16.msra.mxu1 %v6952_v58  ;;  %v7039_v58 = vld [vmem:[%s8633_s9 + $0x1d0] ss:$8 sps:$4 sm:$0xff]  }
 0x3f9   : > { %3496 = vmatpush1.bf16.msra.mxu0 %v6949_v59  ;;  %5173 = vmatprep.subr.bf16.mxu1 %v6960_v60  ;;  %v7041_v59 = vld [vmem:[%s8633_s9 + $0x1d4] ss:$8 sps:$4 sm:$0xff]   ;;  %v7044_v60 = vld [vmem:[%s8633_s9 + $0x3e4] ss:$8 sps:$4 sm:$0xff]  }
 0x3fa   : > { %3497 = vmatprep.subr.bf16.mxu0 %v6957_v61  ;;  %v7047_v61 = vld [vmem:[%s8633_s9 + $0x1e4] ss:$8 sps:$4 sm:$0xff]  }
 0x3fb   : > { %3985 = vmatmul.mubr.bf16.vlgmr.msra.gmra.mrb[24].mxu1 %v8019_v62  ;;  %v6969_v62 = vld [vmem:[%s8633_s9 + $0x114] ss:$8 sps:$4 sm:$0xff]  }
 0x3fc   : > { %5174 = vmatpush1.bf16.msra.mxu1 %v6958_v51  ;;  %v7042_v51 = vld [vmem:[%s8633_s9 + $0x3e0] ss:$8 sps:$4 sm:$0xff]  }
 0x3fd   : > { %3498 = vmatpush1.bf16.msra.mxu0 %v6955_v63  ;;  %5175 = vmatprep.subr.bf16.mxu1 %v6966_v0  ;;  %v7050_v63 = vld [vmem:[%s8633_s9 + $0x3f4] ss:$8 sps:$4 sm:$0xff]   ;;  %v7045_v0 = vld [vmem:[%s8633_s9 + $0x1e0] ss:$8 sps:$4 sm:$0xff]  }
 0x3fe   : > { %4661 = vmatprep.subr.bf16.mxu0 %v6963_v1  ;;  %v7053_v1 = vld [vmem:[%s8633_s9 + $0x1f4] ss:$8 sps:$4 sm:$0xff]  }
 0x400   : > { %3500 = vmatmul.mubr.bf16.vlgmr.msra.gmra.mrb[24].mxu0 %v2994_v6  ;;  %5176 = vmatpush1.bf16.msra.mxu1 %v6964_v2  ;;  %v7048_v2 = vld [vmem:[%s8633_s9 + $0x3f0] ss:$8 sps:$4 sm:$0xff]   ;;  %v3995_v6 = vld [vmem:[%s8632_s8] sm:$0x3] }
 0x401   : > { %4662 = vmatpush1.bf16.msra.mxu0 %v6961_v4  ;;  %5177 = vmatprep.subr.bf16.mxu1 %v6972_v5  ;;  %v7056_v4 = vld [vmem:[%s8633_s9 + $0x204] ss:$8 sps:$4 sm:$0xff]  }
 0x402   : > { %4663 = vmatprep.subr.bf16.mxu0 %v6969_v62  ;;  %v7059_v5 = vld [vmem:[%s8633_s9 + $0x4] ss:$8 sps:$4 sm:$0xff]   ;;  %v4000_v62 = vrot.slane %v3995_v6, %v7717_v26 }
 0x404   : > { %5178 = vmatpush1.bf16.msra.mxu1 %v6970_v8  ;;  %v4004_v8 = vrot.slane %v3995_v6, %v7719_v28 }
 0x405   : > { %4664 = vmatpush1.bf16.msra.mxu0 %v6967_v10  ;;  %5179 = vmatprep.subr.bf16.mxu1 %v6978_v21 }
 0x406   : > { %4665 = vmatprep.subr.bf16.mxu0 %v6975_v11 }
 0x408   : > { %5180 = vmatpush1.bf16.msra.mxu1 %v6976_v12 }
 0x409   : > { %4666 = vmatpush1.bf16.msra.mxu0 %v6973_v13  ;;  %5181 = vmatprep.subr.bf16.mxu1 %v6984_v14 }
 0x40a   : > { %4667 = vmatprep.subr.bf16.mxu0 %v6981_v15 }
 0x40c   : > { %5182 = vmatpush1.bf16.msra.mxu1 %v6982_v16 }
 0x40d   : > { %4668 = vmatpush1.bf16.msra.mxu0 %v6979_v17  ;;  %5183 = vmatprep.subr.bf16.mxu1 %v6990_v7 }
 0x40e   : > { %4669 = vmatprep.subr.bf16.mxu0 %v6987_v18 }
 0x410   : > { %5184 = vmatpush1.bf16.msra.mxu1 %v6988_v19 }
 0x411   : > { %4670 = vmatpush1.bf16.msra.mxu0 %v6985_v20  ;;  %5185 = vmatprep.subr.bf16.mxu1 %v6996_v22 }
 0x412   : > { %4671 = vmatprep.subr.bf16.mxu0 %v6993_v23 }
 0x414   : > { %5186 = vmatpush1.bf16.msra.mxu1 %v6994_v24 }
 0x415   : > { %4672 = vmatpush1.bf16.msra.mxu0 %v6991_v25  ;;  %5187 = vmatprep.subr.bf16.mxu1 %v7002_v27 }
 0x416   : > { %4673 = vmatprep.subr.bf16.mxu0 %v6999_v29 }
 0x418   : > { %5188 = vmatpush1.bf16.msra.mxu1 %v7000_v30 }
 0x419   : > { %4674 = vmatpush1.bf16.msra.mxu0 %v6997_v31  ;;  %5189 = vmatprep.subr.bf16.mxu1 %v7008_v34 }
 0x41a   : > { %4675 = vmatprep.subr.bf16.mxu0 %v7005_v32 }
 0x41c   : > { %5190 = vmatpush1.bf16.msra.mxu1 %v7006_v35 }
 0x41d   : > { %4676 = vmatpush1.bf16.msra.mxu0 %v7003_v33  ;;  %5191 = vmatprep.subr.bf16.mxu1 %v7014_v38 }
 0x41e   : > { %4677 = vmatprep.subr.bf16.mxu0 %v7011_v36 }
 0x420   : > { %5192 = vmatpush1.bf16.msra.mxu1 %v7012_v39 }
 0x421   : > { %4678 = vmatpush1.bf16.msra.mxu0 %v7009_v37  ;;  %5193 = vmatprep.subr.bf16.mxu1 %v7020_v42 }
 0x422   : > { %4679 = vmatprep.subr.bf16.mxu0 %v7017_v40 }
 0x424   : > { %5194 = vmatpush1.bf16.msra.mxu1 %v7018_v43 }
 0x425   : > { %4680 = vmatpush1.bf16.msra.mxu0 %v7015_v41  ;;  %5195 = vmatprep.subr.bf16.mxu1 %v7026_v46 }
 0x426   : > { %4681 = vmatprep.subr.bf16.mxu0 %v7023_v44 }
 0x428   : > { %5196 = vmatpush1.bf16.msra.mxu1 %v7024_v47 }
 0x429   : > { %4682 = vmatpush1.bf16.msra.mxu0 %v7021_v45  ;;  %5197 = vmatprep.subr.bf16.mxu1 %v7032_v50 }
 0x42a   : > { %4683 = vmatprep.subr.bf16.mxu0 %v7029_v48 }
 0x42c   : > { %5198 = vmatpush1.bf16.msra.mxu1 %v7030_v52 }
 0x42d   : > { %4684 = vmatpush1.bf16.msra.mxu0 %v7027_v49  ;;  %5199 = vmatprep.subr.bf16.mxu1 %v7038_v57 }
 0x42e   : > { %4685 = vmatprep.subr.bf16.mxu0 %v7035_v54 }
 0x430   : > { %5200 = vmatpush1.bf16.msra.mxu1 %v7036_v56 }
 0x431   : > { %4686 = vmatpush1.bf16.msra.mxu0 %v7033_v55  ;;  %5201 = vmatprep.subr.bf16.mxu1 %v7044_v60 }
 0x432   : > { %4687 = vmatprep.subr.bf16.mxu0 %v7041_v59 }
 0x434   : > { %5202 = vmatpush1.bf16.msra.mxu1 %v7042_v51 }
 0x435   : > { %4688 = vmatpush1.bf16.msra.mxu0 %v7039_v58  ;;  %5203 = vmatprep.subr.bf16.mxu1 %v7050_v63 }
 0x436   : > { %4689 = vmatprep.subr.bf16.mxu0 %v7047_v61 }
 0x438   : > { %5204 = vmatpush1.bf16.msra.mxu1 %v7048_v2 }
 0x439   : > { %4690 = vmatpush1.bf16.msra.mxu0 %v7045_v0  ;;  %5386 = vmatprep.subr.bf16.mxu1 %v7056_v4 }
 0x43a   : > { %4691 = vmatprep.subr.bf16.mxu0 %v7053_v1 }
 0x43d   : > { %4692 = vmatpush1.bf16.msra.mxu0 %v7051_v3 }
 0x43e   : > { %4874 = vmatprep.subr.bf16.mxu0 %v7059_v5 }
 0x4ce   : > { %v3986_v10 = vpop.f32.mrb[24].mxu1 }
 0x4cf   : > { %v4015_v21 = vadd.f32 %v4000_v62, %v3986_v10  ;;  %v3988_v11 = vpop.f32.mrb[25].mxu1 }
 0x4d0   : > { %v4016_v12 = vadd.f32 %v4004_v8, %v3988_v11  ;;  %v3990_v13 = vpop.f32.mrb[26].mxu1 }
 0x4d1   : > { %v4019_v14 = vmax.f32 %v4015_v21, 0.0  ;;  %v4017_v15 = vadd.f32 %v4000_v62, %v3990_v13  ;;  %v3992_v16 = vpop.f32.mrb[27].mxu1 }
 0x4d2   : > { %v4020_v17 = vmax.f32 %v4016_v12, 0.0  ;;  %v4018_v7 = vadd.f32 %v4004_v8, %v3992_v16 }
 0x4d3   : > { %v4021_v18 = vmax.f32 %v4017_v15, 0.0  ;;  %v3501_v19 = vpop.f32.mrb[24].mxu0 }
 0x4d4   : > { %v4051_v20 = vcombine.low %v4019_v14, %v4020_v17  ;;  %v4133_v22 = vcombine.high %v4019_v14, %v4020_v17  ;;  %v4022_v23 = vmax.f32 %v4018_v7, 0.0  ;;  %v4007_v24 = vadd.f32 %v4000_v62, %v3501_v19  ;;  %v3503_v25 = vpop.f32.mrb[25].mxu0 }
 0x4d5   : > { %v4008_v26 = vadd.f32 %v4004_v8, %v3503_v25  ;;  %v3505_v27 = vpop.f32.mrb[26].mxu0 }
 0x4d6   : > { %v4058_v28 = vrot.slane %v4051_v20, %v7723_v53  ;;  %v4140_v29 = vrot.slane %v4133_v22, %v7723_v53  ;;  %v4219_v30 = vcombine.low %v4021_v18, %v4022_v23  ;;  %v4301_v31 = vcombine.high %v4021_v18, %v4022_v23  ;;  %v3507_v32 = vpop.f32.mrb[27].mxu0 }
 0x4d7   : > { %v4011_v33 = vmax.f32 %v4007_v24, 0.0  ;;  %v4012_v34 = vmax.f32 %v4008_v26, 0.0  ;;  %v4009_v35 = vadd.f32 %v4000_v62, %v3505_v27  ;;  %v4010_v36 = vadd.f32 %v4004_v8, %v3507_v32 }
 0x4d8   : > { %v4065_v37 = vrot.slane %v4058_v28, %v7723_v53  ;;  %v4082_v38 = vcombine.high %v4058_v28, %v4058_v28  ;;  %v4147_v39 = vrot.slane %v4140_v29, %v7723_v53  ;;  %v4164_v40 = vcombine.high %v4140_v29, %v4140_v29 }
 0x4d9   : > { %v4226_v41 = vrot.slane %v4219_v30, %v7723_v53  ;;  %v4308_v42 = vrot.slane %v4301_v31, %v7723_v53  ;;  %v4030_v43 = vcombine.low %v4011_v33, %v4012_v34  ;;  %v4114_v44 = vcombine.high %v4011_v33, %v4012_v34 }
 0x4da   : > { %4068 = vst.msk [vmem:[#allocation5 + $0x2] ss:$8 sm:$0x3] %vm7655_vm1, %v4065_v37  ;;  %v4089_v45 = vrot.slane %v4082_v38, %v7723_v53  ;;  %v4099_v46 = vcombine.high %v4065_v37, %v4065_v37  ;;  %4150 = vst.msk [vmem:[#allocation5 + $0x12] ss:$8 sm:$0x3] %vm7655_vm1, %v4147_v39  ;;  %v4171_v47 = vrot.slane %v4164_v40, %v7723_v53 }
 0x4db   : > { %v4181_v48 = vcombine.high %v4147_v39, %v4147_v39  ;;  %v4233_v49 = vrot.slane %v4226_v41, %v7723_v53  ;;  %v4250_v50 = vcombine.high %v4226_v41, %v4226_v41  ;;  %v4315_v52 = vrot.slane %v4308_v42, %v7723_v53 }
 0x4dc   : > { %v4332_v54 = vcombine.high %v4308_v42, %v4308_v42  ;;  %4092 = vst.msk [vmem:[#allocation5 + $0x4] ss:$8 sm:$0x3] %vm7655_vm1, %v4089_v45  ;;  %4102 = vst.msk [vmem:[#allocation5 + $0x6] ss:$8 sm:$0x3] %vm7655_vm1, %v4099_v46  ;;  %v4109_v55 = vcombine.high %v4089_v45, %v4089_v45  ;;  %v4191_v56 = vcombine.high %v4171_v47, %v4171_v47 }
 0x4dd   : > { %4174 = vst.msk [vmem:[#allocation5 + $0x14] ss:$8 sm:$0x3] %vm7655_vm1, %v4171_v47  ;;  %4184 = vst.msk [vmem:[#allocation5 + $0x16] ss:$8 sm:$0x3] %vm7655_vm1, %v4181_v48  ;;  %v4037_v57 = vrot.slane %v4030_v43, %v7723_v53  ;;  %v4121_v58 = vrot.slane %v4114_v44, %v7723_v53  ;;  %v4257_v59 = vrot.slane %v4250_v50, %v7723_v53 }
 0x4de   : > { %4236 = vst.msk [vmem:[#allocation5 + $0x22] ss:$8 sm:$0x3] %vm7655_vm1, %v4233_v49  ;;  %v4267_v60 = vcombine.high %v4233_v49, %v4233_v49  ;;  %4318 = vst.msk [vmem:[#allocation5 + $0x32] ss:$8 sm:$0x3] %vm7655_vm1, %v4315_v52  ;;  %v4339_v61 = vrot.slane %v4332_v54, %v7723_v53  ;;  %v4349_v51 = vcombine.high %v4315_v52, %v4315_v52 }
 0x4df   : > { %4112 = vst.msk [vmem:[#allocation5 + $0x10] ss:$8 sm:$0x3] %vm7655_vm1, %v4109_v55  ;;  %4194 = vst.msk [vmem:[#allocation5 + $0x20] ss:$8 sm:$0x3] %vm7655_vm1, %v4191_v56  ;;  %v4044_v63 = vrot.slane %v4037_v57, %v7723_v53  ;;  %v4070_v0 = vcombine.high %v4037_v57, %v4037_v57  ;;  %v4128_v1 = vrot.slane %v4121_v58, %v7723_v53 }
 0x4e0   : > { %v4152_v2 = vcombine.high %v4121_v58, %v4121_v58  ;;  %4260 = vst.msk [vmem:[#allocation5 + $0x24] ss:$8 sm:$0x3] %vm7655_vm1, %v4257_v59  ;;  %4270 = vst.msk [vmem:[#allocation5 + $0x26] ss:$8 sm:$0x3] %vm7655_vm1, %v4267_v60  ;;  %v4277_v3 = vcombine.high %v4257_v59, %v4257_v59  ;;  %v4359_v4 = vcombine.high %v4339_v61, %v4339_v61 }
 0x4e1   : > { %4342 = vst.msk [vmem:[#allocation5 + $0x34] ss:$8 sm:$0x3] %vm7655_vm1, %v4339_v61  ;;  %4352 = vst.msk [vmem:[#allocation5 + $0x36] ss:$8 sm:$0x3] %vm7655_vm1, %v4349_v51  ;;  %v4077_v62 = vrot.slane %v4070_v0, %v7723_v53  ;;  %v4094_v8 = vcombine.high %v4044_v63, %v4044_v63  ;;  %v4176_v21 = vcombine.high %v4128_v1, %v4128_v1 }
 0x4e2   : > { %v4013_v5 = vmax.f32 %v4009_v35, 0.0  ;;  %v4014_v6 = vmax.f32 %v4010_v36, 0.0  ;;  %4047 = vst.msk [vmem:[#allocation5 + $0x1] ss:$8 sm:$0x3] %vm7655_vm1, %v4044_v63  ;;  %v4159_v10 = vrot.slane %v4152_v2, %v7723_v53 }
 0x4e3   : > { %4131 = vst.msk [vmem:[#allocation5 + $0x11] ss:$8 sm:$0x3] %vm7655_vm1, %v4128_v1  ;;  %4280 = vst.msk [vmem:[#allocation5 + $0x30] ss:$8 sm:$0x3] %vm7655_vm1, %v4277_v3  ;;  %v4104_v13 = vcombine.high %v4077_v62, %v4077_v62 }
 0x4e4   : > { %4362 = vst.msk [vmem:[#allocation5 + $0x40] ss:$8 sm:$0x3] %vm7655_vm1, %v4359_v4  ;;  %v4198_v11 = vcombine.low %v4013_v5, %v4014_v6  ;;  %v4282_v12 = vcombine.high %v4013_v5, %v4014_v6  ;;  %4080 = vst.msk [vmem:[#allocation5 + $0x3] ss:$8 sm:$0x3] %vm7655_vm1, %v4077_v62  ;;  %v4186_v14 = vcombine.high %v4159_v10, %v4159_v10 }
 0x4e5   : > { %4097 = vst.msk [vmem:[#allocation5 + $0x5] ss:$8 sm:$0x3] %vm7655_vm1, %v4094_v8  ;;  %4162 = vst.msk [vmem:[#allocation5 + $0x13] ss:$8 sm:$0x3] %vm7655_vm1, %v4159_v10 }
 0x4e6   : > { %4179 = vst.msk [vmem:[#allocation5 + $0x15] ss:$8 sm:$0x3] %vm7655_vm1, %v4176_v21  ;;  %v4205_v15 = vrot.slane %v4198_v11, %v7723_v53  ;;  %v4289_v16 = vrot.slane %v4282_v12, %v7723_v53  ;;  %4107 = vst.msk [vmem:[#allocation5 + $0x7] ss:$8 sm:$0x3] %vm7655_vm1, %v4104_v13 }
 0x4e7   : > { %4189 = vst.msk [vmem:[#allocation5 + $0x17] ss:$8 sm:$0x3] %vm7655_vm1, %v4186_v14  ;;  %v7054_v59 = vld [vmem:[%s8633_s9 + $0x200] ss:$8 sps:$4 sm:$0xff]  }
 0x4e8   : > { %v4212_v17 = vrot.slane %v4205_v15, %v7723_v53  ;;  %v4238_v7 = vcombine.high %v4205_v15, %v4205_v15  ;;  %v4296_v18 = vrot.slane %v4289_v16, %v7723_v53  ;;  %v4320_v19 = vcombine.high %v4289_v16, %v4289_v16  ;;  %v7057_v5 = vld [vmem:[%s8633_s9] ss:$8 sps:$4 sm:$0xff]   ;;  %v7062_v12 = vld [vmem:[%s8633_s9 + $0x214] ss:$8 sps:$4 sm:$0xff]   ;;  %v7060_v16 = vld [vmem:[%s8633_s9 + $0x210] ss:$8 sps:$4 sm:$0xff]  }
 0x4e9   : > { %v7065_v13 = vld [vmem:[%s8633_s9 + $0x14] ss:$8 sps:$4 sm:$0xff]  }
 0x4ea   : > { %4215 = vst.msk [vmem:[#allocation5 + $0x21] ss:$8 sm:$0x3] %vm7655_vm1, %v4212_v17  ;;  %v4245_v20 = vrot.slane %v4238_v7, %v7723_v53  ;;  %v4262_v22 = vcombine.high %v4212_v17, %v4212_v17  ;;  %4299 = vst.msk [vmem:[#allocation5 + $0x31] ss:$8 sm:$0x3] %vm7655_vm1, %v4296_v18  ;;  %v4327_v23 = vrot.slane %v4320_v19, %v7723_v53 }
 0x4eb   : > { %v4344_v24 = vcombine.high %v4296_v18, %v4296_v18  ;;  %v4379_v32 = vld [vmem:[#allocation5 + $0x48] sm:$0x1]  ;;  %v4378_v58 = vld [vmem:[#allocation5 + $0x40] sm:$0x1]  ;;  %v7068_v18 = vld [vmem:[%s8633_s9 + $0x224] ss:$8 sps:$4 sm:$0xff]  }
 0x4ec   : > { %4248 = vst.msk [vmem:[#allocation5 + $0x23] ss:$8 sm:$0x3] %vm7655_vm1, %v4245_v20  ;;  %4265 = vst.msk [vmem:[#allocation5 + $0x25] ss:$8 sm:$0x3] %vm7655_vm1, %v4262_v22  ;;  %v4272_v25 = vcombine.high %v4245_v20, %v4245_v20  ;;  %v4354_v26 = vcombine.high %v4327_v23, %v4327_v23  ;;  %v4383_v37 = vpack.c.bf16 %v4379_v32, %v4379_v32 }
 0x4ed   : > { %4330 = vst.msk [vmem:[#allocation5 + $0x33] ss:$8 sm:$0x3] %vm7655_vm1, %v4327_v23  ;;  %4347 = vst.msk [vmem:[#allocation5 + $0x35] ss:$8 sm:$0x3] %vm7655_vm1, %v4344_v24  ;;  %v4382_v8 = vpack.c.bf16 %v4378_v58, %v4378_v58 }
 0x4ee   : > { %4275 = vst.msk [vmem:[#allocation5 + $0x27] ss:$8 sm:$0x3] %vm7655_vm1, %v4272_v25  ;;  %4357 = vst.msk [vmem:[#allocation5 + $0x37] ss:$8 sm:$0x3] %vm7655_vm1, %v4354_v26 }
 0x4ef   : > { %v8315_v53 = vld [vmem:[#allocation5 + $0x18] sm:$0xff]  ;;  %v8317_v27 = vld [vmem:[#allocation5 + $0x10] sm:$0xff]  ;;  %v4377_v28 = vld [vmem:[#allocation5 + $0x8] sm:$0xfe]  ;;  %v4493_v52 = vshll.u32 %v4383_v37, 16  ;;  %v4485_v22 = vshll.u32 %v4382_v8, 16 }
 0x4f0   : > { %v4376_v29 = vld [vmem:[#allocation5] sm:$0xfe]  ;;  %v4381_v30 = vpack.c.bf16 %v8315_v53, %v4377_v28  ;;  %v4385_v33 = vld [vmem:[#allocation5 + $0x8] sm:$0xfc]  ;;  %v4387_v39 = vld [vmem:[#allocation5 + $0x48] sm:$0x3] }
 0x4f1   : > { %v4380_v31 = vpack.c.bf16 %v8317_v27, %v4376_v29  ;;  %v4384_v34 = vld [vmem:[#allocation5] sm:$0xfc]  ;;  %v4389_v38 = vpack.c.bf16 %v8315_v53, %v4385_v33  ;;  %v4391_v49 = vpack.c.bf16 %v4387_v39, %v4387_v39  ;;  %v4386_v3 = vld [vmem:[#allocation5 + $0x40] sm:$0x3]  ;;  %v4495_v11 = vrot.slane %v4493_v52, 1  ;;  %v4365_v28 = vld [vmem:[#allocation5 + $0x8] sm:$0xff] }
 0x4f2   : > { %v4472_v35 = vshll.u32 %v4381_v30, 16  ;;  %v4388_v43 = vpack.c.bf16 %v8317_v27, %v4384_v34  ;;  %v4470_v47 = vshrl.u32 %v4381_v30, 16  ;;  %v4390_v17 = vpack.c.bf16 %v4386_v3, %v4386_v3  ;;  %v7063_v19 = vld [vmem:[%s8633_s9 + $0x10] ss:$8 sps:$4 sm:$0xff]   ;;  %v7071_v23 = vld [vmem:[%s8633_s9 + $0x24] ss:$8 sps:$4 sm:$0xff]  }
 0x4f3   : > { %v4460_v36 = vshll.u32 %v4380_v31, 16  ;;  %v4458_v50 = vshrl.u32 %v4380_v31, 16  ;;  %v5002_v54 = vrot.slane %v4389_v38, 1  ;;  %v5007_v6 = vrot.slane %v4391_v49, 1  ;;  %v7066_v24 = vld [vmem:[%s8633_s9 + $0x220] ss:$8 sps:$4 sm:$0xff]  }
 0x4f4   : > { %v4474_v9 = vrot.slane %v4472_v35, 1  ;;  %v4999_v60 = vrot.slane %v4388_v43, 1  ;;  %v5005_v25 = vrot.slane %v4390_v17, 1  ;;  %v7074_v29 = vld [vmem:[%s8633_s9 + $0x234] ss:$8 sps:$4 sm:$0xff]   ;;  %v4487_v32 = vrot.slane %v4485_v22, 1 }
 0x4f5   : > { %v4369_v40 = vld [vmem:[#allocation5 + $0x28] sm:$0xff]  ;;  %v4371_v41 = vld [vmem:[#allocation5 + $0x38] sm:$0xff]  ;;  %v4368_v42 = vld [vmem:[#allocation5 + $0x20] sm:$0xff]  ;;  %v4462_v44 = vrot.slane %v4460_v36, 1  ;;  %v4373_v35 = vpack.c.bf16 %v8315_v53, %v4365_v28 }
 0x4f6   : > { %v8323_v45 = vpack.c.bf16 %v4371_v41, %v4369_v40  ;;  %v4370_v46 = vld [vmem:[#allocation5 + $0x30] sm:$0xff]  ;;  %v4475_v56 = vor.u32 %v4474_v9, %v4470_v47  ;;  %v7069_v31 = vld [vmem:[%s8633_s9 + $0x20] ss:$8 sps:$4 sm:$0xff]   ;;  %v7080_v37 = vld [vmem:[%s8633_s9 + $0x244] ss:$8 sps:$4 sm:$0xff]  }
 0x4f7   : > { %v8325_v48 = vpack.c.bf16 %v4370_v46, %v4368_v42  ;;  %v4463_v51 = vor.u32 %v4462_v44, %v4458_v50  ;;  %v7077_v33 = vld [vmem:[%s8633_s9 + $0x34] ss:$8 sps:$4 sm:$0xff]   ;;  %v7072_v36 = vld [vmem:[%s8633_s9 + $0x230] ss:$8 sps:$4 sm:$0xff]   ;;  %v7083_v53 = vld [vmem:[%s8633_s9 + $0x44] ss:$8 sps:$4 sm:$0xff]  }
 0x4f8   : > { %v5003_v55 = vrot.slane %v8323_v45, 1  ;;  %v4477_v57 = vshll.u32 %v8323_v45, 16  ;;  %v4489_v2 = vshrl.u32 %v8323_v45, 16  ;;  %v7075_v38 = vld [vmem:[%s8633_s9 + $0x30] ss:$8 sps:$4 sm:$0xff]  }
 0x4f9   : > { %v5000_v61 = vrot.slane %v8325_v48, 1  ;;  %v4465_v63 = vshll.u32 %v8325_v48, 16  ;;  %v4481_v20 = vshrl.u32 %v8325_v48, 16  ;;  %v7078_v9 = vld [vmem:[%s8633_s9 + $0x240] ss:$8 sps:$4 sm:$0xff]  }
 0x4fa   : > { %v5004_v0 = vsel %vm3580_vm2, %v5002_v54, %v5003_v55  ;;  %v4479_v1 = vrot.slane %v4477_v57, 1  ;;  %v5008_v14 = vsel %vm3580_vm2, %v5003_v55, %v5007_v6  ;;  %v7086_v39 = vld [vmem:[%s8633_s9 + $0x254] ss:$8 sps:$4 sm:$0xff]   ;;  %v7081_v40 = vld [vmem:[%s8633_s9 + $0x40] ss:$8 sps:$4 sm:$0xff]  }
 0x4fb   : > { %5205 = vmatprep.mubr.bf16.mxu1 %v5004_v0  ;;  %v5001_v4 = vsel %vm3580_vm2, %v4999_v60, %v5000_v61  ;;  %v4467_v62 = vrot.slane %v4465_v63, 1  ;;  %v5006_v30 = vsel %vm3580_vm2, %v5000_v61, %v5005_v25  ;;  %v7089_v41 = vld [vmem:[%s8633_s9 + $0x54] ss:$8 sps:$4 sm:$0xff]   ;;  %v7084_v42 = vld [vmem:[%s8633_s9 + $0x250] ss:$8 sps:$4 sm:$0xff]  }
 0x4fc   : > { %5206 = vmatmul.mubr.bf16.vlgmr.msra.gmra.mrb[28].mxu1 %v5001_v4  ;;  %v4480_v10 = vsel %vm3077_vm3, %v4475_v56, %v4479_v1  ;;  %v4491_v21 = vor.u32 %v4489_v2, %v4479_v1  ;;  %v7092_v43 = vld [vmem:[%s8633_s9 + $0x264] ss:$8 sps:$4 sm:$0xff]   ;;  %v7087_v44 = vld [vmem:[%s8633_s9 + $0x50] ss:$8 sps:$4 sm:$0xff]   ;;  %v7090_v47 = vld [vmem:[%s8633_s9 + $0x260] ss:$8 sps:$4 sm:$0xff]  }
 0x4fd   : > { %5387 = vmatpush1.bf16.msra.mxu1 %v7054_v59  ;;  %4693 = vmatprep.mubr.bf16.mxu0 %v4480_v10  ;;  %v8349_v15 = vsel %vm3077_vm3, %v4463_v51, %v4467_v62  ;;  %v4483_v26 = vor.u32 %v4481_v20, %v4467_v62  ;;  %v7095_v46 = vld [vmem:[%s8633_s9 + $0x64] ss:$8 sps:$4 sm:$0xff]   ;;  %v7098_v49 = vld [vmem:[%s8633_s9 + $0x274] ss:$8 sps:$4 sm:$0xff]   ;;  %v7093_v50 = vld [vmem:[%s8633_s9 + $0x60] ss:$8 sps:$4 sm:$0xff]  }
 0x4fe   : > { %5215 = vmatprep.mubr.bf16.mxu1 %v5008_v14  ;;  %4694 = vmatmul.mubr.bf16.vlgmr.msra.gmra.mrb[28].mxu0 %v8349_v15  ;;  %v8356_v7 = vsel %vm3077_vm3, %v4491_v21, %v4495_v11  ;;  %v7101_v52 = vld [vmem:[%s8633_s9 + $0x74] ss:$8 sps:$4 sm:$0xff]   ;;  %v7096_v54 = vld [vmem:[%s8633_s9 + $0x270] ss:$8 sps:$4 sm:$0xff]   ;;  %v7104_v55 = vld [vmem:[%s8633_s9 + $0x284] ss:$8 sps:$4 sm:$0xff]  }
 0x4ff   : > { %4875 = vmatpush1.bf16.msra.mxu0 %v7057_v5  ;;  %4703 = vmatprep.mubr.bf16.mxu0 %v8356_v7  ;;  %v8383_v34 = vsel %vm3077_vm3, %v4483_v26, %v4487_v32  ;;  %v7099_v56 = vld [vmem:[%s8633_s9 + $0x70] ss:$8 sps:$4 sm:$0xff]   ;;  %v7107_v57 = vld [vmem:[%s8633_s9 + $0x84] ss:$8 sps:$4 sm:$0xff]   ;;  %v7102_v58 = vld [vmem:[%s8633_s9 + $0x280] ss:$8 sps:$4 sm:$0xff]  }
 0x500   : > { %5388 = vmatprep.subr.bf16.mxu1 %v7062_v12  ;;  %4876 = vmatprep.subr.bf16.mxu0 %v7065_v13  ;;  %v7110_v59 = vld [vmem:[%s8633_s9 + $0x294] ss:$8 sps:$4 sm:$0xff]   ;;  %v7105_v60 = vld [vmem:[%s8633_s9 + $0x80] ss:$8 sps:$4 sm:$0xff]   ;;  %v7108_v51 = vld [vmem:[%s8633_s9 + $0x290] ss:$8 sps:$4 sm:$0xff]  }
 0x501   : > { %5389 = vmatpush1.bf16.msra.mxu1 %v7060_v16  ;;  %v7113_v61 = vld [vmem:[%s8633_s9 + $0x94] ss:$8 sps:$4 sm:$0xff]   ;;  %v7116_v63 = vld [vmem:[%s8633_s9 + $0x2a4] ss:$8 sps:$4 sm:$0xff]   ;;  %v7111_v0 = vld [vmem:[%s8633_s9 + $0x90] ss:$8 sps:$4 sm:$0xff]  }
 0x502   : > { %5390 = vmatprep.subr.bf16.mxu1 %v7068_v18  ;;  %v7119_v1 = vld [vmem:[%s8633_s9 + $0xa4] ss:$8 sps:$4 sm:$0xff]   ;;  %v7114_v2 = vld [vmem:[%s8633_s9 + $0x2a0] ss:$8 sps:$4 sm:$0xff]   ;;  %v7122_v3 = vld [vmem:[%s8633_s9 + $0x2b4] ss:$8 sps:$4 sm:$0xff]  }
 0x503   : > { %4877 = vmatpush1.bf16.msra.mxu0 %v7063_v19  ;;  %v7117_v4 = vld [vmem:[%s8633_s9 + $0xa0] ss:$8 sps:$4 sm:$0xff]   ;;  %v7125_v5 = vld [vmem:[%s8633_s9 + $0xb4] ss:$8 sps:$4 sm:$0xff]   ;;  %v7120_v6 = vld [vmem:[%s8633_s9 + $0x2b0] ss:$8 sps:$4 sm:$0xff]  }
 0x504   : > { %5216 = vmatmul.mubr.bf16.gmra.mrb[32].mxu1 %v5006_v30  ;;  %4878 = vmatprep.subr.bf16.mxu0 %v7071_v23  ;;  %v7128_v62 = vld [vmem:[%s8633_s9 + $0x2c4] ss:$8 sps:$4 sm:$0xff]   ;;  %v7123_v8 = vld [vmem:[%s8633_s9 + $0xb0] ss:$8 sps:$4 sm:$0xff]   ;;  %v7126_v21 = vld [vmem:[%s8633_s9 + $0x2c0] ss:$8 sps:$4 sm:$0xff]  }
 0x505   : > { %5391 = vmatpush1.bf16.msra.mxu1 %v7066_v24  ;;  %5418 = vmatprep.mubr.bf16.mxu1 %v4480_v10  ;;  %v7131_v10 = vld [vmem:[%s8633_s9 + $0xc4] ss:$8 sps:$4 sm:$0xff]   ;;  %v7134_v11 = vld [vmem:[%s8633_s9 + $0x2d4] ss:$8 sps:$4 sm:$0xff]   ;;  %v7129_v12 = vld [vmem:[%s8633_s9 + $0xc0] ss:$8 sps:$4 sm:$0xff]  }
 0x506   : > { %4704 = vmatmul.mubr.bf16.gmra.mrb[32].mxu0 %v8383_v34  ;;  %5392 = vmatprep.subr.bf16.mxu1 %v7074_v29  ;;  %v7137_v13 = vld [vmem:[%s8633_s9 + $0xd4] ss:$8 sps:$4 sm:$0xff]   ;;  %v7132_v14 = vld [vmem:[%s8633_s9 + $0x2d0] ss:$8 sps:$4 sm:$0xff]   ;;  %v7140_v16 = vld [vmem:[%s8633_s9 + $0x2e4] ss:$8 sps:$4 sm:$0xff]  }
 0x507   : > { %4879 = vmatpush1.bf16.msra.mxu0 %v7069_v31  ;;  %4906 = vmatprep.mubr.bf16.mxu0 %v4373_v35  ;;  %v7135_v17 = vld [vmem:[%s8633_s9 + $0xd0] ss:$8 sps:$4 sm:$0xff]   ;;  %v7143_v18 = vld [vmem:[%s8633_s9 + $0xe4] ss:$8 sps:$4 sm:$0xff]   ;;  %v7138_v19 = vld [vmem:[%s8633_s9 + $0x2e0] ss:$8 sps:$4 sm:$0xff]  }
 0x508   : > { %4880 = vmatprep.subr.bf16.mxu0 %v7077_v33  ;;  %v7146_v20 = vld [vmem:[%s8633_s9 + $0x2f4] ss:$8 sps:$4 sm:$0xff]   ;;  %v7141_v22 = vld [vmem:[%s8633_s9 + $0xe0] ss:$8 sps:$4 sm:$0xff]   ;;  %v7144_v24 = vld [vmem:[%s8633_s9 + $0x2f0] ss:$8 sps:$4 sm:$0xff]  }
 0x509   : > { %5393 = vmatpush1.bf16.msra.mxu1 %v7072_v36  ;;  %v7149_v23 = vld [vmem:[%s8633_s9 + $0xf4] ss:$8 sps:$4 sm:$0xff]   ;;  %v7147_v25 = vld [vmem:[%s8633_s9 + $0xf0] ss:$8 sps:$4 sm:$0xff]   ;;  %v4364_v26 = vld [vmem:[#allocation5] sm:$0xff] }
 0x50a   : > { %5394 = vmatprep.subr.bf16.mxu1 %v7080_v37  ;;  %v4372_v28 = vpack.c.bf16 %v8317_v27, %v4364_v26 }
 0x50b   : > { %4881 = vmatpush1.bf16.msra.mxu0 %v7075_v38 }
 0x50c   : > { %4882 = vmatprep.subr.bf16.mxu0 %v7083_v53 }
 0x50d   : > { %5395 = vmatpush1.bf16.msra.mxu1 %v7078_v9 }
 0x50e   : > { %5396 = vmatprep.subr.bf16.mxu1 %v7086_v39 }
 0x50f   : > { %4883 = vmatpush1.bf16.msra.mxu0 %v7081_v40 }
 0x510   : > { %4884 = vmatprep.subr.bf16.mxu0 %v7089_v41 }
 0x511   : > { %5397 = vmatpush1.bf16.msra.mxu1 %v7084_v42 }
 0x512   : > { %5398 = vmatprep.subr.bf16.mxu1 %v7092_v43 }
 0x513   : > { %4885 = vmatpush1.bf16.msra.mxu0 %v7087_v44 }
 0x514   : > { %4886 = vmatprep.subr.bf16.mxu0 %v7095_v46 }
 0x515   : > { %5399 = vmatpush1.bf16.msra.mxu1 %v7090_v47 }
 0x516   : > { %5400 = vmatprep.subr.bf16.mxu1 %v7098_v49 }
 0x517   : > { %4887 = vmatpush1.bf16.msra.mxu0 %v7093_v50 }
 0x518   : > { %4888 = vmatprep.subr.bf16.mxu0 %v7101_v52 }
 0x519   : > { %5401 = vmatpush1.bf16.msra.mxu1 %v7096_v54 }
 0x51a   : > { %5402 = vmatprep.subr.bf16.mxu1 %v7104_v55 }
 0x51b   : > { %4889 = vmatpush1.bf16.msra.mxu0 %v7099_v56 }
 0x51c   : > { %4890 = vmatprep.subr.bf16.mxu0 %v7107_v57 }
 0x51d   : > { %5403 = vmatpush1.bf16.msra.mxu1 %v7102_v58 }
 0x51e   : > { %5404 = vmatprep.subr.bf16.mxu1 %v7110_v59 }
 0x51f   : > { %4891 = vmatpush1.bf16.msra.mxu0 %v7105_v60 }
 0x520   : > { %4892 = vmatprep.subr.bf16.mxu0 %v7113_v61 }
 0x521   : > { %5405 = vmatpush1.bf16.msra.mxu1 %v7108_v51 }
 0x522   : > { %5406 = vmatprep.subr.bf16.mxu1 %v7116_v63 }
 0x523   : > { %4893 = vmatpush1.bf16.msra.mxu0 %v7111_v0 }
 0x524   : > { %4894 = vmatprep.subr.bf16.mxu0 %v7119_v1 }
 0x525   : > { %5407 = vmatpush1.bf16.msra.mxu1 %v7114_v2 }
 0x526   : > { %5408 = vmatprep.subr.bf16.mxu1 %v7122_v3 }
 0x527   : > { %4895 = vmatpush1.bf16.msra.mxu0 %v7117_v4 }
 0x528   : > { %4896 = vmatprep.subr.bf16.mxu0 %v7125_v5 }
 0x529   : > { %5409 = vmatpush1.bf16.msra.mxu1 %v7120_v6 }
 0x52a   : > { %5410 = vmatprep.subr.bf16.mxu1 %v7128_v62 }
 0x52b   : > { %4897 = vmatpush1.bf16.msra.mxu0 %v7123_v8 }
 0x52c   : > { %4898 = vmatprep.subr.bf16.mxu0 %v7131_v10 }
 0x52d   : > { %5411 = vmatpush1.bf16.msra.mxu1 %v7126_v21 }
 0x52e   : > { %5412 = vmatprep.subr.bf16.mxu1 %v7134_v11 }
 0x52f   : > { %4899 = vmatpush1.bf16.msra.mxu0 %v7129_v12 }
 0x530   : > { %4900 = vmatprep.subr.bf16.mxu0 %v7137_v13 }
 0x531   : > { %5413 = vmatpush1.bf16.msra.mxu1 %v7132_v14 }
 0x532   : > { %5414 = vmatprep.subr.bf16.mxu1 %v7140_v16 }
 0x533   : > { %4901 = vmatpush1.bf16.msra.mxu0 %v7135_v17 }
 0x534   : > { %4902 = vmatprep.subr.bf16.mxu0 %v7143_v18 }
 0x535   : > { %5415 = vmatpush1.bf16.msra.mxu1 %v7138_v19 }
 0x536   : > { %5416 = vmatprep.subr.bf16.mxu1 %v7146_v20 }
 0x537   : > { %4903 = vmatpush1.bf16.msra.mxu0 %v7141_v22 }
 0x538   : > { %4904 = vmatprep.subr.bf16.mxu0 %v7149_v23 }
 0x539   : > { %5417 = vmatpush1.bf16.msra.mxu1 %v7144_v24 }
 0x53b   : > { %4905 = vmatpush1.bf16.msra.mxu0 %v7147_v25 }
 0x53c   : > { %5419 = vmatmul.mubr.bf16.vlgmr.msra.gmra.mrb[28].mxu1 %v8349_v15 }
 0x53d   : > { %5428 = vmatprep.mubr.bf16.mxu1 %v8356_v7 }
 0x53e   : > { %4907 = vmatmul.mubr.bf16.vlgmr.msra.gmra.mrb[28].mxu0 %v4372_v28 }
 0x53f   : > { %4916 = vmatprep.mubr.bf16.mxu0 %v8323_v45 }
 0x544   : > { %5429 = vmatmul.mubr.bf16.gmra.mrb[32].mxu1 %v8383_v34 }
 0x546   : > { %4917 = vmatmul.mubr.bf16.gmra.mrb[32].mxu0 %v8325_v48 }
 0x60f   : > { %v5420_v29 = vpop.f32.mrb[28].mxu1 }
 0x610   : > { %6277 = vst [vmem:[%s8546_s28 + $0x40] sm:$0xff] %v5420_v29  ;;  %v5422_v27 = vpop.f32.mrb[29].mxu1 }
 0x611   : > { %6278 = vst.msk [vmem:[%s8546_s28 + $0x48] sm:$0xff] %vm5440_vm4, %v5422_v27  ;;  %v4908_v45 = vpop.f32.mrb[28].mxu0  ;;  %v5424_v48 = vpop.f32.mrb[30].mxu1 }
 0x612   : > { %5439 = vst [vmem:[%s8546_s28] sm:$0xff] %v4908_v45  ;;  %6279 = vst [vmem:[%s8546_s28 + $0x50] sm:$0xff] %v5424_v48  ;;  %v4910_v15 = vpop.f32.mrb[29].mxu0  ;;  %v5426_v7 = vpop.f32.mrb[31].mxu1 }
 0x613   : > { %5441 = vst.msk [vmem:[%s8546_s28 + $0x8] sm:$0xff] %vm5440_vm4, %v4910_v15  ;;  %6280 = vst.msk [vmem:[%s8546_s28 + $0x58] sm:$0xff] %vm5440_vm4, %v5426_v7  ;;  %v4912_v30 = vpop.f32.mrb[30].mxu0 }
 0x614   : > { %5442 = vst [vmem:[%s8546_s28 + $0x10] sm:$0xff] %v4912_v30  ;;  %v4914_v31 = vpop.f32.mrb[31].mxu0 }
 0x615   : > { %5443 = vst.msk [vmem:[%s8546_s28 + $0x18] sm:$0xff] %vm5440_vm4, %v4914_v31 }
 0x617   : > { %v5430_v32 = vpop.f32.mrb[32].mxu1 }
 0x618   : > { %6281 = vst [vmem:[%s8546_s28 + $0x60] sm:$0xff] %v5430_v32  ;;  %v5432_v33 = vpop.f32.mrb[33].mxu1 }
 0x619   : > { %6282 = vst.msk [vmem:[%s8546_s28 + $0x68] sm:$0xff] %vm5440_vm4, %v5432_v33  ;;  %v4918_v34 = vpop.f32.mrb[32].mxu0  ;;  %v5434_v35 = vpop.f32.mrb[34].mxu1 }
 0x61a   : > { %5444 = vst [vmem:[%s8546_s28 + $0x20] sm:$0xff] %v4918_v34  ;;  %6283 = vst [vmem:[%s8546_s28 + $0x70] sm:$0xff] %v5434_v35  ;;  %v4920_v36 = vpop.f32.mrb[33].mxu0  ;;  %v5436_v37 = vpop.f32.mrb[35].mxu1 }
 0x61b   : > { %5445 = vst.msk [vmem:[%s8546_s28 + $0x28] sm:$0xff] %vm5440_vm4, %v4920_v36  ;;  %6284 = vst.msk [vmem:[%s8546_s28 + $0x78] sm:$0xff] %vm5440_vm4, %v5436_v37  ;;  %v4922_v38 = vpop.f32.mrb[34].mxu0 }
 0x61c   : > { %5446 = vst [vmem:[%s8546_s28 + $0x30] sm:$0xff] %v4922_v38  ;;  %v4924_v53 = vpop.f32.mrb[35].mxu0 }
 0x61d   : > { %5447 = vst.msk [vmem:[%s8546_s28 + $0x38] sm:$0xff] %vm5440_vm4, %v4924_v53 }
 0x61e   : > { %7219 = shalt.err (!%p7216_p11)
}
 0x61f   : > { %s7220_s27 = scalar_lea.hbm %s8570_s18, 2048  ;;  %s7224_s24 = scalar_lea.hbm %s8634_s10, 4096 }
 0x620   : > { %p7221_p13 = scmp.ne.s32.totalorder %s8570_s18, %s7220_s27  ;;  %p7225_p6 = scmp.lt.u32.totalorder %s8570_s18, %s8634_s10 }
 0x621   : > { %p7226_p9 = scmp.lt.u32.totalorder %s7224_s24, %s7220_s27  ;;  %p7228_p12 = scmp.lt.u32.totalorder %s7220_s27, %s8570_s18 }
 0x622   : > { %p7222_p5 = pnand %p7221_p13, %p8657_p1 }
 0x623   : > { %p7227_p10 = por %p7226_p9, %p7225_p6 }
 0x624   : > { %p7223_p0 = pneg %p7222_p5 }
 0x625   : > { %p7229_p2 = por %p7228_p12, %p7227_p10 }
 0x627   : > { %p7230_p3 = pnand %p7229_p2, %p7223_p0 }
 0x629   : > { %7233 = shalt.err (!%p7230_p3)
}
 0x62a   : > { %s7286_s11 = smov 256   ;;  %s7287_s30 = smov 16  }
 0x62b   : > { %6323 = dma.vmem_to_hbm [thread:$0]  (%p8657_p1), %s8572_s12, 2048, %s8570_s18, %s8583_s17, %s7286_s11, %s7286_s11, %s7287_s30  }
 0x62c PF: > { %s8658_s22 = sld [smem:[#allocation18_spill]]  ;;  %p6340_p4 = scmp.ge.s32.totalorder %s7276_s16, 2 }
 0x62d   : > { %s5486_s20 = sand.u32 1, %s7264_s13  }
 0x62e   : > { %s5487_s21 = scalar_lea.sflag [#allocation8], %s5486_s20 }
 0x632   : > { %p8659_p7 = scmp.ne.s32.totalorder %s8658_s22, 0 }
 0x634   : > { %p6333_p8 = pnand %p6340_p4, %p8659_p7 }
 0x636   : > { %7259 = dma.done.wait (!%p6333_p8), %s5487_s21, 2048  }
 0x637   : > { %7261 = vsyncadd (!%p6333_p8), %s5487_s21, 4294965248  ;;  %s8660_s16 = sld [smem:[#allocation16_spill]]  ;;  %s8661_s26 = sld [smem:[#allocation15_spill]] }
 0x638   : > { %s8662_s15 = sld [smem:[#allocation17_spill]]  ;;  %s8663_s13 = smov %s7268_s14 }
 0x63d   : > { %p22_p11 = scmp.ge.s32.totalorder %s8660_s16, 4   ;;  %s8664_s14 = smov %s8661_s26 }
 0x63f   :  { %24 = sbr.rel (!%p22_p11) target bundleno = 5 (0x5), region = 181 }
 0x646   :  { %5492 = vsyncpa [#allocation7], 1 }
 0x647   :  { %5494 = vsyncpa [#allocation7 + $0x1], 1 }
 0x648   :  { %5495 = vsyncpa [#allocation10], 1 }
 0x649   :  { %5496 = vsyncpa [#allocation8], 1 }
 0x64a   :  { %5498 = vsyncpa [#allocation8 + $0x1], 1 }

</bundles_post_ra>
